<compile_context>
chip_gen: v7x
topology: tpu7x:2x2x1
jax: 0.10.0
libtpu: 0.0.40
codegen_flags: <defaults>
</compile_context>

<pallas_src>
import functools

import jax
import jax.numpy as jnp
from jax import lax
from jax.experimental import pallas as pl
from jax.experimental.pallas import tpu as pltpu


# ---------------------------------------------------------------------------
# Kernel 1: fused  conv1 -> conv2 -> relu -> 2x2 maxpool   (one batch element)
# ---------------------------------------------------------------------------
def _conv_block_kernel(x_ref, w1_ref, b1_ref, w2_ref, b2_ref, o_ref, *, KH, KW):
    """x:(1,H,W,1)  w1:(KH*KW,C1)  b1:(1,C1)  w2:(KH*KW*C1,C2)  b2:(1,C2)
       o:(1,Hp,Wp,C2).  Valid convs, NHWC, pool 2x2 stride 2."""
    _, H, W, _ = x_ref.shape
    C1 = w1_ref.shape[1]
    C2 = w2_ref.shape[1]
    H1, W1 = H - KH + 1, W - KW + 1          # conv1 output
    H2, W2 = H1 - KH + 1, W1 - KW + 1        # conv2 output
    Hp, Wp = H2 // 2, W2 // 2                # pooled output

    x = x_ref[0]                             # (H, W, 1)
    w1 = w1_ref[...]                         # (KH*KW, C1)
    b1 = b1_ref[...]                         # (1, C1)
    b2 = b2_ref[...]                         # (1, C2)

    # ---- conv1 (Cin=1, NO relu): VPU broadcast MACs, bias hoisted into init.
    acc1 = jnp.broadcast_to(b1, (H1, W1, C1)).astype(jnp.float32)
    for t in range(KH * KW):
        di, dj = t // KW, t % KW
        acc1 = acc1 + x[di:di + H1, dj:dj + W1, :] * w1[t]

    # ---- conv2: im2col -> single MXU matmul with K = KH*KW*C1.
    cols = [acc1[t // KW:t // KW + H2, t % KW:t % KW + W2, :]
            for t in range(KH * KW)]
    patches = jnp.concatenate(cols, axis=2).reshape(H2 * W2, KH * KW * C1)
    conv2 = jnp.dot(patches, w2_ref[...], preferred_element_type=jnp.float32)
    conv2 = jnp.maximum(conv2 + b2, 0.0)     # bias + relu (single broadcast)

    # ---- 2x2 maxpool stride 2: contiguous reshapes + max, no strided reads.
    hmax = conv2.reshape(H2, Wp, 2, C2).max(axis=2)      # horizontal pairs
    pooled = hmax.reshape(Hp, 2, Wp, C2).max(axis=1)     # vertical pairs
    o_ref[0] = pooled.astype(o_ref.dtype)


# ---------------------------------------------------------------------------
# Kernel 2: K-tiled head  fc1 -> relu -> fc3 -> softmax
# ---------------------------------------------------------------------------
def _head_kernel(x_ref, w1_ref, b1_ref, w3_ref, b3_ref, o_ref, acc_ref):
    """grid = (K // tk,), K axis 'arbitrary'.
       x:(B,tk)  w1:(tk,H1)  b1:(1,H1)  w3:(H1,NO)  b3:(1,NO)  o:(B,NO)
       acc: VMEM (B,H1) f32 accumulator."""
    k = pl.program_id(0)

    @pl.when(k == 0)
    def _init():
        acc_ref[...] = jnp.zeros_like(acc_ref)

    acc_ref[...] += jnp.dot(x_ref[...], w1_ref[...],
                            preferred_element_type=jnp.float32)

    @pl.when(k == pl.num_programs(0) - 1)
    def _finalize():
        h = jnp.maximum(acc_ref[...] + b1_ref[...], 0.0)
        logits = jnp.dot(h, w3_ref[...],
                         preferred_element_type=jnp.float32) + b3_ref[...]
        m = jnp.max(logits, axis=1, keepdims=True)
        e = jnp.exp(logits - m)
        o_ref[...] = (e / jnp.sum(e, axis=1, keepdims=True)).astype(o_ref.dtype)


# ---------------------------------------------------------------------------
# Wrappers (BlockSpecs / grids / layout plumbing)
# ---------------------------------------------------------------------------
def conv_block_pallas(x_nhwc, w1_hwio, b1, w2_hwio, b2):
    B, H, W, Cin = x_nhwc.shape
    assert Cin == 1
    KH, KW, _, C1 = w1_hwio.shape
    _, _, _, C2 = w2_hwio.shape
    H1, W1 = H - KH + 1, W - KW + 1
    H2, W2 = H1 - KH + 1, W1 - KW + 1
    assert H2 % 2 == 0 and W2 % 2 == 0
    Hp, Wp = H2 // 2, W2 // 2

    kernel = functools.partial(_conv_block_kernel, KH=KH, KW=KW)
    return pl.pallas_call(
        kernel,
        out_shape=jax.ShapeDtypeStruct((B, Hp, Wp, C2), jnp.float32),
        grid=(B,),
        in_specs=[
            pl.BlockSpec((1, H, W, 1), lambda b: (b, 0, 0, 0)),
            pl.BlockSpec((KH * KW, C1), lambda b: (0, 0)),
            pl.BlockSpec((1, C1), lambda b: (0, 0)),
            pl.BlockSpec((KH * KW * C1, C2), lambda b: (0, 0)),
            pl.BlockSpec((1, C2), lambda b: (0, 0)),
        ],
        out_specs=pl.BlockSpec((1, Hp, Wp, C2), lambda b: (b, 0, 0, 0)),
        compiler_params=pltpu.CompilerParams(dimension_semantics=("parallel",)),
    )(x_nhwc,
      w1_hwio.reshape(KH * KW, C1),
      b1.reshape(1, C1),
      w2_hwio.reshape(KH * KW * C1, C2),
      b2.reshape(1, C2))


def _pick_k_tile(K, max_tile=1152):
    """Largest multiple of 128 that divides K (<= max_tile); else K itself."""
    best = K
    t = 128
    while t <= min(K, max_tile):
        if K % t == 0:
            best = t
        t += 128
    return best


def head_pallas(feat, wf1_k_by_h, bf1, wf3_h_by_o, bf3):
    B, K = feat.shape
    H1 = wf1_k_by_h.shape[1]
    NO = wf3_h_by_o.shape[1]
    tk = _pick_k_tile(K)
    return pl.pallas_call(
        _head_kernel,
        out_shape=jax.ShapeDtypeStruct((B, NO), jnp.float32),
        grid=(K // tk,),
        in_specs=[
            pl.BlockSpec((B, tk), lambda k: (0, k)),
            pl.BlockSpec((tk, H1), lambda k: (k, 0)),
            pl.BlockSpec((1, H1), lambda k: (0, 0)),
            pl.BlockSpec((H1, NO), lambda k: (0, 0)),
            pl.BlockSpec((1, NO), lambda k: (0, 0)),
        ],
        out_specs=pl.BlockSpec((B, NO), lambda k: (0, 0)),
        scratch_shapes=[pltpu.VMEM((B, H1), jnp.float32)],
        compiler_params=pltpu.CompilerParams(dimension_semantics=("arbitrary",)),
    )(feat, wf1_k_by_h, bf1.reshape(1, H1), wf3_h_by_o, bf3.reshape(1, NO))


def net_forward(x_nchw, p):
    B = x_nchw.shape[0]
    # NCHW -> NHWC.  Cin == 1, so this transpose moves a size-1 axis (free).
    x = jnp.transpose(x_nchw, (0, 2, 3, 1))
    w1_hwio = jnp.transpose(p["w1"], (2, 3, 1, 0))   # (KH,KW,1,32)
    w2_hwio = jnp.transpose(p["w2"], (2, 3, 1, 0))   # (KH,KW,32,64)

    pooled = conv_block_pallas(x, w1_hwio, p["b1"], w2_hwio, p["b2"])
    _, Hp, Wp, C2 = pooled.shape
    feat = pooled.reshape(B, -1)                     # NHWC flatten: free, no transpose

    # fc1 weight: permute ONCE from PyTorch's (C,H,W) flatten order to NHWC
    # order so the kernel never needs the old (0,3,1,2) activation transpose.
    wf1 = p["wf1"]                                   # (H1, C2*Hp*Wp)
    H1 = wf1.shape[0]
    wf1_nhwc_T = (wf1.reshape(H1, C2, Hp, Wp)
                     .transpose(0, 2, 3, 1)
                     .reshape(H1, Hp * Wp * C2)).T   # (K, H1)

    return head_pallas(feat, wf1_nhwc_T, p["bf1"], p["wf3"].T, p["bf3"])


# ---------------------------------------------------------------------------
# Pure-JAX reference (for correctness check only)
# ---------------------------------------------------------------------------
def reference_forward(x_nchw, p):
    dn = ("NCHW", "OIHW", "NCHW")
    y = lax.conv_general_dilated(x_nchw, p["w1"], (1, 1), "VALID",
                                 dimension_numbers=dn) + p["b1"][None, :, None, None]
    y = lax.conv_general_dilated(y, p["w2"], (1, 1), "VALID",
                                 dimension_numbers=dn) + p["b2"][None, :, None, None]
    y = jnp.maximum(y, 0.0)
    y = lax.reduce_window(y, -jnp.inf, lax.max, (1, 1, 2, 2), (1, 1, 2, 2), "VALID")
    y = y.reshape(y.shape[0], -1)
    y = jnp.maximum(y @ p["wf1"].T + p["bf1"], 0.0)
    return jax.nn.softmax(y @ p["wf3"].T + p["bf3"], axis=1)


def init_params(key, pooled_h, pooled_w):
    ks = jax.random.split(key, 8)
    k1 = 64 * pooled_h * pooled_w
    return {
        "w1": jax.random.normal(ks[0], (32, 1, 3, 3), jnp.float32) * 0.05,
        "b1": jax.random.normal(ks[1], (32,), jnp.float32) * 0.05,
        "w2": jax.random.normal(ks[2], (64, 32, 3, 3), jnp.float32) * 0.05,
        "b2": jax.random.normal(ks[3], (64,), jnp.float32) * 0.05,
        "wf1": jax.random.normal(ks[4], (128, k1), jnp.float32) * 0.02,
        "bf1": jax.random.normal(ks[5], (128,), jnp.float32) * 0.02,
        "wf3": jax.random.normal(ks[6], (5, 128), jnp.float32) * 0.05,
        "bf3": jax.random.normal(ks[7], (5,), jnp.float32) * 0.05,
    }


if __name__ == "__main__":
    B, H, W = 2, 16, 16                       # small stand-in for 200x200
    pooled_hw = ((H - 2) - 2) // 2            # conv1 -> conv2 -> pool
    x = jax.random.normal(jax.random.PRNGKey(0), (B, 1, H, W), jnp.float32)  # NCHW
    params = init_params(jax.random.PRNGKey(42), pooled_hw, pooled_hw)

    out = jax.block_until_ready(net_forward(x, params))

    ref = reference_forward(x, params)
    assert out.shape == (B, 5)
    assert float(jnp.max(jnp.abs(out - ref))) < 1e-4
    assert float(jnp.max(jnp.abs(jnp.sum(out, axis=1) - 1.0))) < 1e-5

    print("KERNEL_OK")
</pallas_src>

<mosaic_0001>
module attributes {stable_mosaic.version = 11 : i64} {
  func.func @_conv_block_kernel(%arg0: i32, %arg1: memref<1x16x16x1xf32, #tpu.memory_space<vmem>>, %arg2: memref<9x32xf32, #tpu.memory_space<vmem>>, %arg3: memref<1x32xf32, #tpu.memory_space<vmem>>, %arg4: memref<288x64xf32, #tpu.memory_space<vmem>>, %arg5: memref<1x64xf32, #tpu.memory_space<vmem>>, %arg6: memref<1x6x6x64xf32, #tpu.memory_space<vmem>>) attributes {dimension_semantics = [#tpu.dimension_semantics<parallel>], iteration_bounds = array<i64: 2>, scalar_prefetch = 0 : i64, scratch_operands = 0 : i64, tpu.core_type = #tpu.core_type<tc>, window_params = [{transform_indices = @transform_0, window_bounds = array<i64: 1, 16, 16, 1>}, {pipeline_mode = #tpu.pipeline_mode<synchronous>, transform_indices = @transform_1, window_bounds = array<i64: 9, 32>}, {pipeline_mode = #tpu.pipeline_mode<synchronous>, transform_indices = @transform_2, window_bounds = array<i64: 1, 32>}, {pipeline_mode = #tpu.pipeline_mode<synchronous>, transform_indices = @transform_3, window_bounds = array<i64: 288, 64>}, {pipeline_mode = #tpu.pipeline_mode<synchronous>, transform_indices = @transform_4, window_bounds = array<i64: 1, 64>}, {transform_indices = @transform_5, window_bounds = array<i64: 1, 6, 6, 64>}]} {
    %c0 = arith.constant 0 : index
    %c0_0 = arith.constant 0 : index
    %c0_1 = arith.constant 0 : index
    %c0_2 = arith.constant 0 : index
    %0 = vector.load %arg1[%c0, %c0_0, %c0_1, %c0_2] : memref<1x16x16x1xf32, #tpu.memory_space<vmem>>, vector<1x16x16x1xf32>
    %1 = vector.shape_cast %0 : vector<1x16x16x1xf32> to vector<16x16x1xf32>
    %c0_3 = arith.constant 0 : index
    %c0_4 = arith.constant 0 : index
    %2 = vector.load %arg2[%c0_3, %c0_4] : memref<9x32xf32, #tpu.memory_space<vmem>>, vector<9x32xf32>
    %c0_5 = arith.constant 0 : index
    %c0_6 = arith.constant 0 : index
    %3 = vector.load %arg3[%c0_5, %c0_6] : memref<1x32xf32, #tpu.memory_space<vmem>>, vector<1x32xf32>
    %c0_7 = arith.constant 0 : index
    %c0_8 = arith.constant 0 : index
    %4 = vector.load %arg5[%c0_7, %c0_8] : memref<1x64xf32, #tpu.memory_space<vmem>>, vector<1x64xf32>
    %5 = vector.shape_cast %3 : vector<1x32xf32> to vector<1x1x32xf32>
    %6 = vector.broadcast %5 : vector<1x1x32xf32> to vector<14x14x32xf32>
    %7 = vector.extract_strided_slice %1 {offsets = [0, 0, 0], sizes = [14, 14, 1], strides = [1, 1, 1]} : vector<16x16x1xf32> to vector<14x14x1xf32>
    %8 = vector.extract_strided_slice %2 {offsets = [0, 0], sizes = [1, 32], strides = [1, 1]} : vector<9x32xf32> to vector<1x32xf32>
    %9 = vector.shape_cast %8 : vector<1x32xf32> to vector<32xf32>
    %10 = vector.shape_cast %9 : vector<32xf32> to vector<1x1x32xf32>
    %11 = vector.broadcast %7 : vector<14x14x1xf32> to vector<14x14x32xf32>
    %12 = vector.broadcast %10 : vector<1x1x32xf32> to vector<14x14x32xf32>
    %13 = arith.mulf %11, %12 : vector<14x14x32xf32>
    %14 = arith.addf %6, %13 : vector<14x14x32xf32>
    %15 = vector.extract_strided_slice %1 {offsets = [0, 1, 0], sizes = [14, 14, 1], strides = [1, 1, 1]} : vector<16x16x1xf32> to vector<14x14x1xf32>
    %16 = vector.extract_strided_slice %2 {offsets = [1, 0], sizes = [1, 32], strides = [1, 1]} : vector<9x32xf32> to vector<1x32xf32>
    %17 = vector.shape_cast %16 : vector<1x32xf32> to vector<32xf32>
    %18 = vector.shape_cast %17 : vector<32xf32> to vector<1x1x32xf32>
    %19 = vector.broadcast %15 : vector<14x14x1xf32> to vector<14x14x32xf32>
    %20 = vector.broadcast %18 : vector<1x1x32xf32> to vector<14x14x32xf32>
    %21 = arith.mulf %19, %20 : vector<14x14x32xf32>
    %22 = arith.addf %14, %21 : vector<14x14x32xf32>
    %23 = vector.extract_strided_slice %1 {offsets = [0, 2, 0], sizes = [14, 14, 1], strides = [1, 1, 1]} : vector<16x16x1xf32> to vector<14x14x1xf32>
    %24 = vector.extract_strided_slice %2 {offsets = [2, 0], sizes = [1, 32], strides = [1, 1]} : vector<9x32xf32> to vector<1x32xf32>
    %25 = vector.shape_cast %24 : vector<1x32xf32> to vector<32xf32>
    %26 = vector.shape_cast %25 : vector<32xf32> to vector<1x1x32xf32>
    %27 = vector.broadcast %23 : vector<14x14x1xf32> to vector<14x14x32xf32>
    %28 = vector.broadcast %26 : vector<1x1x32xf32> to vector<14x14x32xf32>
    %29 = arith.mulf %27, %28 : vector<14x14x32xf32>
    %30 = arith.addf %22, %29 : vector<14x14x32xf32>
    %31 = vector.extract_strided_slice %1 {offsets = [1, 0, 0], sizes = [14, 14, 1], strides = [1, 1, 1]} : vector<16x16x1xf32> to vector<14x14x1xf32>
    %32 = vector.extract_strided_slice %2 {offsets = [3, 0], sizes = [1, 32], strides = [1, 1]} : vector<9x32xf32> to vector<1x32xf32>
    %33 = vector.shape_cast %32 : vector<1x32xf32> to vector<32xf32>
    %34 = vector.shape_cast %33 : vector<32xf32> to vector<1x1x32xf32>
    %35 = vector.broadcast %31 : vector<14x14x1xf32> to vector<14x14x32xf32>
    %36 = vector.broadcast %34 : vector<1x1x32xf32> to vector<14x14x32xf32>
    %37 = arith.mulf %35, %36 : vector<14x14x32xf32>
    %38 = arith.addf %30, %37 : vector<14x14x32xf32>
    %39 = vector.extract_strided_slice %1 {offsets = [1, 1, 0], sizes = [14, 14, 1], strides = [1, 1, 1]} : vector<16x16x1xf32> to vector<14x14x1xf32>
    %40 = vector.extract_strided_slice %2 {offsets = [4, 0], sizes = [1, 32], strides = [1, 1]} : vector<9x32xf32> to vector<1x32xf32>
    %41 = vector.shape_cast %40 : vector<1x32xf32> to vector<32xf32>
    %42 = vector.shape_cast %41 : vector<32xf32> to vector<1x1x32xf32>
    %43 = vector.broadcast %39 : vector<14x14x1xf32> to vector<14x14x32xf32>
    %44 = vector.broadcast %42 : vector<1x1x32xf32> to vector<14x14x32xf32>
    %45 = arith.mulf %43, %44 : vector<14x14x32xf32>
    %46 = arith.addf %38, %45 : vector<14x14x32xf32>
    %47 = vector.extract_strided_slice %1 {offsets = [1, 2, 0], sizes = [14, 14, 1], strides = [1, 1, 1]} : vector<16x16x1xf32> to vector<14x14x1xf32>
    %48 = vector.extract_strided_slice %2 {offsets = [5, 0], sizes = [1, 32], strides = [1, 1]} : vector<9x32xf32> to vector<1x32xf32>
    %49 = vector.shape_cast %48 : vector<1x32xf32> to vector<32xf32>
    %50 = vector.shape_cast %49 : vector<32xf32> to vector<1x1x32xf32>
    %51 = vector.broadcast %47 : vector<14x14x1xf32> to vector<14x14x32xf32>
    %52 = vector.broadcast %50 : vector<1x1x32xf32> to vector<14x14x32xf32>
    %53 = arith.mulf %51, %52 : vector<14x14x32xf32>
    %54 = arith.addf %46, %53 : vector<14x14x32xf32>
    %55 = vector.extract_strided_slice %1 {offsets = [2, 0, 0], sizes = [14, 14, 1], strides = [1, 1, 1]} : vector<16x16x1xf32> to vector<14x14x1xf32>
    %56 = vector.extract_strided_slice %2 {offsets = [6, 0], sizes = [1, 32], strides = [1, 1]} : vector<9x32xf32> to vector<1x32xf32>
    %57 = vector.shape_cast %56 : vector<1x32xf32> to vector<32xf32>
    %58 = vector.shape_cast %57 : vector<32xf32> to vector<1x1x32xf32>
    %59 = vector.broadcast %55 : vector<14x14x1xf32> to vector<14x14x32xf32>
    %60 = vector.broadcast %58 : vector<1x1x32xf32> to vector<14x14x32xf32>
    %61 = arith.mulf %59, %60 : vector<14x14x32xf32>
    %62 = arith.addf %54, %61 : vector<14x14x32xf32>
    %63 = vector.extract_strided_slice %1 {offsets = [2, 1, 0], sizes = [14, 14, 1], strides = [1, 1, 1]} : vector<16x16x1xf32> to vector<14x14x1xf32>
    %64 = vector.extract_strided_slice %2 {offsets = [7, 0], sizes = [1, 32], strides = [1, 1]} : vector<9x32xf32> to vector<1x32xf32>
    %65 = vector.shape_cast %64 : vector<1x32xf32> to vector<32xf32>
    %66 = vector.shape_cast %65 : vector<32xf32> to vector<1x1x32xf32>
    %67 = vector.broadcast %63 : vector<14x14x1xf32> to vector<14x14x32xf32>
    %68 = vector.broadcast %66 : vector<1x1x32xf32> to vector<14x14x32xf32>
    %69 = arith.mulf %67, %68 : vector<14x14x32xf32>
    %70 = arith.addf %62, %69 : vector<14x14x32xf32>
    %71 = vector.extract_strided_slice %1 {offsets = [2, 2, 0], sizes = [14, 14, 1], strides = [1, 1, 1]} : vector<16x16x1xf32> to vector<14x14x1xf32>
    %72 = vector.extract_strided_slice %2 {offsets = [8, 0], sizes = [1, 32], strides = [1, 1]} : vector<9x32xf32> to vector<1x32xf32>
    %73 = vector.shape_cast %72 : vector<1x32xf32> to vector<32xf32>
    %74 = vector.shape_cast %73 : vector<32xf32> to vector<1x1x32xf32>
    %75 = vector.broadcast %71 : vector<14x14x1xf32> to vector<14x14x32xf32>
    %76 = vector.broadcast %74 : vector<1x1x32xf32> to vector<14x14x32xf32>
    %77 = arith.mulf %75, %76 : vector<14x14x32xf32>
    %78 = arith.addf %70, %77 : vector<14x14x32xf32>
    %79 = vector.extract_strided_slice %78 {offsets = [0, 0, 0], sizes = [12, 12, 32], strides = [1, 1, 1]} : vector<14x14x32xf32> to vector<12x12x32xf32>
    %80 = vector.extract_strided_slice %78 {offsets = [0, 1, 0], sizes = [12, 12, 32], strides = [1, 1, 1]} : vector<14x14x32xf32> to vector<12x12x32xf32>
    %81 = vector.extract_strided_slice %78 {offsets = [0, 2, 0], sizes = [12, 12, 32], strides = [1, 1, 1]} : vector<14x14x32xf32> to vector<12x12x32xf32>
    %82 = vector.extract_strided_slice %78 {offsets = [1, 0, 0], sizes = [12, 12, 32], strides = [1, 1, 1]} : vector<14x14x32xf32> to vector<12x12x32xf32>
    %83 = vector.extract_strided_slice %78 {offsets = [1, 1, 0], sizes = [12, 12, 32], strides = [1, 1, 1]} : vector<14x14x32xf32> to vector<12x12x32xf32>
    %84 = vector.extract_strided_slice %78 {offsets = [1, 2, 0], sizes = [12, 12, 32], strides = [1, 1, 1]} : vector<14x14x32xf32> to vector<12x12x32xf32>
    %85 = vector.extract_strided_slice %78 {offsets = [2, 0, 0], sizes = [12, 12, 32], strides = [1, 1, 1]} : vector<14x14x32xf32> to vector<12x12x32xf32>
    %86 = vector.extract_strided_slice %78 {offsets = [2, 1, 0], sizes = [12, 12, 32], strides = [1, 1, 1]} : vector<14x14x32xf32> to vector<12x12x32xf32>
    %87 = vector.extract_strided_slice %78 {offsets = [2, 2, 0], sizes = [12, 12, 32], strides = [1, 1, 1]} : vector<14x14x32xf32> to vector<12x12x32xf32>
    %88 = tpu.concatenate %79, %80, %81, %82, %83, %84, %85, %86, %87 in 2 : vector<12x12x32xf32>, vector<12x12x32xf32>, vector<12x12x32xf32>, vector<12x12x32xf32>, vector<12x12x32xf32>, vector<12x12x32xf32>, vector<12x12x32xf32>, vector<12x12x32xf32>, vector<12x12x32xf32> -> vector<12x12x288xf32>
    %89 = vector.shape_cast %88 : vector<12x12x288xf32> to vector<144x288xf32>
    %c0_9 = arith.constant 0 : index
    %c0_10 = arith.constant 0 : index
    %90 = vector.load %arg4[%c0_9, %c0_10] : memref<288x64xf32, #tpu.memory_space<vmem>>, vector<288x64xf32>
    %cst = arith.constant dense<0.000000e+00> : vector<144x64xf32>
    %91 = tpu.matmul %89, %90, %cst {dimension_numbers = #tpu.dot_dimension_numbers<[1], [0], [0], [1], [0, 0, 1, 1], [], []>} : vector<144x288xf32>, vector<288x64xf32>, vector<144x64xf32> -> vector<144x64xf32>
    %92 = vector.broadcast %4 : vector<1x64xf32> to vector<144x64xf32>
    %93 = arith.addf %91, %92 : vector<144x64xf32>
    %cst_11 = arith.constant 0.000000e+00 : f32
    %94 = vector.broadcast %cst_11 : f32 to vector<144x64xf32>
    %95 = arith.maximumf %93, %94 : vector<144x64xf32>
    %96 = vector.shape_cast %95 : vector<144x64xf32> to vector<12x6x2x64xf32>
    %cst_12 = arith.constant dense<0xFF800000> : vector<12x6x64xf32>
    %97 = vector.multi_reduction <maximumf>, %96, %cst_12 [2] : vector<12x6x2x64xf32> to vector<12x6x64xf32>
    %98 = vector.shape_cast %97 : vector<12x6x64xf32> to vector<6x2x6x64xf32>
    %cst_13 = arith.constant dense<0xFF800000> : vector<6x6x64xf32>
    %99 = vector.multi_reduction <maximumf>, %98, %cst_13 [1] : vector<6x2x6x64xf32> to vector<6x6x64xf32>
    %c0_14 = arith.constant 0 : index
    %c0_15 = arith.constant 0 : index
    %c0_16 = arith.constant 0 : index
    %c0_17 = arith.constant 0 : index
    %100 = vector.load %arg6[%c0_14, %c0_15, %c0_16, %c0_17] : memref<1x6x6x64xf32, #tpu.memory_space<vmem>>, vector<1x6x6x64xf32>
    %101 = vector.shape_cast %100 : vector<1x6x6x64xf32> to vector<6x6x64xf32>
    %102 = vector.shape_cast %99 : vector<6x6x64xf32> to vector<1x6x6x64xf32>
    tpu.vector_store %arg6[%c0_14, %c0_15, %c0_16, %c0_17], %102 {strides = array<i32>} : memref<1x6x6x64xf32, #tpu.memory_space<vmem>>, vector<1x6x6x64xf32>,
    return
  }
  func.func @transform_0(%arg0: i32) -> (i32, i32, i32, i32) {
    %c0_i32 = arith.constant 0 : i32
    %c0_i32_0 = arith.constant 0 : i32
    %c0_i32_1 = arith.constant 0 : i32
    %c0_i32_2 = arith.constant 0 : i32
    return %arg0, %c0_i32, %c0_i32_0, %c0_i32_1 : i32, i32, i32, i32
  }
  func.func @transform_1(%arg0: i32) -> (i32, i32) {
    %c0_i32 = arith.constant 0 : i32
    %c0_i32_0 = arith.constant 0 : i32
    %c0_i32_1 = arith.constant 0 : i32
    return %c0_i32, %c0_i32_0 : i32, i32
  }
  func.func @transform_2(%arg0: i32) -> (i32, i32) {
    %c0_i32 = arith.constant 0 : i32
    %c0_i32_0 = arith.constant 0 : i32
    %c0_i32_1 = arith.constant 0 : i32
    return %c0_i32, %c0_i32_0 : i32, i32
  }
  func.func @transform_3(%arg0: i32) -> (i32, i32) {
    %c0_i32 = arith.constant 0 : i32
    %c0_i32_0 = arith.constant 0 : i32
    %c0_i32_1 = arith.constant 0 : i32
    return %c0_i32, %c0_i32_0 : i32, i32
  }
  func.func @transform_4(%arg0: i32) -> (i32, i32) {
    %c0_i32 = arith.constant 0 : i32
    %c0_i32_0 = arith.constant 0 : i32
    %c0_i32_1 = arith.constant 0 : i32
    return %c0_i32, %c0_i32_0 : i32, i32
  }
  func.func @transform_5(%arg0: i32) -> (i32, i32, i32, i32) {
    %c0_i32 = arith.constant 0 : i32
    %c0_i32_0 = arith.constant 0 : i32
    %c0_i32_1 = arith.constant 0 : i32
    %c0_i32_2 = arith.constant 0 : i32
    return %arg0, %c0_i32, %c0_i32_0, %c0_i32_1 : i32, i32, i32, i32
  }
}

</mosaic_0001>

<bundles_post_ra>
// kernel: tpu_custom_call.1
= control target key start
LH: loop header
LB: loop body
LE: loop exit
PB: predicated region body
PF: predicated region fallthrough
CT: control target
= control target key end

     0   :  { %s4367_s18 = smov 0   ;;  %s7031_s0 = inlined_call_operand.vmem [shape: f32[2,16,16,1], index: 0, kind: input, shape index: {}]   ;;  %s7032_s1 = inlined_call_operand.vmem [shape: f32[9,32], index: 1, kind: input, shape index: {}]   ;;  %s7033_s2 = inlined_call_operand.vmem [shape: f32[1,32], index: 2, kind: input, shape index: {}]   ;;  %s7034_s3 = inlined_call_operand.vmem [shape: f32[288,64], index: 3, kind: input, shape index: {}]   ;;  %s7035_s4 = inlined_call_operand.vmem [shape: f32[1,64], index: 4, kind: input, shape index: {}]   ;;  %s7036_s5 = inlined_call_operand.vmem [shape: f32[2,6,6,64], index: 5, kind: output, shape index: {}]  }
   0x1 LB: > { %s4012_s19 = sadd.s32 4294967295, %s4329_s18   ;;  %p4016_p0 = scmp.ge.s32.totalorder %s4329_s18, 1  ;;  %s4329_s18 = sphi %s4367_s18, %s15_s18  }
   0x2   : > { %p187_p1 = scmp.lt.s32.totalorder %s4329_s18, 3 }
   0x4   : > { %p188_p2 = pnand %p4016_p0, %p187_p1 }
   0x6   : > { %191 = sbr.rel (%p188_p2) target bundleno = 918 (0x396), region = 40 }
   0xd   : > { %p215_p3 = scmp.lt.s32.totalorder %s4012_s19, 1  ;;  %v4331_v0 = vmov 0   ;;  %v407_v33 = vlaneseq  ;;  %v4421_v36 = vld [vmem:[%s7032_s1] sm:$0xff]  ;;  %vm527_vm0 = vcmask 1046528   ;;  %vm686_vm1 = vcmask 1045504   ;;  %s4332_s30 = smov 96  }
   0xe   : > { %4229 = vset.pattern.permute.xlu1 %v4331_v0  ;;  %4228 = vset.pattern.permute.xlu0 %v4331_v0  ;;  %v4451_v49 = vld [vmem:[%s7033_s2] ss:$0 sm:$0xff]  ;;  %s4333_s6 = smov 64   ;;  %s4334_s7 = smov 32   ;;  %vm2125_vm2 = vcmask 261120   ;;  %vm2150_vm3 = vcmask 523264  }
   0xf   : > { %s7422_s19 = smov (!%p215_p3, %s4012_s19), 1  ;;  %v4415_v34 = vshrl.u32 %v407_v33, 7  ;;  %vm2175_vm4 = vcmask 785408   ;;  %vm3260_vm5 = vcmask 517120   ;;  %vm3909_vm6 = vcmask 1041409  }
  0x10   : > { %s4067_s20 = sshll.u32 %s7422_s19, 8  ;;  %vm3911_vm7 = vcmask 1042434   ;;  %vm3913_vm8 = vcmask 1043459   ;;  %vm3915_vm9 = vcmask 1044484   ;;  %vm3917_vm10 = vcmask 1045509  }
  0x11   : > { %s4381_s23 = scalar_lea.vmem %s7031_s0, %s4067_s20  ;;  %7182 = vst [vmem:[#allocation2_spill] sm:$0xff] %v4415_v34  ;;  %v469_v35 = vsub.s32 1, %v4415_v34  ;;  %v409_v37 = vsub.s32 0, %v4415_v34  ;;  %v628_v38 = vsub.s32 2, %v4415_v34  ;;  %vm3950_vm11 = vcmask 521216  }
  0x12   : > { %v227_v1 = vld [vmem:[%s4381_s23 + $0x10] sm:$0xff]  ;;  %v225_v2 = vld [vmem:[%s4381_s23] sm:$0xff]  ;;  %v228_v3 = vld [vmem:[%s4381_s23 + $0x18] sm:$0xff] }
  0x13   : > { %279 = vperm.xlu0 %4228, %v227_v1   ;;  %269 = vperm.xlu1 %4229, %v225_v2   ;;  %v226_v4 = vld [vmem:[%s4381_s23 + $0x8] sm:$0xff]  ;;  %v229_v5 = vld [vmem:[%s4381_s23 + $0x20] sm:$0xff]  ;;  %v243_v7 = vld [vmem:[%s4381_s23 + $0x90] sm:$0xff]  ;;  %v4426_v39 = vrot.slane %v4421_v36, %v469_v35  ;;  %v4429_v40 = vrot.slane %v4421_v36, %v409_v37  ;;  %v4436_v43 = vrot.slane %v4421_v36, %v628_v38  ;;  %v857_v2 = vsub.s32 4, %v4415_v34 }
  0x14   : > { %v230_v6 = vld [vmem:[%s4381_s23 + $0x28] sm:$0xff]  ;;  %v244_v8 = vld [vmem:[%s4381_s23 + $0x98] sm:$0xff]  ;;  %v245_v9 = vld [vmem:[%s4381_s23 + $0xa0] sm:$0xff] }
  0x15   : > { %v246_v10 = vld [vmem:[%s4381_s23 + $0xa8] sm:$0xff]  ;;  %v231_v11 = vld [vmem:[%s4381_s23 + $0x30] sm:$0xff]  ;;  %v232_v12 = vld [vmem:[%s4381_s23 + $0x38] sm:$0xff] }
  0x16   : > { %v247_v13 = vld [vmem:[%s4381_s23 + $0xb0] sm:$0xff]  ;;  %v248_v14 = vld [vmem:[%s4381_s23 + $0xb8] sm:$0xff]  ;;  %v233_v15 = vld [vmem:[%s4381_s23 + $0x40] sm:$0xff] }
  0x17   : > { %284 = vperm.xlu0 %4228, %v228_v3   ;;  %274 = vperm.xlu1 %4229, %v226_v4   ;;  %v234_v16 = vld [vmem:[%s4381_s23 + $0x48] sm:$0xff]  ;;  %v249_v17 = vld [vmem:[%s4381_s23 + $0xc0] sm:$0xff]  ;;  %v251_v19 = vld [vmem:[%s4381_s23 + $0xd0] sm:$0xff] }
  0x18   : > { %v250_v18 = vld [vmem:[%s4381_s23 + $0xc8] sm:$0xff]  ;;  %v252_v20 = vld [vmem:[%s4381_s23 + $0xd8] sm:$0xff]  ;;  %v235_v21 = vld [vmem:[%s4381_s23 + $0x50] sm:$0xff] }
  0x19   : > { %v236_v22 = vld [vmem:[%s4381_s23 + $0x58] sm:$0xff]  ;;  %v253_v23 = vld [vmem:[%s4381_s23 + $0xe0] sm:$0xff]  ;;  %v254_v24 = vld [vmem:[%s4381_s23 + $0xe8] sm:$0xff] }
  0x1a   : > { %v237_v25 = vld [vmem:[%s4381_s23 + $0x60] sm:$0xff]  ;;  %v238_v26 = vld [vmem:[%s4381_s23 + $0x68] sm:$0xff]  ;;  %v255_v27 = vld [vmem:[%s4381_s23 + $0xf0] sm:$0xff] }
  0x1b   : > { %289 = vperm.xlu0 %4228, %v229_v5   ;;  %294 = vperm.xlu1 %4229, %v230_v6   ;;  %v256_v28 = vld [vmem:[%s4381_s23 + $0xf8] sm:$0xff]  ;;  %v239_v29 = vld [vmem:[%s4381_s23 + $0x70] sm:$0xff]  ;;  %v241_v31 = vld [vmem:[%s4381_s23 + $0x80] sm:$0xff]  ;;  %v797_v6 = vsub.s32 3, %v4415_v34 }
  0x1c   : > { %v240_v30 = vld [vmem:[%s4381_s23 + $0x78] sm:$0xff]  ;;  %v242_v32 = vld [vmem:[%s4381_s23 + $0x88] sm:$0xff] }
  0x1f   : > { %359 = vperm.xlu0 %4228, %v243_v7   ;;  %364 = vperm.xlu1 %4229, %v244_v8   ;;  %v4483_v8 = vrot.slane %v4421_v36, %v857_v2 }
  0x23   : > { %369 = vperm.xlu0 %4228, %v245_v9   ;;  %374 = vperm.xlu1 %4229, %v246_v10  }
  0x27   : > { %299 = vperm.xlu0 %4228, %v231_v11   ;;  %304 = vperm.xlu1 %4229, %v232_v12  }
  0x2b   : > { %379 = vperm.xlu0 %4228, %v247_v13   ;;  %384 = vperm.xlu1 %4229, %v248_v14   ;;  %v1015_v13 = vsub.s32 5, %v4415_v34  ;;  %v4496_v14 = vrot.slane %v4421_v36, %v797_v6 }
  0x2f   : > { %309 = vperm.xlu0 %4228, %v233_v15   ;;  %314 = vperm.xlu1 %4229, %v234_v16  }
  0x33   : > { %389 = vperm.xlu0 %4228, %v249_v17   ;;  %394 = vperm.xlu1 %4229, %v250_v18   ;;  %v1243_v18 = vsub.s32 7, %v4415_v34 }
  0x37   : > { %399 = vperm.xlu0 %4228, %v251_v19   ;;  %404 = vperm.xlu1 %4229, %v252_v20  }
  0x3b   : > { %319 = vperm.xlu0 %4228, %v235_v21   ;;  %324 = vperm.xlu1 %4229, %v236_v22  }
  0x3f   : > { %787 = vperm.xlu0 %4228, %v253_v23   ;;  %792 = vperm.xlu1 %4229, %v254_v24   ;;  %v4513_v23 = vrot.slane %v4421_v36, %v1015_v13  ;;  %v1183_v24 = vsub.s32 6, %v4415_v34 }
  0x41   : > { %v4533_v35 = vrot.slane %v4421_v36, %v1183_v24 }
  0x43   : > { %329 = vperm.xlu0 %4228, %v237_v25   ;;  %334 = vperm.xlu1 %4229, %v238_v26  }
  0x47   : > { %1173 = vperm.xlu0 %4228, %v255_v27   ;;  %1178 = vperm.xlu1 %4229, %v256_v28  }
  0x4b   : > { %339 = vperm.xlu0 %4228, %v239_v29   ;;  %344 = vperm.xlu1 %4229, %v240_v30   ;;  %v4526_v29 = vrot.slane %v4421_v36, %v1243_v18 }
  0x4f   : > { %349 = vperm.xlu0 %4228, %v241_v31   ;;  %354 = vperm.xlu1 %4229, %v242_v32  }
  0x92   : > { %v4431_v41 = vpop.permute.xlu0 %279  ;;  %v4433_v42 = vpop.permute.xlu1 %269 }
  0x93   : > { %v473_v44 = vmul.f32 %v4426_v39, %v4431_v41  ;;  %v413_v45 = vmul.f32 %v4429_v40, %v4431_v41  ;;  %v632_v46 = vmul.f32 %v4436_v43, %v4431_v41 }
  0x95   : > { %v531_v50 = vrot.slane %v473_v44, 1  ;;  %v441_v53 = vadd.f32 %v4451_v49, %v413_v45  ;;  %v690_v54 = vrot.slane %v632_v46, 2  ;;  %v4548_v46 = vld [vmem:[%s7032_s1 + $0x8] ss:$0 sm:$0xff] }
  0x96   : > { %v4444_v47 = vpop.permute.xlu0 %284  ;;  %v4446_v48 = vpop.permute.xlu1 %274 }
  0x97   : > { %v474_v51 = vmul.f32 %v4426_v39, %v4444_v47  ;;  %v633_v52 = vmul.f32 %v4436_v43, %v4444_v47  ;;  %v414_v9 = vmul.f32 %v4429_v40, %v4444_v47 }
  0x99   : > { %v532_v55 = vrot.slane %v474_v51, 1  ;;  %v691_v56 = vrot.slane %v633_v52, 2  ;;  %v442_v19 = vadd.f32 %v4451_v49, %v414_v9 }
  0x9a   : > { %v4458_v57 = vpop.permute.xlu1 %294  ;;  %v4466_v0 = vpop.permute.xlu0 %289 }
  0x9b   : > { %7183 = vst [vmem:[#allocation3_spill] sm:$0xff] %v4458_v57  ;;  %v533_v58 = vsel %vm527_vm0, %v531_v50, %v532_v55  ;;  %v692_v60 = vsel %vm686_vm1, %v690_v54, %v691_v56  ;;  %7186 = vst [vmem:[#allocation6_spill] sm:$0xff] %v4466_v0  ;;  %v601_v30 = vadd.f32 %v532_v55, %v442_v19 }
  0x9c   : > { %v600_v59 = vadd.f32 %v533_v58, %v441_v53  ;;  %v861_v33 = vmul.f32 %v4483_v8, %v4466_v0  ;;  %v862_v38 = vmul.f32 %v4483_v8, %v4458_v57  ;;  %v801_v45 = vmul.f32 %v4496_v14, %v4466_v0 }
  0x9d   : > { %v760_v53 = vadd.f32 %v691_v56, %v601_v30  ;;  %v1019_v58 = vmul.f32 %v4513_v23, %v4466_v0  ;;  %v1020_v2 = vmul.f32 %v4513_v23, %v4458_v57  ;;  %v802_v56 = vmul.f32 %v4496_v14, %v4458_v57 }
  0x9e   : > { %v759_v61 = vadd.f32 %v692_v60, %v600_v59  ;;  %v4462_v62 = vpop.permute.xlu1 %364  ;;  %v4471_v3 = vpop.permute.xlu0 %359  ;;  %v918_v51 = vrot.slane %v861_v33, 1  ;;  %v919_v52 = vrot.slane %v862_v38, 1  ;;  %v4582_v30 = vmul.f32 %v4483_v8, %v4431_v41 }
  0x9f   : > { %7184 = vst [vmem:[#allocation4_spill] sm:$0xff] %v4462_v62  ;;  %7187 = vst [vmem:[#allocation7_spill] sm:$0xff] %v4471_v3  ;;  %v1076_v18 = vrot.slane %v1019_v58, 2  ;;  %v4590_v38 = vmul.f32 %v4513_v23, %v4431_v41 }
  0xa0   : > { %v829_v55 = vadd.f32 %v801_v45, %v759_v61  ;;  %v920_v9 = vsel %vm527_vm0, %v918_v51, %v919_v52  ;;  %7193 = vst [vmem:[#allocation13_spill] sm:$0xff] %v4582_v30  ;;  %v471_v51 = vmul.f32 %v4426_v39, %v4433_v42 }
  0xa1   : > { %7194 = vst [vmem:[#allocation14_spill] sm:$0xff] %v4590_v38 }
  0xa2   : > { %v4464_v63 = vpop.permute.xlu1 %374  ;;  %v4498_v15 = vpop.permute.xlu0 %369  ;;  %v987_v13 = vadd.f32 %v920_v9, %v829_v55 }
  0xa3   : > { %7185 = vst [vmem:[#allocation5_spill] sm:$0xff] %v4464_v63  ;;  %v432_v4 = vmul.f32 %v4429_v40, %v4464_v63  ;;  %v4480_v7 = vmul.f32 %v4426_v39, %v4464_v63  ;;  %v4492_v12 = vmul.f32 %v4436_v43, %v4464_v63 }
  0xa5   : > { %v460_v11 = vadd.f32 %v4451_v49, %v432_v4  ;;  %v7042_v16 = vrot.slane %v4480_v7, 1  ;;  %v7041_v21 = vrot.slane %v4492_v12, 2 }
  0xa6   : > { %v4468_v1 = vpop.permute.xlu1 %304  ;;  %v4528_v31 = vpop.permute.xlu0 %299 }
  0xa7   : > { %v619_v20 = vadd.f32 %v7042_v16, %v460_v11  ;;  %7190 = vst [vmem:[#allocation10_spill] sm:$0xff] %v4528_v31  ;;  %v830_v11 = vadd.f32 %v802_v56, %v760_v53  ;;  %v1248_v24 = vmul.f32 %v4526_v29, %v4468_v1  ;;  %v1406_v33 = vmul.f32 %v4548_v46, %v4468_v1 }
  0xa8   : > { %v1188_v58 = vmul.f32 %v4533_v35, %v4468_v1 }
  0xa9   : > { %v778_v26 = vadd.f32 %v7041_v21, %v619_v20  ;;  %v1077_v20 = vrot.slane %v1020_v2, 2  ;;  %v988_v55 = vadd.f32 %v919_v52, %v830_v11  ;;  %v1463_v11 = vrot.slane %v1406_v33, 2 }
  0xaa   : > { %v4475_v5 = vpop.permute.xlu1 %384  ;;  %v4564_v4 = vpop.permute.xlu0 %379 }
  0xab   : > { %7188 = vst [vmem:[#allocation8_spill] sm:$0xff] %v4475_v5  ;;  %v4503_v17 = vmul.f32 %v4483_v8, %v4475_v5  ;;  %v820_v22 = vmul.f32 %v4496_v14, %v4475_v5  ;;  %v4523_v28 = vmul.f32 %v4513_v23, %v4475_v5  ;;  %v434_v45 = vmul.f32 %v4429_v40, %v4475_v5 }
  0xac   : > { %v1078_v2 = vsel %vm686_vm1, %v1076_v18, %v1077_v20  ;;  %v630_v18 = vmul.f32 %v4436_v43, %v4433_v42 }
  0xad   : > { %v7040_v27 = vrot.slane %v4503_v17, 1  ;;  %v848_v32 = vadd.f32 %v820_v22, %v778_v26  ;;  %v7039_v36 = vrot.slane %v4523_v28, 2  ;;  %v1247_v22 = vmul.f32 %v4526_v29, %v4528_v31 }
  0xae   : > { %v4487_v10 = vpop.permute.xlu1 %314  ;;  %v4578_v26 = vmul.f32 %v4496_v14, %v4431_v41  ;;  %v4602_v53 = vpop.permute.xlu0 %309  ;;  %v1187_v41 = vmul.f32 %v4533_v35, %v4528_v31  ;;  %v1145_v9 = vadd.f32 %v1078_v2, %v987_v13  ;;  %v412_v13 = vmul.f32 %v4429_v40, %v4446_v48 }
  0xaf   : > { %7189 = vst [vmem:[#allocation9_spill] sm:$0xff] %v4487_v10  ;;  %v1006_v44 = vadd.f32 %v7040_v27, %v848_v32  ;;  %v1405_v32 = vmul.f32 %v4548_v46, %v4528_v31  ;;  %v1304_v56 = vrot.slane %v1247_v22, 1  ;;  %v4621_v27 = vmul.f32 %v4436_v43, %v4475_v5 }
  0xb0   : > { %7192 = vst [vmem:[#allocation12_spill] sm:$0xff] %v4578_v26  ;;  %v440_v16 = vadd.f32 %v4451_v49, %v412_v13 }
  0xb1   : > { %v1164_v59 = vadd.f32 %v7039_v36, %v1006_v44  ;;  %v411_v44 = vmul.f32 %v4429_v40, %v4433_v42  ;;  %v1462_v52 = vrot.slane %v1405_v32, 2  ;;  %v4617_v36 = vmul.f32 %v4426_v39, %v4475_v5  ;;  %7197 = vst [vmem:[#allocation17_spill] sm:$0xff] %v4621_v27 }
  0xb2   : > { %v4516_v25 = vpop.permute.xlu1 %394  ;;  %v4633_v32 = vmul.f32 %v4483_v8, %v4444_v47  ;;  %v4747_v5 = vmul.f32 %v4513_v23, %v4487_v10 }
  0xb3   : > { %v4537_v37 = vmul.f32 %v4526_v29, %v4516_v25  ;;  %v1206_v50 = vmul.f32 %v4533_v35, %v4516_v25  ;;  %v4555_v54 = vmul.f32 %v4548_v46, %v4516_v25  ;;  %7196 = vst [vmem:[#allocation16_spill] sm:$0xff] %v4617_v36  ;;  %v7044_v33 = vrot.slane %v4617_v36, 1 }
  0xb4   : > { %v822_v21 = vmul.f32 %v4496_v14, %v4516_v25  ;;  %v439_v13 = vadd.f32 %v4451_v49, %v411_v44 }
  0xb5   : > { %7191 = vst [vmem:[#allocation11_spill] sm:$0xff] %v4555_v54  ;;  %v7038_v60 = vrot.slane %v4537_v37, 1  ;;  %v1234_v6 = vadd.f32 %v1206_v50, %v1164_v59  ;;  %v7037_v61 = vrot.slane %v4555_v54, 2  ;;  %v472_v59 = vmul.f32 %v4426_v39, %v4446_v48 }
  0xb7   : > { %v1392_v19 = vadd.f32 %v7038_v60, %v1234_v6  ;;  %v1305_v6 = vrot.slane %v1248_v24, 1  ;;  %v462_v60 = vadd.f32 %v4451_v49, %v434_v45  ;;  %v4629_v24 = vmul.f32 %v4513_v23, %v4444_v47 }
  0xb8   : > { %v4638_v45 = vmul.f32 %v4483_v8, %v4516_v25  ;;  %v529_v42 = vrot.slane %v472_v59, 1 }
  0xb9   : > { %v4598_v50 = vadd.f32 %v7037_v61, %v1392_v19  ;;  %v1146_v19 = vadd.f32 %v1077_v20, %v988_v55  ;;  %v1306_v61 = vsel %vm527_vm0, %v1304_v56, %v1305_v6  ;;  %v1215_v20 = vadd.f32 %v1187_v41, %v1145_v9  ;;  %7198 = vst [vmem:[#allocation18_spill] sm:$0xff] %v4629_v24  ;;  %v4642_v41 = vpop.permute.xlu0 %389 }
  0xba   : > { %7199 = vst [vmem:[#allocation19_spill] sm:$0xff] %v4638_v45  ;;  %v631_v55 = vmul.f32 %v4436_v43, %v4446_v48  ;;  %v1464_v56 = vsel %vm686_vm1, %v1462_v52, %v1463_v11  ;;  %v621_v9 = vadd.f32 %v7044_v33, %v462_v60  ;;  %v4657_v48 = vmul.f32 %v4513_v23, %v4516_v25  ;;  %v4661_v60 = vpop.permute.xlu1 %404 }
  0xbb   : > { %7195 = vst [vmem:[#allocation15_spill] sm:$0xff] %v4598_v50  ;;  %1837 = vrot.lane.b32.xlu0 %v4598_v50, %s4332_s30  ;;  %v1216_v22 = vadd.f32 %v1188_v58, %v1146_v19  ;;  %v1373_v58 = vadd.f32 %v1306_v61, %v1215_v20  ;;  %v7045_v19 = vrot.slane %v4621_v27, 2  ;;  %v528_v61 = vrot.slane %v471_v51, 1 }
  0xbc   : > { %7202 = vst [vmem:[#allocation22_spill] sm:$0xff] %v4657_v48  ;;  %v7046_v20 = vrot.slane %v4638_v45, 1 }
  0xbd   : > { %v1374_v2 = vadd.f32 %v1305_v6, %v1216_v22  ;;  %v4651_v59 = vadd.f32 %v1464_v56, %v1373_v58  ;;  %v418_v6 = vmul.f32 %v4429_v40, %v4468_v1  ;;  %v780_v52 = vadd.f32 %v7045_v19, %v621_v9  ;;  %v4678_v44 = vpop.permute.xlu0 %399 }
  0xbe   : > { %v687_v22 = vrot.slane %v630_v18, 2  ;;  %v688_v58 = vrot.slane %v631_v55, 2  ;;  %v530_v56 = vsel %vm527_vm0, %v528_v61, %v529_v42  ;;  %v599_v9 = vadd.f32 %v529_v42, %v440_v16  ;;  %v4720_v38 = vpop.permute.xlu1 %324 }
  0xbf   : > { %7200 = vst [vmem:[#allocation20_spill] sm:$0xff] %v4651_v59  ;;  %v4653_v34 = vadd.f32 %v1463_v11, %v1374_v2  ;;  %v800_v11 = vmul.f32 %v4496_v14, %v4444_v47  ;;  %v850_v33 = vadd.f32 %v822_v21, %v780_v52  ;;  %v4676_v19 = vmul.f32 %v4429_v40, %v4466_v0 }
  0xc0   : > { %v7048_v47 = vrot.slane %v4657_v48, 2  ;;  %v4683_v18 = vmul.f32 %v4526_v29, %v4661_v60  ;;  %v446_v51 = vadd.f32 %v4451_v49, %v418_v6  ;;  %v4690_v16 = vmul.f32 %v4426_v39, %v4468_v1  ;;  %7208 = vst [vmem:[#allocation28_spill] sm:$0xff] %v4720_v38 }
  0xc1   : > { %7201 = vst [vmem:[#allocation21_spill] sm:$0xff] %v4653_v34  ;;  %1801 = vrot.lane.b32.xlu0 %v4653_v34, %s4332_s30  ;;  %7203 = vst [vmem:[#allocation23_spill] sm:$0xff] %v4676_v19  ;;  %v1008_v55 = vadd.f32 %v7046_v20, %v850_v33  ;;  %v4694_v21 = vmul.f32 %v4436_v43, %v4468_v1  ;;  %v598_v42 = vadd.f32 %v530_v56, %v439_v13 }
  0xc2   : > { %7204 = vst [vmem:[#allocation24_spill] sm:$0xff] %v4683_v18  ;;  %v689_v61 = vsel %vm686_vm1, %v687_v22, %v688_v58  ;;  %v416_v52 = vmul.f32 %v4429_v40, %v4458_v57  ;;  %v4701_v2 = vmul.f32 %v4548_v46, %v4661_v60  ;;  %v1208_v6 = vmul.f32 %v4533_v35, %v4661_v60 }
  0xc3   : > { %v1166_v33 = vadd.f32 %v7048_v47, %v1008_v55  ;;  %v7055_v20 = vrot.slane %v4690_v16, 1  ;;  %v4710_v13 = vmul.f32 %v4483_v8, %v4487_v10  ;;  %v758_v22 = vadd.f32 %v688_v58, %v599_v9  ;;  %v4728_v9 = vpop.permute.xlu0 %319 }
  0xc4   : > { %7205 = vst [vmem:[#allocation25_spill] sm:$0xff] %v4701_v2  ;;  %v4714_v56 = vmul.f32 %v4426_v39, %v4466_v0  ;;  %v4718_v59 = vmul.f32 %v4436_v43, %v4466_v0  ;;  %v7059_v55 = vrot.slane %v4683_v18, 1  ;;  %v7060_v30 = vrot.slane %v4694_v21, 2  ;;  %7209 = vst [vmem:[#allocation29_spill] sm:$0xff] %v4728_v9 }
  0xc5   : > { %v1236_v47 = vadd.f32 %v1208_v6, %v1166_v33  ;;  %v605_v26 = vadd.f32 %v7055_v20, %v446_v51  ;;  %v806_v58 = vmul.f32 %v4496_v14, %v4487_v10  ;;  %v444_v0 = vadd.f32 %v4451_v49, %v416_v52 }
  0xc6   : > { %7206 = vst [vmem:[#allocation26_spill] sm:$0xff] %v4714_v56  ;;  %7207 = vst [vmem:[#allocation27_spill] sm:$0xff] %v4718_v59  ;;  %v4734_v34 = vmul.f32 %v4426_v39, %v4458_v57  ;;  %v4738_v33 = vmul.f32 %v4436_v43, %v4458_v57  ;;  %v4749_v52 = vadd.f32 %v689_v61, %v598_v42  ;;  %v4769_v61 = vpop.permute.xlu1 %792 }
  0xc7   : > { %v1394_v51 = vadd.f32 %v7059_v55, %v1236_v47  ;;  %v764_v6 = vadd.f32 %v7060_v30, %v605_v26  ;;  %v4755_v57 = vmul.f32 %v4483_v8, %v4468_v1  ;;  %v4757_v47 = vadd.f32 %v800_v11, %v758_v22  ;;  %v4789_v11 = vpop.permute.xlu0 %787 }
  0xc8   : > { %7210 = vst [vmem:[#allocation30_spill] sm:$0xff] %v4734_v34  ;;  %7211 = vst [vmem:[#allocation31_spill] sm:$0xff] %v4738_v33  ;;  %v7061_v59 = vrot.slane %v4734_v34, 1  ;;  %v7214_v26 = vrot.slane %v4701_v2, 2  ;;  %v4765_v20 = vmul.f32 %v4526_v29, %v4720_v38  ;;  %v477_v42 = vmul.f32 %v4426_v39, %v4528_v31 }
  0xc9   : > { %7212 = vst [vmem:[#allocation32_spill] sm:$0xff] %v4749_v52  ;;  %7213 = vst [vmem:[#allocation33_spill] sm:$0xff] %v4755_v57  ;;  %v834_v30 = vadd.f32 %v806_v58, %v764_v6  ;;  %v804_v22 = vmul.f32 %v4496_v14, %v4468_v1  ;;  %v4778_v58 = vmul.f32 %v4426_v39, %v4498_v15  ;;  %v7217_v52 = vrot.slane %v4738_v33, 2 }
  0xca   : > { %v4761_v55 = vadd.f32 %v7214_v26, %v1394_v51  ;;  %v603_v48 = vadd.f32 %v7061_v59, %v444_v0  ;;  %v7216_v51 = vrot.slane %v4710_v13, 1  ;;  %v7069_v26 = vrot.slane %v4747_v5, 2  ;;  %v4823_v18 = vpop.permute.xlu1 %334 }
  0xcb   : > { %v1192_v0 = vmul.f32 %v4533_v35, %v4720_v38  ;;  %v417_v59 = vmul.f32 %v4429_v40, %v4528_v31  ;;  %v4803_v56 = vmul.f32 %v4548_v46, %v4720_v38  ;;  %v498_v34 = vmul.f32 %v4426_v39, %v4661_v60  ;;  %7219 = vst [vmem:[#allocation36_spill] sm:$0xff] %v4823_v18 }
  0xcc   : > { %7215 = vst [vmem:[#allocation34_spill] sm:$0xff] %v4761_v55  ;;  %2013 = vrot.lane.b32.xlu1 %v4761_v55, %s4333_s6  ;;  %v992_v6 = vadd.f32 %v7216_v51, %v834_v30  ;;  %v762_v2 = vadd.f32 %v7217_v52, %v603_v48  ;;  %v4796_v55 = vmul.f32 %v4513_v23, %v4468_v1  ;;  %v537_v33 = vrot.slane %v477_v42, 1 }
  0xcd   : > { %v636_v48 = vmul.f32 %v4436_v43, %v4528_v31  ;;  %v4811_v1 = vmul.f32 %v4526_v29, %v4487_v10  ;;  %v497_v42 = vmul.f32 %v4426_v39, %v4678_v44  ;;  %v1190_v31 = vmul.f32 %v4533_v35, %v4487_v10 }
  0xce   : > { %7218 = vst [vmem:[#allocation35_spill] sm:$0xff] %v4796_v55  ;;  %v1150_v30 = vadd.f32 %v7069_v26, %v992_v6  ;;  %v832_v52 = vadd.f32 %v804_v22, %v762_v2  ;;  %v4815_v6 = vmul.f32 %v4483_v8, %v4789_v11  ;;  %v4819_v26 = vmul.f32 %v4483_v8, %v4769_v61 }
  0xcf   : > { %v7220_v2 = vrot.slane %v4755_v57, 1  ;;  %v7081_v38 = vrot.slane %v4796_v55, 2  ;;  %v657_v19 = vmul.f32 %v4436_v43, %v4661_v60  ;;  %v7221_v50 = vrot.slane %v4765_v20, 1 }
  0xd0   : > { %v1220_v51 = vadd.f32 %v1192_v0, %v1150_v30  ;;  %v7087_v0 = vrot.slane %v4803_v56, 2  ;;  %v568_v30 = vrot.slane %v498_v34, 1  ;;  %v438_v18 = vmul.f32 %v4429_v40, %v4661_v60 }
  0xd1   : > { %v990_v22 = vadd.f32 %v7220_v2, %v832_v52  ;;  %v4842_v57 = vmul.f32 %v4548_v46, %v4487_v10  ;;  %v437_v27 = vmul.f32 %v4429_v40, %v4678_v44  ;;  %v727_v10 = vrot.slane %v657_v19, 2  ;;  %v1179_v19 = vpop.permute.xlu1 %1178 }
  0xd2   : > { %v1378_v45 = vadd.f32 %v7221_v50, %v1220_v51  ;;  %v826_v50 = vmul.f32 %v4496_v14, %v4769_v61  ;;  %v567_v51 = vrot.slane %v497_v42, 1  ;;  %v466_v55 = vadd.f32 %v4451_v49, %v438_v18 }
  0xd3   : > { %v1148_v52 = vadd.f32 %v7081_v38, %v990_v22  ;;  %7222 = vst [vmem:[#allocation37_spill] sm:$0xff] %v4842_v57  ;;  %v4856_v38 = vmul.f32 %v4513_v23, %v4769_v61  ;;  %v445_v36 = vadd.f32 %v4451_v49, %v417_v59  ;;  %v7225_v18 = vrot.slane %v4811_v1, 1 }
  0xd4   : > { %v4850_v34 = vadd.f32 %v7087_v0, %v1378_v45  ;;  %v625_v63 = vadd.f32 %v568_v30, %v466_v55  ;;  %v7224_v45 = vrot.slane %v4690_v16, 1  ;;  %v696_v0 = vrot.slane %v636_v48, 2 }
  0xd5   : > { %v1218_v2 = vadd.f32 %v1190_v31, %v1148_v52  ;;  %v7091_v54 = vrot.slane %v4842_v57, 2  ;;  %v465_v24 = vadd.f32 %v4451_v49, %v437_v27  ;;  %v656_v31 = vmul.f32 %v4436_v43, %v4678_v44 }
  0xd6   : > { %7223 = vst [vmem:[#allocation38_spill] sm:$0xff] %v4850_v34  ;;  %1981 = vrot.lane.b32.xlu0 %v4850_v34, %s4333_s6  ;;  %v539_v42 = vsel %vm527_vm0, %v537_v33, %v7224_v45  ;;  %v569_v55 = vsel %vm527_vm0, %v567_v51, %v568_v30  ;;  %v784_v52 = vadd.f32 %v727_v10, %v625_v63  ;;  %v7227_v48 = vrot.slane %v4694_v21, 2 }
  0xd7   : > { %v1376_v22 = vadd.f32 %v7225_v18, %v1218_v2  ;;  %v604_v59 = vadd.f32 %v539_v42, %v445_v36  ;;  %v805_v16 = vmul.f32 %v4496_v14, %v4602_v53  ;;  %v865_v27 = vmul.f32 %v4483_v8, %v4602_v53 }
  0xd8   : > { %v698_v2 = vsel %vm686_vm1, %v696_v0, %v7227_v48  ;;  %v1023_v45 = vmul.f32 %v4513_v23, %v4602_v53  ;;  %v854_v30 = vadd.f32 %v826_v50, %v784_v52  ;;  %v4885_v63 = vmul.f32 %v4526_v29, %v1179_v19 }
  0xd9   : > { %v4875_v33 = vadd.f32 %v7091_v54, %v1376_v22  ;;  %v763_v36 = vadd.f32 %v698_v2, %v604_v59  ;;  %v1251_v51 = vmul.f32 %v4526_v29, %v4728_v9  ;;  %v726_v21 = vrot.slane %v656_v31, 2 }
  0xda   : > { %v7095_v0 = vrot.slane %v4856_v38, 2  ;;  %v924_v22 = vrot.slane %v865_v27, 1  ;;  %v1082_v42 = vrot.slane %v1023_v45, 2  ;;  %v624_v18 = vadd.f32 %v569_v55, %v465_v24 }
  0xdb   : > { %7226 = vst [vmem:[#allocation39_spill] sm:$0xff] %v4875_v33  ;;  %1977 = vrot.lane.b32.xlu1 %v4875_v33, %s4333_s6  ;;  %v7228_v48 = vrot.slane %v4819_v26, 1  ;;  %v1212_v50 = vmul.f32 %v4533_v35, %v1179_v19  ;;  %v833_v52 = vadd.f32 %v805_v16, %v763_v36  ;;  %v4896_v59 = vmul.f32 %v4548_v46, %v1179_v19 }
  0xdc   : > { %v7229_v2 = vrot.slane %v4710_v13, 1  ;;  %v1310_v57 = vrot.slane %v1251_v51, 1  ;;  %v1409_v31 = vmul.f32 %v4548_v46, %v4728_v9  ;;  %v1341_v55 = vrot.slane %v4885_v63, 1 }
  0xdd   : > { %v1012_v54 = vadd.f32 %v7228_v48, %v854_v30  ;;  %v1191_v16 = vmul.f32 %v4533_v35, %v4728_v9  ;;  %v430_v19 = vmul.f32 %v4429_v40, %v4462_v62  ;;  %v431_v13 = vmul.f32 %v4429_v40, %v4498_v15 }
  0xde   : > { %v926_v34 = vsel %vm527_vm0, %v924_v22, %v7229_v2  ;;  %v728_v45 = vsel %vm686_vm1, %v726_v21, %v727_v10  ;;  %v7230_v30 = vrot.slane %v4747_v5, 2  ;;  %v954_v2 = vrot.slane %v4815_v6, 1 }
  0xdf   : > { %v1170_v24 = vadd.f32 %v7095_v0, %v1012_v54  ;;  %v991_v27 = vadd.f32 %v926_v34, %v833_v52  ;;  %1805 = vrot.lane.b32.xlu1 %v4875_v33, %s4332_s30  ;;  %v825_v54 = vmul.f32 %v4496_v14, %v4789_v11  ;;  %v4920_v34 = vpop.permute.xlu0 %329  ;;  %v783_v51 = vadd.f32 %v728_v45, %v624_v18 }
  0xe0   : > { %v1084_v36 = vsel %vm686_vm1, %v1082_v42, %v7230_v30  ;;  %7231 = vst [vmem:[#allocation40_spill] sm:$0xff] %v4920_v34  ;;  %v558_v52 = vrot.slane %v4778_v58, 1  ;;  %v7232_v10 = vrot.slane %v4765_v20, 1  ;;  %v1468_v21 = vrot.slane %v1409_v31, 2 }
  0xe1   : > { %v1240_v22 = vadd.f32 %v1212_v50, %v1170_v24  ;;  %v1149_v48 = vadd.f32 %v1084_v36, %v991_v27  ;;  %v650_v42 = vmul.f32 %v4436_v43, %v4498_v15  ;;  %v1499_v0 = vrot.slane %v4896_v59, 2 }
  0xe2   : > { %v1312_v5 = vsel %vm527_vm0, %v1310_v57, %v7232_v10  ;;  %v7233_v50 = vrot.slane %v4633_v32, 1  ;;  %v4939_v20 = vmul.f32 %v4426_v39, %v4471_v3  ;;  %v4943_v57 = vmul.f32 %v4426_v39, %v4462_v62 }
  0xe3   : > { %v1398_v30 = vadd.f32 %v1341_v55, %v1240_v22  ;;  %v1219_v18 = vadd.f32 %v1191_v16, %v1149_v48  ;;  %v1043_v6 = vmul.f32 %v4513_v23, %v4789_v11  ;;  %v853_v31 = vadd.f32 %v825_v54, %v783_v51 }
  0xe4   : > { %v4935_v58 = vadd.f32 %v7233_v50, %v4757_v47  ;;  %v459_v47 = vadd.f32 %v4451_v49, %v431_v13  ;;  %v4954_v16 = vmul.f32 %v4436_v43, %v4462_v62  ;;  %v7235_v45 = vrot.slane %v4819_v26, 1  ;;  %v1174_v13 = vpop.permute.xlu0 %1173  ;;  %v7266_v62 = vld [vmem:[#allocation10_spill] sm:$0xff] }
  0xe5   : > { %v4949_v24 = vadd.f32 %v1499_v0, %v1398_v30  ;;  %v1377_v27 = vadd.f32 %v1312_v5, %v1219_v18  ;;  %v7236_v22 = vrot.slane %v4803_v56, 2  ;;  %v7237_v54 = vrot.slane %v4480_v7, 1 }
  0xe6   : > { %v956_v36 = vsel %vm527_vm0, %v954_v2, %v7235_v45  ;;  %v4966_v10 = vadd.f32 %v4451_v49, %v430_v19  ;;  %v717_v18 = vrot.slane %v650_v42, 2  ;;  %v1112_v50 = vrot.slane %v1043_v6, 2 }
  0xe7   : > { %7234 = vst [vmem:[#allocation41_spill] sm:$0xff] %v4949_v24  ;;  %v1470_v48 = vsel %vm686_vm1, %v1468_v21, %v7236_v22  ;;  %v560_v51 = vsel %vm527_vm0, %v558_v52, %v7237_v54  ;;  %v819_v26 = vmul.f32 %v4496_v14, %v4564_v4  ;;  %v879_v56 = vmul.f32 %v4483_v8, %v4564_v4 }
  0xe8   : > { %v4968_v5 = vadd.f32 %v1470_v48, %v1377_v27  ;;  %v618_v30 = vadd.f32 %v560_v51, %v459_v47  ;;  %v1037_v7 = vmul.f32 %v4513_v23, %v4564_v4  ;;  %v1011_v2 = vadd.f32 %v956_v36, %v853_v31 }
  0xe9   : > { %v7239_v19 = vrot.slane %v4492_v12, 2  ;;  %v1265_v21 = vmul.f32 %v4526_v29, %v4642_v41  ;;  %v436_v42 = vmul.f32 %v4429_v40, %v4516_v25  ;;  %v1211_v6 = vmul.f32 %v4533_v35, %v1174_v13 }
  0xea   : > { %7238 = vst [vmem:[#allocation42_spill] sm:$0xff] %v4968_v5  ;;  %1979 = vrot.lane.b32.xlu0 %v4968_v5, %s4333_s6  ;;  %v945_v47 = vrot.slane %v879_v56, 1  ;;  %v4988_v31 = vmul.f32 %v4426_v39, %v4516_v25  ;;  %v1271_v45 = vmul.f32 %v4526_v29, %v1174_v13  ;;  %v1103_v36 = vrot.slane %v1037_v7, 2 }
  0xeb   : > { %v719_v52 = vsel %vm686_vm1, %v717_v18, %v7239_v19  ;;  %v464_v12 = vadd.f32 %v4451_v49, %v436_v42  ;;  %v4994_v22 = vmul.f32 %v4436_v43, %v4516_v25  ;;  %v7240_v48 = vrot.slane %v4856_v38, 2 }
  0xec   : > { %v777_v27 = vadd.f32 %v719_v52, %v618_v30  ;;  %v7241_v30 = vrot.slane %v4503_v17, 1  ;;  %v7096_v56 = vrot.slane %v4988_v31, 1  ;;  %v1205_v7 = vmul.f32 %v4533_v35, %v4642_v41 }
  0xed   : > { %v1114_v54 = vsel %vm686_vm1, %v1112_v50, %v7240_v48  ;;  %v1331_v52 = vrot.slane %v1265_v21, 1  ;;  %v1423_v25 = vmul.f32 %v4548_v46, %v4642_v41  ;;  %v7101_v50 = vrot.slane %v4994_v22, 2 }
  0xee   : > { %v847_v51 = vadd.f32 %v819_v26, %v777_v27  ;;  %v947_v18 = vsel %vm527_vm0, %v945_v47, %v7241_v30  ;;  %v1169_v19 = vadd.f32 %v1114_v54, %v1011_v2  ;;  %v623_v38 = vadd.f32 %v7096_v56, %v464_v12 }
  0xef   : > { %v5012_v17 = vmul.f32 %v4483_v8, %v4661_v60  ;;  %v493_v2 = vmul.f32 %v4426_v39, %v4564_v4  ;;  %v1429_v21 = vmul.f32 %v4548_v46, %v1174_v13  ;;  %v7242_v27 = vrot.slane %v4523_v28, 2 }
  0xf0   : > { %v1005_v42 = vadd.f32 %v947_v18, %v847_v51  ;;  %v782_v12 = vadd.f32 %v7101_v50, %v623_v38  ;;  %v824_v54 = vmul.f32 %v4496_v14, %v4661_v60  ;;  %v5027_v51 = vmul.f32 %v4513_v23, %v4661_v60  ;;  %v7263_v50 = vld [vmem:[#allocation26_spill] sm:$0xff] }
  0xf1   : > { %v1105_v47 = vsel %vm686_vm1, %v1103_v36, %v7242_v27  ;;  %v1239_v30 = vadd.f32 %v1211_v6, %v1169_v19  ;;  %v1340_v18 = vrot.slane %v1271_v45, 1  ;;  %v7243_v56 = vrot.slane %v4537_v37, 1 }
  0xf2   : > { %v1163_v48 = vadd.f32 %v1105_v47, %v1005_v42  ;;  %v1489_v28 = vrot.slane %v1423_v25, 2  ;;  %v852_v36 = vadd.f32 %v824_v54, %v782_v12  ;;  %v7100_v42 = vrot.slane %v5012_v17, 1 }
  0xf3   : > { %v1333_v13 = vsel %vm527_vm0, %v1331_v52, %v7243_v56  ;;  %v5035_v38 = vmul.f32 %v4526_v29, %v4769_v61  ;;  %v433_v27 = vmul.f32 %v4429_v40, %v4564_v4  ;;  %v561_v60 = vrot.slane %v493_v2, 1  ;;  %v7244_v52 = vld [vmem:[#allocation18_spill] sm:$0xff] }
  0xf4   : > { %v1233_v26 = vadd.f32 %v1205_v7, %v1163_v48  ;;  %v652_v6 = vmul.f32 %v4436_v43, %v4564_v4  ;;  %v1498_v45 = vrot.slane %v1429_v21, 2  ;;  %v1010_v56 = vadd.f32 %v7100_v42, %v852_v36  ;;  %v7246_v48 = vld [vmem:[#allocation11_spill] sm:$0xff] }
  0xf5   : > { %v7099_v19 = vrot.slane %v5027_v51, 2  ;;  %v1210_v7 = vmul.f32 %v4533_v35, %v4769_v61  ;;  %v7245_v25 = vrot.slane %v7244_v52, 2  ;;  %v7247_v2 = vrot.slane %v7246_v48, 2  ;;  %v7249_v48 = vld [vmem:[#allocation16_spill] sm:$0xff] }
  0xf6   : > { %v1391_v37 = vadd.f32 %v1333_v13, %v1233_v26  ;;  %v5056_v26 = vmul.f32 %v4548_v46, %v4769_v61  ;;  %v1342_v21 = vsel %vm527_vm0, %v1340_v18, %v1341_v55  ;;  %v461_v61 = vadd.f32 %v4451_v49, %v433_v27 }
  0xf7   : > { %v5049_v47 = vadd.f32 %v7245_v25, %v4935_v58  ;;  %v1491_v12 = vsel %vm686_vm1, %v1489_v28, %v7247_v2  ;;  %v1168_v13 = vadd.f32 %v7099_v19, %v1010_v56  ;;  %v7098_v58 = vrot.slane %v5035_v38, 1  ;;  %v7261_v19 = vld [vmem:[#allocation30_spill] sm:$0xff] }
  0xf8   : > { %v5061_v54 = vadd.f32 %v1491_v12, %v1391_v37  ;;  %v1397_v36 = vadd.f32 %v1342_v21, %v1239_v30  ;;  %v1500_v28 = vsel %vm686_vm1, %v1498_v45, %v1499_v0  ;;  %v7250_v63 = vrot.slane %v7249_v48, 1  ;;  %v7253_v45 = vld [vmem:[#allocation5_spill] sm:$0xff] }
  0xf9   : > { %v7251_v18 = vrot.slane %v4943_v57, 1  ;;  %v1238_v30 = vadd.f32 %v1210_v7, %v1168_v13  ;;  %v720_v2 = vrot.slane %v652_v6, 2  ;;  %v821_v0 = vmul.f32 %v4496_v14, %v4642_v41  ;;  %v7254_v21 = vld [vmem:[#allocation17_spill] sm:$0xff] }
  0xfa   : > { %7248 = vst [vmem:[#allocation18_spill] sm:$0xff] %v5061_v54  ;;  %v563_v55 = vsel %vm527_vm0, %v561_v60, %v7250_v63  ;;  %1835 = vrot.lane.b32.xlu0 %v5061_v54, %s4332_s30  ;;  %v5079_v56 = vadd.f32 %v1500_v28, %v1397_v36  ;;  %v881_v27 = vmul.f32 %v4483_v8, %v4642_v41  ;;  %v7097_v7 = vrot.slane %v5056_v26, 2 }
  0xfb   : > { %v617_v37 = vadd.f32 %v7251_v18, %v4966_v10  ;;  %v620_v59 = vadd.f32 %v563_v55, %v461_v61  ;;  %v1039_v60 = vmul.f32 %v4513_v23, %v4642_v41  ;;  %v818_v10 = vmul.f32 %v4496_v14, %v7253_v45 }
  0xfc   : > { %7252 = vst [vmem:[#allocation11_spill] sm:$0xff] %v5079_v56  ;;  %v1396_v12 = vadd.f32 %v7098_v58, %v1238_v30  ;;  %v7255_v6 = vrot.slane %v7254_v21, 2  ;;  %v5097_v36 = vmul.f32 %v4483_v8, %v7253_v45  ;;  %v948_v61 = vrot.slane %v881_v27, 1 }
  0xfd   : > { %v1207_v48 = vmul.f32 %v4533_v35, %v4678_v44  ;;  %v1106_v55 = vrot.slane %v1039_v60, 2  ;;  %v1267_v18 = vmul.f32 %v4526_v29, %v4678_v44  ;;  %v1425_v30 = vmul.f32 %v4548_v46, %v4678_v44 }
  0xfe   : > { %v722_v13 = vsel %vm686_vm1, %v720_v2, %v7255_v6  ;;  %v5103_v63 = vadd.f32 %v7097_v7, %v1396_v12  ;;  %2019 = vrot.lane.b32.xlu0 %v5079_v56, %s4333_s6  ;;  %v7258_v6 = vld [vmem:[#allocation15_spill] sm:$0xff]  ;;  %v7262_v42 = vrot.slane %v7261_v19, 1  ;;  %v7264_v25 = vrot.slane %v7263_v50, 1  ;;  %v7267_v56 = vld [vmem:[#allocation22_spill] sm:$0xff] }
  0xff   : > { %v779_v28 = vadd.f32 %v722_v13, %v620_v59  ;;  %v7256_v59 = vld [vmem:[#allocation19_spill] sm:$0xff]  ;;  %v5115_v13 = vrot.slane %v7258_v6, 2  ;;  %v1334_v60 = vrot.slane %v1267_v18, 1  ;;  %v1492_v58 = vrot.slane %v1425_v30, 2  ;;  %v7269_v30 = vld [vmem:[#allocation24_spill] sm:$0xff] }
 0x100   : > { %v7257_v27 = vrot.slane %v7256_v59, 1  ;;  %v7260_v12 = vld [vmem:[#allocation23_spill] sm:$0xff]  ;;  %2017 = vrot.lane.b32.xlu1 %v5103_v63, %s4333_s6  ;;  %v803_v24 = vmul.f32 %v4496_v14, %v7266_v62  ;;  %v7268_v34 = vrot.slane %v7267_v56, 2  ;;  %v7270_v19 = vrot.slane %v7269_v30, 1 }
 0x101   : > { %v849_v2 = vadd.f32 %v821_v0, %v779_v28  ;;  %7259 = vst [vmem:[#allocation16_spill] sm:$0xff] %v5115_v13  ;;  %v443_v7 = vadd.f32 %v4451_v49, %v7260_v12  ;;  %v536_v0 = vsel %vm527_vm0, %v7264_v25, %v7262_v42  ;;  %v7265_v28 = vld [vmem:[#allocation27_spill] sm:$0xff]  ;;  %v863_v12 = vmul.f32 %v4483_v8, %v7266_v62 }
 0x102   : > { %v950_v21 = vsel %vm527_vm0, %v948_v61, %v7257_v27  ;;  %v693_v59 = vrot.slane %v7265_v28, 2  ;;  %v1108_v18 = vsel %vm686_vm1, %v1106_v55, %v7268_v34  ;;  %v1336_v50 = vsel %vm527_vm0, %v1334_v60, %v7270_v19  ;;  %1939 = vrot.lane.b32.xlu0 %v5115_v13, %s4334_s7  ;;  %v7271_v42 = vld [vmem:[#allocation31_spill] sm:$0xff] }
 0x103   : > { %v1007_v61 = vadd.f32 %v950_v21, %v849_v2  ;;  %v602_v27 = vadd.f32 %v536_v0, %v443_v7  ;;  %v7272_v25 = vrot.slane %v7271_v42, 2  ;;  %v1021_v2 = vmul.f32 %v4513_v23, %v7266_v62  ;;  %v7273_v0 = vld [vmem:[#allocation25_spill] sm:$0xff] }
 0x104   : > { %v7274_v56 = vrot.slane %v7273_v0, 2  ;;  %v921_v28 = vrot.slane %v863_v12, 1  ;;  %v1249_v60 = vmul.f32 %v4526_v29, %v4602_v53  ;;  %v1407_v19 = vmul.f32 %v4548_v46, %v4602_v53  ;;  %v7275_v42 = vld [vmem:[#allocation21_spill] sm:$0xff]  ;;  %v7279_v12 = vld [vmem:[#allocation35_spill] sm:$0xff] }
 0x105   : > { %v695_v7 = vsel %vm686_vm1, %v693_v59, %v7272_v25  ;;  %v1165_v21 = vadd.f32 %v1108_v18, %v1007_v61  ;;  %v1079_v30 = vrot.slane %v1021_v2, 2  ;;  %v5152_v5 = vrot.slane %v7275_v42, 2  ;;  %v7276_v62 = vld [vmem:[#allocation33_spill] sm:$0xff] }
 0x106   : > { %v1494_v34 = vsel %vm686_vm1, %v1492_v58, %v7274_v56  ;;  %v761_v55 = vadd.f32 %v695_v7, %v602_v27  ;;  %v7277_v61 = vrot.slane %v7276_v62, 1  ;;  %v7278_v58 = vrot.slane %v4954_v16, 2 }
 0x107   : > { %v1235_v59 = vadd.f32 %v1207_v48, %v1165_v21  ;;  %v7280_v7 = vrot.slane %v7279_v12, 2  ;;  %v1189_v0 = vmul.f32 %v4533_v35, %v4602_v53  ;;  %v1307_v56 = vrot.slane %v1249_v60, 1  ;;  %1903 = vrot.lane.b32.xlu0 %v5152_v5, %s4334_s7 }
 0x108   : > { %v831_v25 = vadd.f32 %v803_v24, %v761_v55  ;;  %v923_v18 = vsel %vm527_vm0, %v921_v28, %v7277_v61  ;;  %v776_v27 = vadd.f32 %v7278_v58, %v617_v37  ;;  %v7111_v24 = vrot.slane %v5097_v36, 1  ;;  %v7282_v61 = vld [vmem:[#allocation8_spill] sm:$0xff] }
 0x109   : > { %v1081_v2 = vsel %vm686_vm1, %v1079_v30, %v7280_v7  ;;  %v1393_v48 = vadd.f32 %v1336_v50, %v1235_v59  ;;  %v5169_v28 = vmul.f32 %v4513_v23, %v7253_v45  ;;  %v7281_v37 = vrot.slane %v4811_v1, 1  ;;  %v7289_v1 = vld [vmem:[#allocation12_spill] sm:$0xff]  ;;  %v7290_v45 = vld [vmem:[#allocation37_spill] sm:$0xff] }
 0x10a   : > { %v989_v21 = vadd.f32 %v923_v18, %v831_v25  ;;  %v846_v55 = vadd.f32 %v818_v10, %v776_v27  ;;  %v1465_v62 = vrot.slane %v1407_v19, 2  ;;  %v1204_v60 = vmul.f32 %v4533_v35, %v7282_v61  ;;  %v7284_v25 = vld [vmem:[#allocation34_spill] sm:$0xff]  ;;  %v7286_v27 = vld [vmem:[#allocation3_spill] sm:$0xff] }
 0x10b   : > { %v1309_v30 = vsel %vm527_vm0, %v1307_v56, %v7281_v37  ;;  %v5178_v58 = vmul.f32 %v4526_v29, %v7282_v61  ;;  %v5180_v12 = vadd.f32 %v1494_v34, %v1393_v48  ;;  %v7110_v59 = vrot.slane %v5169_v28, 2 }
 0x10c   : > { %v1147_v50 = vadd.f32 %v1081_v2, %v989_v21  ;;  %v1004_v10 = vadd.f32 %v7111_v24, %v846_v55  ;;  %v5188_v19 = vmul.f32 %v4548_v46, %v7282_v61  ;;  %v5191_v18 = vrot.slane %v7284_v25, 1  ;;  %v7287_v21 = vld [vmem:[#allocation13_spill] sm:$0xff]  ;;  %v7288_v24 = vld [vmem:[#allocation32_spill] sm:$0xff] }
 0x10d   : > { %7283 = vst [vmem:[#allocation17_spill] sm:$0xff] %v5180_v12  ;;  %v1186_v7 = vmul.f32 %v4533_v35, %v7286_v27  ;;  %2011 = vrot.lane.b32.xlu1 %v5180_v12, %s4333_s6  ;;  %v5201_v56 = vmul.f32 %v4526_v29, %v7286_v27  ;;  %v5205_v48 = vmul.f32 %v4548_v46, %v7286_v27  ;;  %v915_v55 = vrot.slane %v7287_v21, 1 }
 0x10e   : > { %7285 = vst [vmem:[#allocation19_spill] sm:$0xff] %v5191_v18  ;;  %v1217_v34 = vadd.f32 %v1189_v0, %v1147_v50  ;;  %v1162_v2 = vadd.f32 %v7110_v59, %v1004_v10  ;;  %v429_v37 = vmul.f32 %v4429_v40, %v4471_v3  ;;  %v648_v61 = vmul.f32 %v4436_v43, %v4471_v3 }
 0x10f   : > { %2088 = vrot.lane.b32.xlu0 %v5191_v18, %s4332_s30  ;;  %v1214_v0 = vadd.f32 %v1186_v7, %v5049_v47  ;;  %v555_v50 = vrot.slane %v4939_v20, 1  ;;  %v1302_v27 = vrot.slane %v5201_v56, 1  ;;  %v827_v21 = vadd.f32 %v7289_v1, %v7288_v24 }
 0x110   : > { %v1375_v10 = vadd.f32 %v1309_v30, %v1217_v34  ;;  %v1232_v59 = vadd.f32 %v1204_v60, %v1162_v2  ;;  %v7291_v12 = vrot.slane %v7290_v45, 2  ;;  %v1487_v3 = vrot.slane %v5188_v19, 2  ;;  %v7294_v30 = vld [vmem:[#allocation14_spill] sm:$0xff] }
 0x111   : > { %v7293_v18 = vrot.slane %v5178_v58, 1  ;;  %v1372_v7 = vadd.f32 %v1302_v27, %v1214_v0  ;;  %v1460_v20 = vrot.slane %v5205_v48, 2  ;;  %v1073_v60 = vrot.slane %v7294_v30, 2 }
 0x112   : > { %v1467_v9 = vsel %vm686_vm1, %v1465_v62, %v7291_v12  ;;  %v7295_v34 = vrot.slane %v4633_v32, 1  ;;  %v457_v45 = vadd.f32 %v4451_v49, %v429_v37  ;;  %v714_v1 = vrot.slane %v648_v61, 2 }
 0x113   : > { %v5223_v54 = vadd.f32 %v1467_v9, %v1375_v10  ;;  %v1390_v47 = vadd.f32 %v7293_v18, %v1232_v59  ;;  %v877_v62 = vmul.f32 %v4483_v8, %v4498_v15  ;;  %v5241_v12 = vadd.f32 %v1460_v20, %v1372_v7 }
 0x114   : > { %v917_v24 = vsel %vm527_vm0, %v915_v55, %v7295_v34  ;;  %v7297_v59 = vrot.slane %v4943_v57, 1  ;;  %v1035_v49 = vmul.f32 %v4513_v23, %v4498_v15  ;;  %v7299_v55 = vrot.slane %v7244_v52, 2  ;;  %v7300_v57 = vld [vmem:[#allocation6_spill] sm:$0xff] }
 0x115   : > { %7292 = vst [vmem:[#allocation23_spill] sm:$0xff] %v5223_v54  ;;  %1803 = vrot.lane.b32.xlu1 %v5223_v54, %s4332_s30  ;;  %v5239_v9 = vadd.f32 %v1487_v3, %v1390_v47  ;;  %7296 = vst [vmem:[#allocation30_spill] sm:$0xff] %v5241_v12  ;;  %v985_v18 = vadd.f32 %v917_v24, %v827_v21  ;;  %v1690_v56 = vrot.slane %v5241_v12, 2  ;;  %v942_v61 = vrot.slane %v877_v62, 1 }
 0x116   : > { %v557_v32 = vsel %vm527_vm0, %v555_v50, %v7297_v59  ;;  %v1075_v37 = vsel %vm686_vm1, %v1073_v60, %v7299_v55  ;;  %v1245_v0 = vmul.f32 %v4526_v29, %v7300_v57  ;;  %v7301_v50 = vrot.slane %v4954_v16, 2 }
 0x117   : > { %v5249_v2 = vrot.slane %v5239_v9, 1  ;;  %v616_v48 = vadd.f32 %v557_v32, %v457_v45  ;;  %1727 = vrot.lane.b32.xlu0 %v1690_v56, %s4333_s6  ;;  %v1143_v21 = vadd.f32 %v1075_v37, %v985_v18  ;;  %v817_v52 = vmul.f32 %v4496_v14, %v4498_v15 }
 0x118   : > { %v716_v10 = vsel %vm686_vm1, %v714_v1, %v7301_v50  ;;  %v495_v47 = vmul.f32 %v4426_v39, %v4642_v41  ;;  %v5270_v30 = vrot.slane %v5239_v9, 2  ;;  %v5273_v60 = vrot.slane %v4875_v33, 1  ;;  %v7304_v50 = vld [vmem:[#allocation38_spill] sm:$0xff] }
 0x119   : > { %7298 = vst [vmem:[#allocation26_spill] sm:$0xff] %v5249_v2  ;;  %1655 = vrot.lane.b32.xlu1 %v5249_v2, %s4334_s7  ;;  %v775_v7 = vadd.f32 %v716_v10, %v616_v48  ;;  %v1100_v34 = vrot.slane %v1035_v49, 2  ;;  %v1185_v16 = vmul.f32 %v4533_v35, %v7300_v57  ;;  %v1403_v24 = vmul.f32 %v4548_v46, %v7300_v57 }
 0x11a   : > { %7302 = vst [vmem:[#allocation27_spill] sm:$0xff] %v5270_v30  ;;  %v1263_v1 = vmul.f32 %v4526_v29, %v4564_v4  ;;  %v1301_v62 = vrot.slane %v1245_v0, 1  ;;  %v7303_v59 = vrot.slane %v5097_v36, 1  ;;  %v435_v18 = vmul.f32 %v4429_v40, %v4642_v41 }
 0x11b   : > { %v845_v45 = vadd.f32 %v817_v52, %v775_v7  ;;  %2052 = vrot.lane.b32.xlu0 %v5273_v60, %s4332_s30  ;;  %v564_v49 = vrot.slane %v495_v47, 1  ;;  %v1213_v48 = vadd.f32 %v1185_v16, %v1143_v21  ;;  %v654_v37 = vmul.f32 %v4436_v43, %v4642_v41 }
 0x11c   : > { %v944_v32 = vsel %vm527_vm0, %v942_v61, %v7303_v59  ;;  %v1582_v57 = vrot.slane %v5241_v12, 1  ;;  %v5294_v10 = vrot.slane %v7304_v50, 1  ;;  %v7306_v0 = vrot.slane %v5169_v28, 2  ;;  %v5310_v28 = vld [vmem:[%s7033_s2] ss:$0 sm:$0xff] }
 0x11d   : > { %1763 = vrot.lane.b32.xlu1 %v5270_v30, %s4333_s6  ;;  %v1003_v55 = vadd.f32 %v944_v32, %v845_v45  ;;  %v1459_v52 = vrot.slane %v1403_v24, 2  ;;  %v1203_v7 = vmul.f32 %v4533_v35, %v4564_v4  ;;  %v1328_v47 = vrot.slane %v1263_v1, 1 }
 0x11e   : > { %7305 = vst [vmem:[#allocation10_spill] sm:$0xff] %v5294_v10  ;;  %v1102_v36 = vsel %vm686_vm1, %v1100_v34, %v7306_v0  ;;  %v1303_v41 = vsel %vm527_vm0, %v1301_v62, %v1302_v27  ;;  %v1269_v21 = vmul.f32 %v4526_v29, %v4789_v11  ;;  %v463_v34 = vadd.f32 %v5310_v28, %v435_v18 }
 0x11f   : > { %v1161_v61 = vadd.f32 %v1102_v36, %v1003_v55  ;;  %2056 = vrot.lane.b32.xlu0 %v5294_v10, %s4332_s30  ;;  %v1371_v16 = vadd.f32 %v1303_v41, %v1213_v48  ;;  %v7307_v24 = vrot.slane %v4988_v31, 1  ;;  %v5317_v1 = vrot.slane %v7275_v42, 1 }
 0x120   : > { %v5320_v27 = vrot.slane %v7258_v6, 1  ;;  %v1421_v62 = vmul.f32 %v4548_v46, %v4564_v4  ;;  %v723_v59 = vrot.slane %v654_v37, 2  ;;  %v1461_v32 = vsel %vm686_vm1, %v1459_v52, %v1460_v20  ;;  %v7339_v6 = vld [vmem:[#allocation36_spill] sm:$0xff] }
 0x121   : > { %1619 = vrot.lane.b32.xlu1 %v1582_v57, %s4334_s7  ;;  %v566_v45 = vsel %vm527_vm0, %v564_v49, %v7307_v24  ;;  %7308 = vst [vmem:[#allocation22_spill] sm:$0xff] %v5317_v1  ;;  %v1231_v48 = vadd.f32 %v1203_v7, %v1161_v61  ;;  %v7309_v55 = vrot.slane %v5178_v58, 1  ;;  %v7310_v49 = vrot.slane %v4994_v22, 2 }
 0x122   : > { %v622_v31 = vadd.f32 %v566_v45, %v463_v34  ;;  %v883_v4 = vmul.f32 %v4483_v8, %v4678_v44  ;;  %v1041_v20 = vmul.f32 %v4513_v23, %v4678_v44  ;;  %v5339_v58 = vadd.f32 %v1461_v32, %v1371_v16 }
 0x123   : > { %v1330_v18 = vsel %vm527_vm0, %v1328_v47, %v7309_v55  ;;  %1659 = vrot.lane.b32.xlu0 %v5320_v27, %s4334_s7  ;;  %v725_v0 = vsel %vm686_vm1, %v723_v59, %v7310_v49  ;;  %v823_v36 = vmul.f32 %v4496_v14, %v4678_v44  ;;  %v5344_v52 = vrot.slane %v4875_v33, 2  ;;  %v7312_v47 = vld [vmem:[#allocation20_spill] sm:$0xff] }
 0x124   : > { %v781_v37 = vadd.f32 %v725_v0, %v622_v31  ;;  %v1486_v61 = vrot.slane %v1421_v62, 2  ;;  %v951_v7 = vrot.slane %v883_v4, 1  ;;  %v1109_v22 = vrot.slane %v1041_v20, 2 }
 0x125   : > { %1623 = vrot.lane.b32.xlu1 %v5317_v1, %s4334_s7  ;;  %7311 = vst [vmem:[#allocation24_spill] sm:$0xff] %v5344_v52  ;;  %v1692_v41 = vrot.slane %v7312_v47, 2  ;;  %v1389_v34 = vadd.f32 %v1330_v18, %v1231_v48  ;;  %v1337_v45 = vrot.slane %v1269_v21, 1  ;;  %v1427_v59 = vmul.f32 %v4548_v46, %v4789_v11 }
 0x126   : > { %v851_v24 = vadd.f32 %v823_v36, %v781_v37  ;;  %v7313_v44 = vrot.slane %v5012_v17, 1  ;;  %v1209_v62 = vmul.f32 %v4533_v35, %v4789_v11  ;;  %v1581_v32 = vrot.slane %v5339_v58, 1 }
 0x127   : > { %1767 = vrot.lane.b32.xlu0 %v5115_v13, %s4333_s6  ;;  %v5360_v21 = vrot.slane %v5103_v63, 2  ;;  %v1488_v46 = vsel %vm686_vm1, %v1486_v61, %v1487_v3  ;;  %v7315_v55 = vrot.slane %v5027_v51, 2  ;;  %v5370_v17 = vsel %vm686_vm1, %v1692_v41, %v5152_v5  ;;  %v7320_v61 = vld [vmem:[#allocation9_spill] sm:$0xff] }
 0x128   : > { %v953_v16 = vsel %vm527_vm0, %v951_v7, %v7313_v44  ;;  %v5372_v31 = vadd.f32 %v1488_v46, %v1389_v34  ;;  %v1495_v49 = vrot.slane %v1427_v59, 2  ;;  %v7317_v3 = vrot.slane %v5035_v38, 1  ;;  %v7323_v44 = vld [vmem:[#allocation19_spill] sm:$0xff] }
 0x129   : > { %1907 = vrot.lane.b32.xlu1 %v5344_v52, %s4334_s7  ;;  %v1009_v48 = vadd.f32 %v953_v16, %v851_v24  ;;  %7314 = vst [vmem:[#allocation31_spill] sm:$0xff] %v5360_v21  ;;  %v1111_v18 = vsel %vm686_vm1, %v1109_v22, %v7315_v55  ;;  %v1583_v19 = vsel %vm527_vm0, %v1581_v32, %v1582_v57  ;;  %v5383_v4 = vrot.slane %v7284_v25, 2  ;;  %v7322_v24 = vld [vmem:[#allocation18_spill] sm:$0xff] }
 0x12a   : > { %7316 = vst [vmem:[#allocation25_spill] sm:$0xff] %v5372_v31  ;;  %v1339_v51 = vsel %vm527_vm0, %v1337_v45, %v7317_v3  ;;  %v4230_v20 = vpack.i.bf16 %v1583_v19, %v5370_v17  ;;  %v1608_v37 = vrot.slane %v5372_v31, 1  ;;  %v479_v57 = vmul.f32 %v4426_v39, %v4602_v53 }
 0x12b   : > { %v1167_v11 = vadd.f32 %v1111_v18, %v1009_v48  ;;  %1947 = vrot.lane.b32.xlu0 %v5360_v21, %s4334_s7  ;;  %7318 = vst [vmem:[#allocation33_spill] sm:$0xff] %v5383_v4  ;;  %v480_v7 = vmul.f32 %v4426_v39, %v7320_v61  ;;  %v1689_v22 = vrot.slane %v5339_v58, 2  ;;  %v1719_v45 = vrot.slane %v7322_v24, 2 }
 0x12c   : > { %v5402_v34 = vsel %vm527_vm0, %v1608_v37, %v5249_v2  ;;  %v419_v59 = vmul.f32 %v4429_v40, %v4602_v53  ;;  %v540_v16 = vrot.slane %v479_v57, 1  ;;  %v420_v46 = vmul.f32 %v4429_v40, %v7320_v61  ;;  %v7327_v57 = vld [vmem:[#allocation28_spill] sm:$0xff] }
 0x12d   : > { %1731 = vrot.lane.b32.xlu1 %v5152_v5, %s4333_s6  ;;  %v1237_v0 = vadd.f32 %v1209_v62, %v1167_v11  ;;  %v7319_v5 = vrot.slane %v5056_v26, 2  ;;  %7321 = vst [vmem:[#allocation35_spill] sm:$0xff] %v5402_v34  ;;  %v1587_v26 = vrot.slane %v5223_v54, 1  ;;  %v638_v62 = vmul.f32 %v4436_v43, %v4602_v53 }
 0x12e   : > { %v541_v32 = vrot.slane %v480_v7, 1  ;;  %v1691_v48 = vsel %vm686_vm1, %v1689_v22, %v1690_v56  ;;  %v639_v55 = vmul.f32 %v4436_v43, %v7320_v61  ;;  %v1695_v11 = vrot.slane %v5223_v54, 2 }
 0x12f   : > { %v1395_v36 = vadd.f32 %v1339_v51, %v1237_v0  ;;  %4231 = vrot.lane.b32.xlu0 %v4230_v20, %s4334_s7  ;;  %v1497_v38 = vsel %vm686_vm1, %v1495_v49, %v7319_v5  ;;  %v4235_v18 = vpack.i.bf16 %v1691_v48, %v5223_v54  ;;  %v5425_v49 = vsel %vm686_vm1, %v1719_v45, %v5115_v13  ;;  %v7326_v5 = vld [vmem:[#allocation29_spill] sm:$0xff] }
 0x130   : > { %7324 = vst [vmem:[#allocation8_spill] sm:$0xff] %v5425_v49  ;;  %v5429_v53 = vsel %vm527_vm0, %v1587_v26, %v5273_v60  ;;  %v447_v56 = vadd.f32 %v5310_v28, %v419_v59  ;;  %v699_v3 = vrot.slane %v638_v62, 2  ;;  %v542_v51 = vsel %vm527_vm0, %v540_v16, %v541_v32  ;;  %v7329_v16 = vld [vmem:[#allocation17_spill] sm:$0xff] }
 0x131   : > { %1943 = vrot.lane.b32.xlu1 %v5383_v4, %s4334_s7  ;;  %v5398_v41 = vadd.f32 %v1497_v38, %v1395_v36  ;;  %7325 = vst [vmem:[#allocation3_spill] sm:$0xff] %v5429_v53  ;;  %v7123_v19 = vmov 0.0|0.0   ;;  %v448_v0 = vadd.f32 %v5310_v28, %v420_v46  ;;  %v700_v20 = vrot.slane %v639_v55, 2  ;;  %v2368_v46 = vld [vmem:[%s7034_s3] sm:$0xff]  ;;  %v2369_v55 = vld [vmem:[%s7034_s3 + $0x8] sm:$0xff] }
 0x132   : > { %4125 = vmatprep.subr.bf16.mxu0 %v7123_v19  ;;  %4181 = vmatprep.subr.bf16.mxu1 %v7123_v19  ;;  %v4240_v37 = vpack.i.bf16 %v7312_v47, %v5429_v53  ;;  %v1584_v36 = vrot.slane %v7312_v47, 1  ;;  %v867_v38 = vmul.f32 %v4483_v8, %v7326_v5  ;;  %v5446_v61 = vmul.f32 %v4483_v8, %v7327_v57 }
 0x133   : > { %1653 = vrot.lane.b32.xlu0 %v5402_v34, %s4334_s7  ;;  %v5450_v7 = vsel %vm686_vm1, %v1695_v11, %v5344_v52  ;;  %v1716_v22 = vrot.slane %v5372_v31, 2  ;;  %v606_v45 = vadd.f32 %v542_v51, %v447_v56  ;;  %v607_v26 = vadd.f32 %v541_v32, %v448_v0  ;;  %v7331_v0 = vld [vmem:[#allocation42_spill] sm:$0xff] }
 0x134   : > { %7328 = vst [vmem:[#allocation13_spill] sm:$0xff] %v5450_v7  ;;  %v5458_v59 = vsel %vm527_vm0, %v1584_v36, %v5317_v1  ;;  %v1614_v62 = vrot.slane %v7329_v16, 1  ;;  %v807_v48 = vmul.f32 %v4496_v14, %v7326_v5  ;;  %v927_v11 = vrot.slane %v867_v38, 1  ;;  %v2371_v38 = vld [vmem:[%s7034_s3 + $0x18] sm:$0xff] }
 0x135   : > { %1663 = vrot.lane.b32.xlu1 %v7323_v44, %s4334_s7  ;;  %v5471_v32 = vsel %vm686_vm1, %v1716_v22, %v5270_v30  ;;  %v928_v56 = vrot.slane %v5446_v61, 1  ;;  %v808_v51 = vmul.f32 %v4496_v14, %v7327_v57  ;;  %v1722_v36 = vrot.slane %v7329_v16, 2 }
 0x136   : > { %7330 = vst [vmem:[#allocation32_spill] sm:$0xff] %v5471_v32  ;;  %v1025_v61 = vmul.f32 %v4513_v23, %v7326_v5  ;;  %v5493_v19 = vmul.f32 %v4513_v23, %v7327_v57  ;;  %v4126_v13 = vpack.c.bf16 %v2369_v55, %v2368_v46  ;;  %v766_v33 = vadd.f32 %v700_v20, %v607_v26 }
 0x137   : > { %1937 = vrot.lane.b32.xlu0 %v5425_v49, %s4334_s7  ;;  %v5501_v30 = vsel %vm527_vm0, %v1614_v62, %v7323_v44  ;;  %v1611_v26 = vrot.slane %v7322_v24, 1  ;;  %v5515_v62 = vsel %vm686_vm1, %v1722_v36, %v5383_v4 }
 0x138   : > { %7332 = vst [vmem:[#allocation12_spill] sm:$0xff] %v5501_v30  ;;  %4127 = vmatpush1.bf16.msra.mxu0 %v4126_v13  ;;  %4197 = vmatpush1.bf16.msra.mxu1 %v4126_v13  ;;  %v836_v54 = vadd.f32 %v808_v51, %v766_v33  ;;  %7334 = vst [vmem:[#allocation14_spill] sm:$0xff] %v5515_v62  ;;  %v2372_v33 = vld [vmem:[%s7034_s3 + $0x20] sm:$0xff]  ;;  %v2373_v13 = vld [vmem:[%s7034_s3 + $0x28] sm:$0xff]  ;;  %v1085_v46 = vrot.slane %v1025_v61, 2  ;;  %v1086_v55 = vrot.slane %v5493_v19, 2 }
 0x139   : > { %4236 = vrot.lane.b32.xlu1 %v4235_v18, %s4333_s6  ;;  %v701_v18 = vsel %vm686_vm1, %v699_v3, %v700_v20  ;;  %v2370_v3 = vld [vmem:[%s7034_s3 + $0x10] sm:$0xff]  ;;  %v4250_v51 = vpack.i.bf16 %v5425_v49, %v5398_v41  ;;  %v1898_v61 = vrot.slane %v5398_v41, 2  ;;  %v5541_v19 = vmul.f32 %v4526_v29, %v7339_v6 }
 0x13a   : > { %v765_v22 = vadd.f32 %v701_v18, %v606_v45  ;;  %v5497_v45 = vmul.f32 %v4426_v39, %v7326_v5  ;;  %v4129_v2 = vpack.c.bf16 %v2371_v38, %v2370_v3  ;;  %v1871_v38 = vrot.slane %v5398_v41, 1 }
 0x13b   : > { %4241 = vrot.lane.b32.xlu0 %v4240_v37, %s4332_s30  ;;  %v1590_v37 = vrot.slane %v7331_v0, 1  ;;  %v4132_v34 = vpack.c.bf16 %v2373_v13, %v2372_v33  ;;  %v5545_v49 = vmul.f32 %v4426_v39, %v7327_v57  ;;  %v2375_v33 = vld [vmem:[%s7034_s3 + $0x38] sm:$0xff]  ;;  %v1087_v44 = vsel %vm686_vm1, %v1085_v46, %v1086_v55 }
 0x13c   : > { %v835_v18 = vadd.f32 %v807_v48, %v765_v22  ;;  %v1698_v48 = vrot.slane %v7331_v0, 2  ;;  %v7338_v22 = vld [vmem:[#allocation40_spill] sm:$0xff]  ;;  %v994_v24 = vadd.f32 %v928_v56, %v836_v54  ;;  %v5579_v54 = vsel %vm686_vm1, %v1898_v61, %v5360_v21 }
 0x13d   : > { %1905 = vrot.lane.b32.xlu1 %v5450_v7, %s4334_s7  ;;  %v5508_v20 = vsel %vm527_vm0, %v1590_v37, %v5294_v10  ;;  %v5533_v37 = vrot.slane %v7304_v50, 2  ;;  %v1253_v3 = vmul.f32 %v4526_v29, %v7338_v22  ;;  %v1193_v42 = vmul.f32 %v4533_v35, %v7338_v22  ;;  %7343 = vst [vmem:[#allocation36_spill] sm:$0xff] %v5579_v54 }
 0x13e   : > { %7333 = vst [vmem:[#allocation37_spill] sm:$0xff] %v5508_v20 }
 0x13f   : > { %1621 = vrot.lane.b32.xlu0 %v5458_v59, %s4334_s7  ;;  %7337 = vst [vmem:[#allocation9_spill] sm:$0xff] %v5533_v37  ;;  %v1313_v1 = vrot.slane %v1253_v3, 1  ;;  %v5593_v3 = vpop.permute.xlu0 %339 }
 0x141   : > { %1761 = vrot.lane.b32.xlu1 %v5471_v32, %s4333_s6  ;;  %v929_v32 = vsel %vm527_vm0, %v927_v11, %v928_v56  ;;  %v7336_v11 = vmov 0.0|0.0   ;;  %v1314_v56 = vrot.slane %v5541_v19, 1  ;;  %v1152_v19 = vadd.f32 %v1086_v55, %v994_v24 }
 0x142   : > { %4128 = vmatprep.subr.bf16.mxu0 %v7336_v11  ;;  %4182 = vmatprep.subr.bf16.mxu1 %v7336_v11  ;;  %v993_v36 = vadd.f32 %v929_v32, %v835_v18  ;;  %v1194_v32 = vmul.f32 %v4533_v35, %v7339_v6  ;;  %v5553_v18 = vsel %vm527_vm0, %v1611_v26, %v5320_v27 }
 0x143   : > { %2086 = vrot.lane.b32.xlu0 %v5501_v30, %s4332_s30  ;;  %4130 = vmatpush1.bf16.msra.mxu0 %v4129_v2  ;;  %7340 = vst [vmem:[#allocation29_spill] sm:$0xff] %v5553_v18  ;;  %v4245_v13 = vpack.i.bf16 %v5553_v18, %v5515_v62  ;;  %v5569_v26 = vsel %vm686_vm1, %v1698_v48, %v5533_v37  ;;  %v2376_v48 = vld [vmem:[%s7034_s3 + $0x40] sm:$0xff] }
 0x144   : > { %4198 = vmatpush1.bf16.msra.mxu1 %v4129_v2  ;;  %v2374_v2 = vld [vmem:[%s7034_s3 + $0x30] sm:$0xff]  ;;  %4131 = vmatprep.subr.bf16.mxu0 %v7336_v11  ;;  %7341 = vst [vmem:[#allocation28_spill] sm:$0xff] %v5569_v26  ;;  %v1315_v18 = vsel %vm527_vm0, %v1313_v1, %v1314_v56  ;;  %v1222_v31 = vadd.f32 %v1194_v32, %v1152_v19 }
 0x145   : > { %1729 = vrot.lane.b32.xlu1 %v5370_v17, %s4333_s6  ;;  %v5524_v17 = vrot.slane %v5103_v63, 1  ;;  %4183 = vmatprep.subr.bf16.mxu1 %v7336_v11  ;;  %v4135_v46 = vpack.c.bf16 %v2375_v33, %v2374_v2  ;;  %v543_v2 = vrot.slane %v5497_v45, 1  ;;  %v640_v55 = vmul.f32 %v4436_v43, %v7326_v5  ;;  %v2378_v45 = vld [vmem:[%s7034_s3 + $0x50] sm:$0xff] }
 0x146   : > { %v422_v1 = vmul.f32 %v4429_v40, %v7327_v57 }
 0x147   : > { %7335 = vst [vmem:[#allocation6_spill] sm:$0xff] %v5524_v17  ;;  %4251 = vrot.lane.b32.xlu0 %v4250_v51, %s4333_s6  ;;  %v1151_v51 = vadd.f32 %v1087_v44, %v993_v36  ;;  %v5575_v47 = vsel %vm527_vm0, %v1871_v38, %v5524_v17  ;;  %4133 = vmatpush1.bf16.msra.mxu0 %v4132_v34  ;;  %v2377_v36 = vld [vmem:[%s7034_s3 + $0x48] sm:$0xff] }
 0x148   : > { %7342 = vst [vmem:[#allocation40_spill] sm:$0xff] %v5575_v47  ;;  %4199 = vmatpush1.bf16.msra.mxu1 %v4132_v34  ;;  %v421_v44 = vmul.f32 %v4429_v40, %v7326_v5  ;;  %v5598_v34 = vld [vmem:[%s7032_s1 + $0x8] ss:$0 sm:$0xff]  ;;  %4134 = vmatprep.subr.bf16.mxu0 %v7336_v11  ;;  %v4255_v33 = vpack.i.bf16 %v7329_v16, %v5575_v47 }
 0x149   : > { %2054 = vrot.lane.b32.xlu1 %v5508_v20, %s4332_s30  ;;  %v1411_v38 = vmul.f32 %v5598_v34, %v7338_v22  ;;  %v1412_v61 = vmul.f32 %v5598_v34, %v7339_v6  ;;  %4184 = vmatprep.subr.bf16.mxu1 %v7336_v11  ;;  %v1221_v21 = vadd.f32 %v1193_v42, %v1151_v51  ;;  %v2379_v42 = vld [vmem:[%s7034_s3 + $0x58] sm:$0xff] }
 0x14a   : > { %v4138_v24 = vpack.c.bf16 %v2377_v36, %v2376_v48  ;;  %v5632_v48 = vpop.permute.xlu0 %349  ;;  %v1380_v36 = vadd.f32 %v1314_v56, %v1222_v31  ;;  %v450_v31 = vadd.f32 %v5310_v28, %v422_v1  ;;  %v702_v56 = vrot.slane %v640_v55, 2  ;;  %v2383_v1 = vld [vmem:[%s7034_s3 + $0x78] sm:$0xff] }
 0x14b   : > { %1945 = vrot.lane.b32.xlu0 %v5579_v54, %s4334_s7  ;;  %v544_v54 = vrot.slane %v5545_v49, 1  ;;  %4136 = vmatpush1.bf16.msra.mxu0 %v4135_v46  ;;  %v5627_v49 = vmul.f32 %v4436_v43, %v7327_v57  ;;  %v1471_v5 = vrot.slane %v1411_v38, 2  ;;  %v1472_v32 = vrot.slane %v1412_v61, 2  ;;  %v2381_v57 = vld [vmem:[%s7034_s3 + $0x68] sm:$0xff] }
 0x14c   : > { %4200 = vmatpush1.bf16.msra.mxu1 %v4135_v46  ;;  %4137 = vmatprep.subr.bf16.mxu0 %v7336_v11  ;;  %v1379_v51 = vadd.f32 %v1315_v18, %v1221_v21  ;;  %v449_v46 = vadd.f32 %v5310_v28, %v421_v44  ;;  %v2380_v21 = vld [vmem:[%s7034_s3 + $0x60] sm:$0xff]  ;;  %v869_v55 = vmul.f32 %v4483_v8, %v7338_v22 }
 0x14d   : > { %4246 = vrot.lane.b32.xlu1 %v4245_v13, %s4334_s7  ;;  %v4260_v13 = vpack.i.bf16 %v5429_v53, %v5569_v26  ;;  %4185 = vmatprep.subr.bf16.mxu1 %v7336_v11  ;;  %v545_v19 = vsel %vm527_vm0, %v543_v2, %v544_v54  ;;  %v1473_v18 = vsel %vm686_vm1, %v1471_v5, %v1472_v32  ;;  %v703_v44 = vrot.slane %v5627_v49, 2  ;;  %v7346_v5 = vld [vmem:[#allocation11_spill] sm:$0xff]  ;;  %v2392_v53 = vld [vmem:[%s7034_s3 + $0xc0] sm:$0xff] }
 0x14e   : > { %v5650_v38 = vadd.f32 %v1473_v18, %v1379_v51  ;;  %v608_v61 = vadd.f32 %v545_v19, %v449_v46  ;;  %v5652_v2 = vadd.f32 %v1472_v32, %v1380_v36  ;;  %v609_v49 = vadd.f32 %v544_v54, %v450_v31  ;;  %v7347_v51 = vld [vmem:[#allocation41_spill] sm:$0xff] }
 0x14f   : > { %4261 = vrot.lane.b32.xlu0 %v4260_v13, %s4334_s7  ;;  %4139 = vmatpush1.bf16.msra.mxu0 %v4138_v24  ;;  %v5654_v13 = vpop.permute.xlu0 %1837  ;;  %v2047_v32 = vrot.slane %v7346_v5, 1  ;;  %v704_v36 = vsel %vm686_vm1, %v702_v56, %v703_v44  ;;  %v483_v46 = vmul.f32 %v4426_v39, %v7338_v22 }
 0x150   : > { %4201 = vmatpush1.bf16.msra.mxu1 %v4138_v24  ;;  %4140 = vmatprep.subr.bf16.mxu0 %v7336_v11  ;;  %7344 = vst [vmem:[#allocation43_spill] sm:$0xff] %v5650_v38  ;;  %7345 = vst [vmem:[#allocation44_spill] sm:$0xff] %v5652_v2  ;;  %v4144_v24 = vpack.c.bf16 %v2381_v57, %v2380_v21  ;;  %v4265_v19 = vpack.i.bf16 %v5450_v7, %v5650_v38  ;;  %v5683_v54 = vrot.slane %v5652_v2, 2 }
 0x151   : > { %4256 = vrot.lane.b32.xlu1 %v4255_v33, %s4332_s30  ;;  %v4141_v33 = vpack.c.bf16 %v2379_v42, %v2378_v45  ;;  %4186 = vmatprep.subr.bf16.mxu1 %v7336_v11  ;;  %v5664_v45 = vmul.f32 %v4483_v8, %v7339_v6  ;;  %v2382_v42 = vld [vmem:[%s7034_s3 + $0x70] sm:$0xff]  ;;  %v767_v21 = vadd.f32 %v704_v36, %v608_v61  ;;  %v1593_v31 = vrot.slane %v5650_v38, 1 }
 0x152   : > { %v809_v57 = vmul.f32 %v4496_v14, %v7338_v22  ;;  %v5687_v18 = vrot.slane %v5652_v2, 1  ;;  %v4147_v56 = vpack.c.bf16 %v2383_v1, %v2382_v42  ;;  %v930_v61 = vrot.slane %v869_v55, 1  ;;  %v2385_v42 = vld [vmem:[%s7034_s3 + $0x88] sm:$0xff] }
 0x153   : > { %2092 = vrot.lane.b32.xlu0 %v5524_v17, %s4332_s30  ;;  %4142 = vmatpush1.bf16.msra.mxu0 %v4141_v33  ;;  %v931_v36 = vrot.slane %v5664_v45, 1  ;;  %v810_v1 = vmul.f32 %v4496_v14, %v7339_v6  ;;  %v5710_v45 = vpop.permute.xlu0 %1801  ;;  %v1027_v7 = vmul.f32 %v4513_v23, %v7338_v22  ;;  %v1028_v17 = vmul.f32 %v4513_v23, %v7339_v6 }
 0x154   : > { %4202 = vmatpush1.bf16.msra.mxu1 %v4141_v33  ;;  %4143 = vmatprep.subr.bf16.mxu0 %v7336_v11  ;;  %v1701_v33 = vrot.slane %v5650_v38, 2  ;;  %7348 = vst [vmem:[#allocation45_spill] sm:$0xff] %v5687_v18  ;;  %7350 = vst [vmem:[#allocation46_spill] sm:$0xff] %v5710_v45  ;;  %v837_v5 = vadd.f32 %v809_v57, %v767_v21  ;;  %v423_v21 = vmul.f32 %v4429_v40, %v7338_v22 }
 0x155   : > { %1661 = vrot.lane.b32.xlu1 %v5501_v30, %s4334_s7  ;;  %4187 = vmatprep.subr.bf16.mxu1 %v7336_v11 }
 0x156   : > { %v5722_v16 = vsel %vm686_vm1, %v1701_v33, %v5683_v54  ;;  %v2387_v33 = vld [vmem:[%s7034_s3 + $0x98] sm:$0xff] }
 0x157   : > { %1771 = vrot.lane.b32.xlu0 %v5383_v4, %s4333_s6  ;;  %4145 = vmatpush1.bf16.msra.mxu0 %v4144_v24  ;;  %v2384_v4 = vld [vmem:[%s7034_s3 + $0x80] sm:$0xff]  ;;  %7351 = vst [vmem:[#allocation47_spill] sm:$0xff] %v5722_v16 }
 0x158   : > { %4203 = vmatpush1.bf16.msra.mxu1 %v4144_v24  ;;  %v5703_v24 = vmul.f32 %v4426_v39, %v7339_v6  ;;  %4146 = vmatprep.subr.bf16.mxu0 %v7336_v11 }
 0x159   : > { %1769 = vrot.lane.b32.xlu1 %v5515_v62, %s4333_s6  ;;  %4188 = vmatprep.subr.bf16.mxu1 %v7336_v11  ;;  %v768_v62 = vadd.f32 %v703_v44, %v609_v49  ;;  %v932_v44 = vsel %vm527_vm0, %v930_v61, %v931_v36  ;;  %v2386_v49 = vld [vmem:[%s7034_s3 + $0x90] sm:$0xff]  ;;  %v1088_v61 = vrot.slane %v1027_v7, 2  ;;  %v1255_v7 = vmul.f32 %v4526_v29, %v5593_v3 }
 0x15a   : > { %v995_v47 = vadd.f32 %v932_v44, %v837_v5  ;;  %v4153_v30 = vpack.c.bf16 %v2387_v33, %v2386_v49  ;;  %v2388_v5 = vld [vmem:[%s7034_s3 + $0xa0] sm:$0xff]  ;;  %v451_v49 = vadd.f32 %v5310_v28, %v423_v21 }
 0x15b   : > { %1843 = vrot.lane.b32.xlu0 %v5398_v41, %s4332_s30  ;;  %v7349_v41 = vrot.slane %v7347_v51, 1  ;;  %4148 = vmatpush1.bf16.msra.mxu0 %v4147_v56  ;;  %v838_v57 = vadd.f32 %v810_v1, %v768_v62  ;;  %v424_v62 = vmul.f32 %v4429_v40, %v7339_v6  ;;  %v642_v1 = vmul.f32 %v4436_v43, %v7338_v22 }
 0x15c   : > { %4204 = vmatpush1.bf16.msra.mxu1 %v4147_v56  ;;  %4149 = vmatprep.subr.bf16.mxu0 %v7336_v11 }
 0x15d   : > { %4266 = vrot.lane.b32.xlu1 %v4265_v19, %s4333_s6  ;;  %v2049_v55 = vsel %vm527_vm0, %v2047_v32, %v7349_v41  ;;  %v5714_v19 = vpop.permute.xlu1 %344  ;;  %v5726_v32 = vsel %vm527_vm0, %v1593_v31, %v5687_v18  ;;  %v4150_v41 = vpack.c.bf16 %v2385_v42, %v2384_v4  ;;  %v546_v4 = vrot.slane %v483_v46, 1  ;;  %4189 = vmatprep.subr.bf16.mxu1 %v7336_v11 }
 0x15e   : > { %7352 = vst [vmem:[#allocation48_spill] sm:$0xff] %v5726_v32  ;;  %v547_v31 = vrot.slane %v5703_v24, 1  ;;  %v4270_v56 = vpack.i.bf16 %v7331_v0, %v5726_v32  ;;  %v1089_v42 = vrot.slane %v1028_v17, 2  ;;  %v1256_v17 = vmul.f32 %v4526_v29, %v5714_v19  ;;  %v2389_v24 = vld [vmem:[%s7034_s3 + $0xa8] sm:$0xff] }
 0x15f   : > { %1913 = vrot.lane.b32.xlu0 %v5722_v16, %s4334_s7  ;;  %4151 = vmatpush1.bf16.msra.mxu0 %v4150_v41  ;;  %v996_v44 = vadd.f32 %v931_v36, %v838_v57  ;;  %v1195_v0 = vmul.f32 %v4533_v35, %v5593_v3  ;;  %v1196_v22 = vmul.f32 %v4533_v35, %v5714_v19 }
 0x160   : > { %4205 = vmatpush1.bf16.msra.mxu1 %v4150_v41  ;;  %v643_v41 = vmul.f32 %v4436_v43, %v7339_v6  ;;  %4152 = vmatprep.subr.bf16.mxu0 %v7336_v11  ;;  %v548_v33 = vsel %vm527_vm0, %v546_v4, %v547_v31  ;;  %v4156_v6 = vpack.c.bf16 %v2389_v24, %v2388_v5  ;;  %v1316_v4 = vrot.slane %v1255_v7, 1 }
 0x161   : > { %2094 = vrot.lane.b32.xlu1 %v2049_v55, %s4332_s30  ;;  %v5745_v55 = vpop.permute.xlu0 %1981  ;;  %v5749_v46 = vpop.permute.xlu1 %354  ;;  %4190 = vmatprep.subr.bf16.mxu1 %v7336_v11  ;;  %v452_v36 = vadd.f32 %v5310_v28, %v424_v62  ;;  %v1317_v57 = vrot.slane %v1256_v17, 1  ;;  %v871_v5 = vmul.f32 %v4483_v8, %v5593_v3  ;;  %v5798_v7 = vmul.f32 %v4483_v8, %v5714_v19 }
 0x162   : > { %7353 = vst [vmem:[#allocation49_spill] sm:$0xff] %v5745_v55  ;;  %v706_v62 = vrot.slane %v643_v41, 2  ;;  %v1413_v17 = vmul.f32 %v5598_v34, %v5593_v3  ;;  %v610_v41 = vadd.f32 %v548_v33, %v451_v49  ;;  %v812_v49 = vmul.f32 %v4496_v14, %v5714_v19 }
 0x163   : > { %4271 = vrot.lane.b32.xlu0 %v4270_v56, %s4332_s30  ;;  %v1090_v56 = vsel %vm686_vm1, %v1088_v61, %v1089_v42  ;;  %4154 = vmatpush1.bf16.msra.mxu0 %v4153_v30  ;;  %v705_v61 = vrot.slane %v642_v1, 2  ;;  %v1414_v1 = vmul.f32 %v5598_v34, %v5714_v19 }
 0x164   : > { %4206 = vmatpush1.bf16.msra.mxu1 %v4153_v30  ;;  %v2391_v30 = vld [vmem:[%s7034_s3 + $0xb8] sm:$0xff]  ;;  %4155 = vmatprep.subr.bf16.mxu0 %v7336_v11 }
 0x165   : > { %1841 = vrot.lane.b32.xlu1 %v7284_v25, %s4332_s30  ;;  %v1153_v25 = vadd.f32 %v1090_v56, %v995_v47  ;;  %v5782_v21 = vpop.permute.xlu1 %2013  ;;  %v2390_v47 = vld [vmem:[%s7034_s3 + $0xb0] sm:$0xff]  ;;  %v5792_v24 = vpop.permute.xlu0 %1979  ;;  %v1154_v56 = vadd.f32 %v1089_v42, %v996_v44  ;;  %4191 = vmatprep.subr.bf16.mxu1 %v7336_v11  ;;  %v611_v42 = vadd.f32 %v547_v31, %v452_v36  ;;  %v933_v31 = vrot.slane %v871_v5, 1 }
 0x166   : > { %7354 = vst [vmem:[#allocation50_spill] sm:$0xff] %v5792_v24  ;;  %v4159_v24 = vpack.c.bf16 %v2391_v30, %v2390_v47  ;;  %v1318_v44 = vsel %vm527_vm0, %v1316_v4, %v1317_v57  ;;  %v707_v33 = vsel %vm686_vm1, %v705_v61, %v706_v62  ;;  %v1474_v36 = vrot.slane %v1413_v17, 2 }
 0x167   : > { %1629 = vrot.lane.b32.xlu0 %v5508_v20, %s4334_s7  ;;  %v1223_v20 = vadd.f32 %v1195_v0, %v1153_v25  ;;  %v1224_v45 = vadd.f32 %v1196_v22, %v1154_v56  ;;  %4157 = vmatpush1.bf16.msra.mxu0 %v4156_v6  ;;  %v2393_v25 = vld [vmem:[%s7034_s3 + $0xc8] sm:$0xff]  ;;  %v811_v0 = vmul.f32 %v4496_v14, %v5593_v3  ;;  %v934_v22 = vrot.slane %v5798_v7, 1  ;;  %v2394_v7 = vld [vmem:[%s7034_s3 + $0xd0] sm:$0xff] }
 0x168   : > { %4207 = vmatpush1.bf16.msra.mxu1 %v4156_v6  ;;  %4158 = vmatprep.subr.bf16.mxu0 %v7336_v11  ;;  %v1475_v4 = vrot.slane %v1414_v1, 2  ;;  %v769_v47 = vadd.f32 %v707_v33, %v610_v41  ;;  %v4162_v5 = vpack.c.bf16 %v2393_v25, %v2392_v53  ;;  %v770_v12 = vadd.f32 %v706_v62, %v611_v42 }
 0x169   : > { %1911 = vrot.lane.b32.xlu1 %v5533_v37, %s4334_s7  ;;  %4192 = vmatprep.subr.bf16.mxu1 %v7336_v11  ;;  %v5823_v6 = vpop.permute.xlu1 %1977  ;;  %v1381_v30 = vadd.f32 %v1318_v44, %v1223_v20  ;;  %v1382_v56 = vadd.f32 %v1317_v57, %v1224_v45  ;;  %v7355_v61 = vrot.slane %v7347_v51, 1  ;;  %v2395_v20 = vld [vmem:[%s7034_s3 + $0xd8] sm:$0xff]  ;;  %v1029_v53 = vmul.f32 %v4513_v23, %v5593_v3 }
 0x16a   : > { %v1030_v45 = vmul.f32 %v4513_v23, %v5714_v19  ;;  %v840_v57 = vadd.f32 %v812_v49, %v770_v12  ;;  %v1476_v62 = vsel %vm686_vm1, %v1474_v36, %v1475_v4  ;;  %v935_v17 = vsel %vm527_vm0, %v933_v31, %v934_v22  ;;  %v2396_v12 = vld [vmem:[%s7034_s3 + $0xe0] sm:$0xff] }
 0x16b   : > { %1985 = vrot.lane.b32.xlu0 %v5652_v2, %s4333_s6  ;;  %4160 = vmatpush1.bf16.msra.mxu0 %v4159_v24  ;;  %v5846_v1 = vadd.f32 %v1476_v62, %v1381_v30  ;;  %v5848_v41 = vadd.f32 %v1475_v4, %v1382_v56  ;;  %v4165_v44 = vpack.c.bf16 %v2395_v20, %v2394_v7  ;;  %v1091_v31 = vrot.slane %v1029_v53, 2  ;;  %v2398_v56 = vld [vmem:[%s7034_s3 + $0xf0] sm:$0xff]  ;;  %v2400_v62 = vld [vmem:[%s7034_s3 + $0x100] sm:$0xff] }
 0x16c   : > { %v5825_v55 = vpop.permute.xlu0 %1835  ;;  %4208 = vmatpush1.bf16.msra.mxu1 %v4159_v24  ;;  %4161 = vmatprep.subr.bf16.mxu0 %v7336_v11  ;;  %v839_v24 = vadd.f32 %v811_v0, %v769_v47  ;;  %v2397_v0 = vld [vmem:[%s7034_s3 + $0xe8] sm:$0xff]  ;;  %v1092_v49 = vrot.slane %v1030_v45, 2  ;;  %v998_v4 = vadd.f32 %v934_v22, %v840_v57  ;;  %v1258_v7 = vmul.f32 %v4526_v29, %v5749_v46 }
 0x16d   : > { %2021 = vrot.lane.b32.xlu1 %v7347_v51, %s4333_s6  ;;  %4193 = vmatprep.subr.bf16.mxu1 %v7336_v11  ;;  %7356 = vst [vmem:[#allocation51_spill] sm:$0xff] %v5846_v1  ;;  %v5854_v25 = vpop.permute.xlu1 %1805  ;;  %v1596_v33 = vrot.slane %v5846_v1, 1  ;;  %v5868_v36 = vrot.slane %v5848_v41, 1  ;;  %v4168_v47 = vpack.c.bf16 %v2397_v0, %v2396_v12  ;;  %v485_v20 = vmul.f32 %v4426_v39, %v5593_v3 }
 0x16e   : > { %v1093_v22 = vsel %vm686_vm1, %v1091_v31, %v1092_v49  ;;  %v486_v53 = vmul.f32 %v4426_v39, %v5714_v19  ;;  %v1198_v0 = vmul.f32 %v4533_v35, %v5749_v46  ;;  %v1197_v31 = vmul.f32 %v4533_v35, %v5632_v48 }
 0x16f   : > { %2096 = vrot.lane.b32.xlu0 %v7355_v61, %s4332_s30  ;;  %4163 = vmatpush1.bf16.msra.mxu0 %v4162_v5  ;;  %v1257_v61 = vmul.f32 %v4526_v29, %v5632_v48  ;;  %v549_v51 = vrot.slane %v485_v20, 1  ;;  %v645_v20 = vmul.f32 %v4436_v43, %v5714_v19 }
 0x170   : > { %v5850_v42 = vpop.permute.xlu0 %2019  ;;  %4209 = vmatpush1.bf16.msra.mxu1 %v4162_v5  ;;  %4164 = vmatprep.subr.bf16.mxu0 %v7336_v11  ;;  %v2399_v5 = vld [vmem:[%s7034_s3 + $0xf8] sm:$0xff] }
 0x171   : > { %1627 = vrot.lane.b32.xlu1 %v5273_v60, %s4334_s7  ;;  %7357 = vst [vmem:[#allocation52_spill] sm:$0xff] %v5850_v42  ;;  %4194 = vmatprep.subr.bf16.mxu1 %v7336_v11  ;;  %v4171_v12 = vpack.c.bf16 %v2399_v5, %v2398_v56  ;;  %v425_v56 = vmul.f32 %v4429_v40, %v5593_v3 }
 0x172   : > { %v5893_v45 = vpop.permute.xlu1 %2017 }
 0x173   : > { %1735 = vrot.lane.b32.xlu0 %v5344_v52, %s4333_s6  ;;  %4166 = vmatpush1.bf16.msra.mxu0 %v4165_v44  ;;  %7358 = vst [vmem:[#allocation53_spill] sm:$0xff] %v5893_v45 }
 0x174   : > { %4210 = vmatpush1.bf16.msra.mxu1 %v4165_v44  ;;  %v5874_v30 = vpop.permute.xlu0 %1939  ;;  %4167 = vmatprep.subr.bf16.mxu0 %v7336_v11  ;;  %v1156_v44 = vadd.f32 %v1092_v49, %v998_v4  ;;  %v1320_v49 = vrot.slane %v1258_v7, 1  ;;  %v1416_v4 = vmul.f32 %v5598_v34, %v5749_v46  ;;  %v426_v7 = vmul.f32 %v4429_v40, %v5714_v19 }
 0x175   : > { %1845 = vrot.lane.b32.xlu1 %v5103_v63, %s4332_s30  ;;  %v997_v63 = vadd.f32 %v935_v17, %v839_v24  ;;  %4195 = vmatprep.subr.bf16.mxu1 %v7336_v11  ;;  %v2401_v24 = vld [vmem:[%s7034_s3 + $0x108] sm:$0xff]  ;;  %v5903_v17 = vsel %vm527_vm0, %v1596_v33, %v5868_v36  ;;  %v1319_v33 = vrot.slane %v1257_v61, 1  ;;  %v644_v61 = vmul.f32 %v4436_v43, %v5593_v3 }
 0x176   : > { %v1226_v52 = vadd.f32 %v1198_v0, %v1156_v44  ;;  %v454_v0 = vadd.f32 %v5310_v28, %v426_v7 }
 0x177   : > { %1915 = vrot.lane.b32.xlu0 %v5683_v54, %s4334_s7  ;;  %v1155_v57 = vadd.f32 %v1093_v22, %v997_v63  ;;  %4169 = vmatpush1.bf16.msra.mxu0 %v4168_v47  ;;  %v1415_v63 = vmul.f32 %v5598_v34, %v5632_v48 }
 0x178   : > { %4211 = vmatpush1.bf16.msra.mxu1 %v4168_v47  ;;  %4170 = vmatprep.subr.bf16.mxu0 %v7336_v11  ;;  %v5919_v47 = vpack.c.bf16 %v2401_v24, %v2400_v62  ;;  %v1478_v62 = vrot.slane %v1416_v4, 2  ;;  %v453_v24 = vadd.f32 %v5310_v28, %v425_v56  ;;  %v1384_v44 = vadd.f32 %v1320_v49, %v1226_v52 }
 0x179   : > { %1987 = vrot.lane.b32.xlu1 %v5846_v1, %s4333_s6  ;;  %4196 = vmatprep.subr.bf16.mxu1 %v7336_v11  ;;  %v5923_v5 = vpop.permute.xlu0 %1903  ;;  %v1225_v22 = vadd.f32 %v1197_v31, %v1155_v57  ;;  %v1477_v57 = vrot.slane %v1415_v63, 2  ;;  %v427_v31 = vmul.f32 %v4429_v40, %v5632_v48  ;;  %v709_v4 = vrot.slane %v645_v20, 2 }
 0x17a   : > { %7359 = vst [vmem:[#allocation54_spill] sm:$0xff] %v5919_v47  ;;  %v487_v52 = vmul.f32 %v4426_v39, %v5632_v48  ;;  %v5959_v7 = vadd.f32 %v1478_v62, %v1384_v44 }
 0x17b   : > { %2062 = vrot.lane.b32.xlu0 %v5903_v17, %s4332_s30  ;;  %4172 = vmatpush1.bf16.msra.mxu0 %v4171_v12  ;;  %v1479_v63 = vsel %vm686_vm1, %v1477_v57, %v1478_v62  ;;  %v873_v57 = vmul.f32 %v4483_v8, %v5632_v48 }
 0x17c   : > { %4212 = vmatpush1.bf16.msra.mxu1 %v4171_v12  ;;  %v552_v62 = vrot.slane %v487_v52, 1 }
 0x17d   : > { %1631 = vrot.lane.b32.xlu1 %v5294_v10, %s4334_s7  ;;  %v550_v10 = vrot.slane %v486_v53, 1  ;;  %v1321_v53 = vsel %vm527_vm0, %v1319_v33, %v1320_v49  ;;  %4174 = vmatprep.subr.bf16.mxu1 %v5919_v47  ;;  %v708_v33 = vrot.slane %v644_v61, 2  ;;  %v428_v61 = vmul.f32 %v4429_v40, %v5749_v46 }
 0x17e   : > { %v1383_v3 = vadd.f32 %v1321_v53, %v1225_v22 }
 0x17f   : > { %v5931_v11 = vpop.permute.xlu1 %2011  ;;  %1809 = vrot.lane.b32.xlu0 %v7304_v50, %s4332_s30  ;;  %v551_v12 = vsel %vm527_vm0, %v549_v51, %v550_v10  ;;  %v488_v51 = vmul.f32 %v4426_v39, %v5749_v46  ;;  %v613_v53 = vadd.f32 %v550_v10, %v454_v0  ;;  %v455_v50 = vadd.f32 %v5310_v28, %v427_v31 }
 0x180   : > { %v5957_v56 = vadd.f32 %v1479_v63, %v1383_v3  ;;  %v612_v22 = vadd.f32 %v551_v12, %v453_v24  ;;  %v646_v39 = vmul.f32 %v4436_v43, %v5632_v48  ;;  %v710_v20 = vsel %vm686_vm1, %v708_v33, %v709_v4 }
 0x181   : > { %1737 = vrot.lane.b32.xlu1 %v5569_v26, %s4333_s6  ;;  %v5948_v19 = vpop.permute.xlu0 %2088  ;;  %v874_v10 = vmul.f32 %v4483_v8, %v5749_v46  ;;  %v553_v3 = vrot.slane %v488_v51, 1  ;;  %v1704_v0 = vrot.slane %v5846_v1, 2  ;;  %v5983_v31 = vrot.slane %v5848_v41, 2 }
 0x182   : > { %v4280_v44 = vpack.i.bf16 %v5722_v16, %v5957_v56  ;;  %v771_v12 = vadd.f32 %v710_v20, %v612_v22  ;;  %v1707_v63 = vrot.slane %v5957_v56, 2  ;;  %v5987_v33 = vrot.slane %v5959_v7, 2 }
 0x183   : > { %1989 = vrot.lane.b32.xlu0 %v5848_v41, %s4333_s6  ;;  %v456_v52 = vadd.f32 %v5310_v28, %v428_v61  ;;  %v647_v51 = vmul.f32 %v4436_v43, %v5749_v46  ;;  %v813_v22 = vmul.f32 %v4496_v14, %v5632_v48  ;;  %v936_v20 = vrot.slane %v873_v57, 1 }
 0x184   : > { %v1031_v16 = vmul.f32 %v4513_v23, %v5632_v48  ;;  %v1032_v26 = vmul.f32 %v4513_v23, %v5749_v46  ;;  %v554_v28 = vsel %vm527_vm0, %v552_v62, %v553_v3  ;;  %v6012_v57 = vsel %vm686_vm1, %v1707_v63, %v5987_v33 }
 0x185   : > { %2060 = vrot.lane.b32.xlu1 %v5687_v18, %s4332_s30  ;;  %v841_v42 = vadd.f32 %v813_v22, %v771_v12  ;;  %7361 = vst [vmem:[#allocation56_spill] sm:$0xff] %v6012_v57  ;;  %v711_v48 = vrot.slane %v646_v39, 2  ;;  %v712_v45 = vrot.slane %v647_v51, 2  ;;  %v814_v62 = vmul.f32 %v4496_v14, %v5749_v46 }
 0x186   : > { %v1095_v12 = vrot.slane %v1032_v26, 2 }
 0x187   : > { %v5955_v49 = vpop.permute.xlu1 %1803  ;;  %2064 = vrot.lane.b32.xlu0 %v5868_v36, %s4332_s30 }
 0x189   : > { %1739 = vrot.lane.b32.xlu1 %v5533_v37, %s4333_s6  ;;  %v5977_v24 = vpop.permute.xlu0 %1727  ;;  %v937_v37 = vrot.slane %v874_v10, 1  ;;  %v615_v10 = vadd.f32 %v553_v3, %v456_v52  ;;  %v7363_v52 = vld [vmem:[#allocation7_spill] sm:$0xff] }
 0x18a   : > { %v875_v51 = vmul.f32 %v4483_v8, %v7363_v52 }
 0x18b   : > { %v5975_v40 = vpop.permute.xlu1 %1655  ;;  %4281 = vrot.lane.b32.xlu0 %v4280_v44, %s4333_s6  ;;  %v6008_v44 = vsel %vm686_vm1, %v1704_v0, %v5983_v31  ;;  %v614_v0 = vadd.f32 %v554_v28, %v455_v50  ;;  %v1259_v50 = vmul.f32 %v4526_v29, %v7363_v52 }
 0x18c   : > { %v4275_v39 = vpack.i.bf16 %v5726_v32, %v6008_v44 }
 0x18d   : > { %1811 = vrot.lane.b32.xlu1 %v5650_v38, %s4332_s30  ;;  %v6004_v43 = vpop.permute.xlu0 %2052  ;;  %v772_v38 = vadd.f32 %v709_v4, %v613_v53  ;;  %v938_v4 = vsel %vm527_vm0, %v936_v20, %v937_v37  ;;  %v1094_v53 = vrot.slane %v1031_v16, 2  ;;  %v1599_v20 = vrot.slane %v5957_v56, 1 }
 0x18e   : > { %7360 = vst [vmem:[#allocation55_spill] sm:$0xff] %v6004_v43  ;;  %v999_v63 = vadd.f32 %v938_v4, %v841_v42  ;;  %v6033_v16 = vrot.slane %v5959_v7, 1  ;;  %v774_v42 = vadd.f32 %v712_v45, %v615_v10  ;;  %v1033_v4 = vmul.f32 %v4513_v23, %v7363_v52 }
 0x18f   : > { %v6002_v61 = vpop.permute.xlu1 %1763  ;;  %1921 = vrot.lane.b32.xlu0 %v6012_v57, %s4334_s7  ;;  %v842_v46 = vadd.f32 %v814_v62, %v772_v38  ;;  %v713_v38 = vsel %vm686_vm1, %v711_v48, %v712_v45  ;;  %v815_v62 = vmul.f32 %v4496_v14, %v7363_v52 }
 0x190   : > { %v773_v28 = vadd.f32 %v713_v38, %v614_v0  ;;  %v6058_v10 = vsel %vm527_vm0, %v1599_v20, %v6033_v16  ;;  %v1322_v0 = vrot.slane %v1259_v50, 1  ;;  %v1097_v43 = vrot.slane %v1033_v4, 2 }
 0x191   : > { %1813 = vrot.lane.b32.xlu1 %v5652_v2, %s4332_s30  ;;  %v6025_v3 = vpop.permute.xlu0 %2056  ;;  %v7364_v2 = vld [vmem:[#allocation4_spill] sm:$0xff]  ;;  %v1000_v57 = vadd.f32 %v937_v37, %v842_v46  ;;  %v1199_v37 = vmul.f32 %v4533_v35, %v7363_v52  ;;  %v4285_v20 = vpack.i.bf16 %v5846_v1, %v6058_v10 }
 0x192   : > { %7362 = vst [vmem:[#allocation57_spill] sm:$0xff] %v6025_v3  ;;  %v876_v47 = vmul.f32 %v4483_v8, %v7364_v2  ;;  %v1260_v26 = vmul.f32 %v4526_v29, %v7364_v2  ;;  %v1096_v8 = vsel %vm686_vm1, %v1094_v53, %v1095_v12  ;;  %v939_v3 = vrot.slane %v875_v51, 1 }
 0x193   : > { %v6021_v22 = vpop.permute.xlu1 %1619  ;;  %1635 = vrot.lane.b32.xlu0 %v5687_v18, %s4334_s7  ;;  %v1157_v32 = vadd.f32 %v1096_v8, %v999_v63  ;;  %v816_v48 = vmul.f32 %v4496_v14, %v7364_v2  ;;  %v1034_v45 = vmul.f32 %v4513_v23, %v7364_v2  ;;  %v1417_v23 = vmul.f32 %v5598_v34, %v7363_v52 }
 0x194   : > { %v940_v53 = vrot.slane %v876_v47, 1  ;;  %v1323_v63 = vrot.slane %v1260_v26, 1  ;;  %v1418_v46 = vmul.f32 %v5598_v34, %v7364_v2  ;;  %v843_v51 = vadd.f32 %v815_v62, %v773_v28 }
 0x195   : > { %4276 = vrot.lane.b32.xlu1 %v4275_v39, %s4334_s7  ;;  %v6050_v18 = vpop.permute.xlu0 %1659  ;;  %v844_v14 = vadd.f32 %v816_v48, %v774_v42  ;;  %v1227_v8 = vadd.f32 %v1199_v37, %v1157_v32  ;;  %v1098_v50 = vrot.slane %v1034_v45, 2  ;;  %v1200_v52 = vmul.f32 %v4533_v35, %v7364_v2  ;;  %v7366_v45 = vld [vmem:[#allocation5_spill] sm:$0xff] }
 0x196   : > { %7365 = vst [vmem:[#allocation7_spill] sm:$0xff] %v6050_v18  ;;  %v1158_v18 = vadd.f32 %v1095_v12, %v1000_v57  ;;  %v1324_v26 = vsel %vm527_vm0, %v1322_v0, %v1323_v63  ;;  %v941_v42 = vsel %vm527_vm0, %v939_v3, %v940_v53  ;;  %v1480_v28 = vrot.slane %v1417_v23, 2 }
 0x197   : > { %v6048_v39 = vpop.permute.xlu1 %1623  ;;  %1993 = vrot.lane.b32.xlu0 %v5959_v7, %s4333_s6  ;;  %v1481_v62 = vrot.slane %v1418_v46, 2  ;;  %v1001_v48 = vadd.f32 %v941_v42, %v843_v51  ;;  %v1002_v1 = vadd.f32 %v940_v53, %v844_v14  ;;  %v1385_v57 = vadd.f32 %v1324_v26, %v1227_v8 }
 0x198   : > { %v1228_v12 = vadd.f32 %v1200_v52, %v1158_v18  ;;  %v1099_v2 = vsel %vm686_vm1, %v1097_v43, %v1098_v50  ;;  %v1261_v3 = vmul.f32 %v4526_v29, %v4498_v15  ;;  %v1262_v53 = vmul.f32 %v4526_v29, %v7366_v45 }
 0x199   : > { %1919 = vrot.lane.b32.xlu1 %v5983_v31, %s4334_s7  ;;  %v6074_v38 = vpop.permute.xlu0 %1767  ;;  %v1482_v37 = vsel %vm686_vm1, %v1480_v28, %v1481_v62  ;;  %v1159_v0 = vadd.f32 %v1099_v2, %v1001_v48  ;;  %v1160_v18 = vadd.f32 %v1098_v50, %v1002_v1  ;;  %v1201_v43 = vmul.f32 %v4533_v35, %v4498_v15 }
 0x19a   : > { %v6099_v23 = vadd.f32 %v1482_v37, %v1385_v57  ;;  %v1386_v46 = vadd.f32 %v1323_v63, %v1228_v12  ;;  %v1325_v29 = vrot.slane %v1261_v3, 1  ;;  %v1326_v1 = vrot.slane %v1262_v53, 1 }
 0x19b   : > { %v6070_v47 = vpop.permute.xlu1 %1907  ;;  %1639 = vrot.lane.b32.xlu0 %v5868_v36, %s4334_s7  ;;  %v1419_v8 = vmul.f32 %v5598_v34, %v4498_v15  ;;  %v1420_v63 = vmul.f32 %v5598_v34, %v7366_v45  ;;  %v1229_v50 = vadd.f32 %v1201_v43, %v1159_v0 }
 0x19c   : > { %v6113_v26 = vadd.f32 %v1481_v62, %v1386_v46  ;;  %v1327_v28 = vsel %vm527_vm0, %v1325_v29, %v1326_v1  ;;  %v1602_v62 = vrot.slane %v6099_v23, 1  ;;  %v1710_v37 = vrot.slane %v6099_v23, 2 }
 0x19d   : > { %4286 = vrot.lane.b32.xlu1 %v4285_v20, %s4332_s30  ;;  %v6085_v4 = vpop.permute.xlu0 %1947  ;;  %v1202_v20 = vmul.f32 %v4533_v35, %v7366_v45  ;;  %v1483_v48 = vrot.slane %v1419_v8, 2  ;;  %v1484_v15 = vrot.slane %v1420_v63, 2  ;;  %v1387_v34 = vadd.f32 %v1327_v28, %v1229_v50 }
 0x19e   : > { %v6124_v45 = vrot.slane %v6113_v26, 1  ;;  %v6128_v0 = vrot.slane %v6113_v26, 2  ;;  %v2145_v8 = vsel %vm2125_vm2, %v5239_v9, %v5975_v40 }
 0x19f   : > { %v6083_v32 = vpop.permute.xlu1 %1731  ;;  %1745 = vrot.lane.b32.xlu0 %v6008_v44, %s4333_s6  ;;  %v1230_v52 = vadd.f32 %v1202_v20, %v1160_v18  ;;  %v2170_v28 = vsel %vm2150_vm3, %v2145_v8, %v6002_v61  ;;  %v7369_v8 = vld [vmem:[#allocation29_spill] sm:$0xff] }
 0x1a0   : > { %v6148_v50 = vsel %vm527_vm0, %v1602_v62, %v6124_v45 }
 0x1a1   : > { %1637 = vrot.lane.b32.xlu1 %v5903_v17, %s4334_s7  ;;  %v4232_v51 = vpop.permute.xlu0 %4231  ;;  %v1388_v2 = vadd.f32 %v1326_v1, %v1230_v52 }
 0x1a2   : > { %v4234_v57 = vunpack.i.h.bf16 %v4232_v51  ;;  %v4233_v12 = vunpack.i.l.bf16 %v4232_v51  ;;  %v1485_v51 = vsel %vm686_vm1, %v1483_v48, %v1484_v15 }
 0x1a3   : > { %v6097_v14 = vpop.permute.xlu1 %1943  ;;  %2068 = vrot.lane.b32.xlu0 %v6033_v16, %s4332_s30  ;;  %v6139_v29 = vadd.f32 %v1485_v51, %v1387_v34  ;;  %v6141_v1 = vadd.f32 %v1484_v15, %v1388_v2 }
 0x1a4   : > { %v2200_v20 = vsel %vm2125_vm2, %v5458_v59, %v4233_v12  ;;  %v2126_v43 = vsel %vm2125_vm2, %v5339_v58, %v4234_v57  ;;  %v6152_v59 = vsel %vm686_vm1, %v1710_v37, %v6128_v0  ;;  %v2219_v58 = vsel %vm2125_vm2, %v5320_v27, %v5874_v30 }
 0x1a5   : > { %1995 = vrot.lane.b32.xlu1 %v6099_v23, %s4333_s6  ;;  %v1654_v35 = vpop.permute.xlu0 %1653  ;;  %v1605_v34 = vrot.slane %v6139_v29, 1  ;;  %v6169_v61 = vrot.slane %v6141_v1, 1  ;;  %v2243_v2 = vsel %vm2150_vm3, %v2219_v58, %v5782_v21  ;;  %v4290_v37 = vpack.i.bf16 %v6058_v10, %v6152_v59 }
 0x1a6   : > { %v2267_v58 = vsel %vm2175_vm4, %v2243_v2, %v5948_v19 }
 0x1a7   : > { %v6115_v42 = vpop.permute.xlu1 %1663  ;;  %1747 = vrot.lane.b32.xlu0 %v5983_v31, %s4333_s6  ;;  %v6203_v19 = vsel %vm527_vm0, %v1605_v34, %v6169_v61  ;;  %v2403_v34 = vld [vmem:[%s7034_s3 + $0x118] sm:$0xff] }
 0x1a9   : > { %1743 = vrot.lane.b32.xlu1 %v5683_v54, %s4333_s6  ;;  %v1938_v53 = vpop.permute.xlu0 %1937 }
 0x1ab   : > { %v4237_v3 = vpop.permute.xlu1 %4236  ;;  %1819 = vrot.lane.b32.xlu0 %v5957_v56, %s4332_s30 }
 0x1ac   : > { %v4239_v18 = vunpack.i.h.bf16 %v4237_v3  ;;  %v4238_v46 = vunpack.i.l.bf16 %v4237_v3 }
 0x1ad   : > { %1923 = vrot.lane.b32.xlu1 %v5987_v33, %s4334_s7  ;;  %v4242_v52 = vpop.permute.xlu0 %4241 }
 0x1ae   : > { %v4244_v48 = vunpack.i.h.bf16 %v4242_v52  ;;  %v4243_v40 = vunpack.i.l.bf16 %v4242_v52  ;;  %v2224_v15 = vsel %vm2150_vm3, %v2200_v20, %v4238_v46  ;;  %v2151_v57 = vsel %vm2150_vm3, %v2126_v43, %v4239_v18  ;;  %v7367_v46 = vld [vmem:[#allocation30_spill] sm:$0xff]  ;;  %v7368_v43 = vld [vmem:[#allocation25_spill] sm:$0xff] }
 0x1af   : > { %v1906_v63 = vpop.permute.xlu1 %1905  ;;  %1821 = vrot.lane.b32.xlu0 %v5959_v7, %s4332_s30  ;;  %v2195_v18 = vsel %vm2175_vm4, %v2170_v28, %v5654_v13  ;;  %v2127_v51 = vsel %vm2125_vm2, %v7367_v46, %v6021_v22  ;;  %v2203_v20 = vsel %vm2125_vm2, %v5273_v60, %v6070_v47  ;;  %v2144_v21 = vsel %vm2125_vm2, %v7368_v43, %v1654_v35  ;;  %v7370_v22 = vld [vmem:[#allocation20_spill] sm:$0xff]  ;;  %v7371_v60 = vld [vmem:[#allocation22_spill] sm:$0xff]  ;;  %v7372_v35 = vld [vmem:[#allocation21_spill] sm:$0xff] }
 0x1b0   : > { %v2248_v12 = vsel %vm2175_vm4, %v2224_v15, %v4243_v40  ;;  %v2176_v30 = vsel %vm2175_vm4, %v2151_v57, %v4244_v48  ;;  %v2218_v52 = vsel %vm2125_vm2, %v7369_v8, %v1938_v53  ;;  %v2201_v47 = vsel %vm2125_vm2, %v7371_v60, %v5923_v5  ;;  %v7373_v15 = vld [vmem:[#allocation49_spill] sm:$0xff] }
 0x1b1   : > { %2070 = vrot.lane.b32.xlu1 %v6148_v50, %s4332_s30  ;;  %v1622_v62 = vpop.permute.xlu0 %1621  ;;  %2600 = vmatprep.mubr.f32.mxu0 %v2248_v12  ;;  %v2129_v53 = vsel %vm2125_vm2, %v7372_v35, %v6048_v39  ;;  %v2359_v48 = vcombine.low %v2195_v18, %v2267_v58  ;;  %v2152_v40 = vsel %vm2150_vm3, %v2127_v51, %v5977_v24  ;;  %v2402_v39 = vld [vmem:[%s7034_s3 + $0x110] sm:$0xff]  ;;  %v7374_v24 = vld [vmem:[#allocation3_spill] sm:$0xff] }
 0x1b2   : > { %2601 = vmatmul.mubr.f32.vlgmr.msra.gmra.mrb[0].mxu0 %v2176_v30  ;;  %v2128_v28 = vsel %vm2125_vm2, %v7370_v22, %v1622_v62  ;;  %v2227_v57 = vsel %vm2150_vm3, %v2203_v20, %v7373_v15  ;;  %v2154_v12 = vsel %vm2150_vm3, %v2129_v53, %v6083_v32  ;;  %v2242_v2 = vsel %vm2150_vm3, %v2218_v52, %v5931_v11  ;;  %v7375_v52 = vld [vmem:[#allocation50_spill] sm:$0xff]  ;;  %v7377_v35 = vld [vmem:[#allocation55_spill] sm:$0xff]  ;;  %v7378_v53 = vld [vmem:[#allocation57_spill] sm:$0xff] }
 0x1b3   : > { %v1762_v3 = vpop.permute.xlu1 %1761  ;;  %4291 = vrot.lane.b32.xlu0 %v4290_v37, %s4334_s7  ;;  %v4300_v51 = vpack.i.bf16 %v6099_v23, %v6203_v19  ;;  %v4177_v20 = vpack.c.bf16 %v2403_v34, %v2402_v39 }
 0x1b4   : > { %v2169_v13 = vsel %vm2150_vm3, %v2144_v21, %v1762_v3  ;;  %v2202_v3 = vsel %vm2125_vm2, %v7374_v24, %v1906_v63  ;;  %v2179_v63 = vsel %vm2175_vm4, %v2154_v12, %v5854_v25  ;;  %v2225_v21 = vsel %vm2150_vm3, %v2201_v47, %v5823_v6  ;;  %v7380_v24 = vld [vmem:[#allocation54_spill] sm:$0xff] }
 0x1b5   : > { %1817 = vrot.lane.b32.xlu1 %v5848_v41, %s4332_s30  ;;  %v2087_v5 = vpop.permute.xlu0 %2086  ;;  %v6223_v62 = vsel %vm2175_vm4, %v2169_v13, %v5825_v55  ;;  %v7376_v13 = vld [vmem:[#allocation46_spill] sm:$0xff]  ;;  %v2249_v25 = vsel %vm2175_vm4, %v2225_v21, %v7377_v35 }
 0x1b6   : > { %v6227_v37 = vsel %vm2175_vm4, %v2242_v2, %v2087_v5  ;;  %v2177_v22 = vsel %vm2175_vm4, %v2152_v40, %v7376_v13 }
 0x1b7   : > { %v1730_v30 = vpop.permute.xlu1 %1729  ;;  %v2357_v46 = vcombine.high %v6223_v62, %v6227_v37  ;;  %1927 = vrot.lane.b32.xlu0 %v6128_v0, %s4334_s7  ;;  %v4042_v55 = vcombine.high %v6227_v37, %v2359_v48  ;;  %v2251_v48 = vsel %vm2175_vm4, %v2227_v57, %v7378_v53 }
 0x1b8   : > { %v2153_v32 = vsel %vm2150_vm3, %v2128_v28, %v1730_v30  ;;  %v2327_v6 = vcombine.low %v2179_v63, %v2251_v48 }
 0x1b9   : > { %1997 = vrot.lane.b32.xlu1 %v6113_v26, %s4333_s6  ;;  %v2178_v11 = vsel %vm2175_vm4, %v2153_v32, %v5955_v49  ;;  %v2226_v49 = vsel %vm2150_vm3, %v2202_v3, %v7375_v52  ;;  %v4252_v28 = vpop.permute.xlu0 %4251  ;;  %2670 = vmatprep.mubr.f32.mxu1 %v4042_v55  ;;  %v4041_v60 = vcombine.low %v2357_v46, %v2195_v18  ;;  %v7379_v18 = vld [vmem:[#allocation56_spill] sm:$0xff]  ;;  %v1713_v46 = vrot.slane %v6139_v29, 2  ;;  %v7382_v52 = vld [vmem:[#allocation18_spill] sm:$0xff] }
 0x1ba   : > { %v4023_v12 = vcombine.low %v2177_v22, %v2178_v11  ;;  %v4295_v5 = vpack.i.bf16 %v7379_v18, %v6139_v29  ;;  %v4254_v39 = vunpack.i.h.bf16 %v4252_v28  ;;  %v4253_v57 = vunpack.i.l.bf16 %v4252_v28 }
 0x1bb   : > { %v2055_v58 = vpop.permute.xlu1 %2054  ;;  %4301 = vrot.lane.b32.xlu0 %v4300_v51, %s4332_s30  ;;  %2671 = vmatmul.mubr.f32.vlgmr.msra.gmra.mrb[0].mxu1 %v4041_v60  ;;  %v6261_v55 = vrot.slane %v6141_v1, 2  ;;  %v7381_v51 = vld [vmem:[#allocation12_spill] sm:$0xff] }
 0x1bc   : > { %v2250_v15 = vsel %vm2175_vm4, %v2226_v49, %v2055_v58  ;;  %4176 = vmatpush3.bf16.msra.mxu1 %v7380_v24  ;;  %v7386_v24 = vld [vmem:[#allocation53_spill] sm:$0xff] }
 0x1bd   : > { %2072 = vrot.lane.b32.xlu1 %v6124_v45, %s4332_s30  ;;  %v4024_v47 = vcombine.low %v2249_v25, %v2250_v15  ;;  %v2325_v40 = vcombine.high %v2178_v11, %v2250_v15  ;;  %v4026_v2 = vcombine.high %v2250_v15, %v2327_v6  ;;  %v1946_v34 = vpop.permute.xlu0 %1945  ;;  %4178 = vmatprep.subr.bf16.mxu1 %v4177_v20 }
 0x1bf   : > { %v4247_v30 = vpop.permute.xlu1 %4246  ;;  %2605 = vmatprep.mubr.f32.mxu0 %v4024_v47  ;;  %v4025_v11 = vcombine.low %v2325_v40, %v2179_v63  ;;  %1645 = vrot.lane.b32.xlu0 %v6148_v50, %s4334_s7  ;;  %v6274_v63 = vsel %vm686_vm1, %v1713_v46, %v6261_v55  ;;  %v7383_v40 = vld [vmem:[#allocation19_spill] sm:$0xff] }
 0x1c0   : > { %v4249_v3 = vunpack.i.h.bf16 %v4247_v30  ;;  %v4248_v32 = vunpack.i.l.bf16 %v4247_v30  ;;  %2606 = vmatmul.mubr.f32.gmra.mrb[2].mxu0 %v4023_v12  ;;  %4180 = vmatpush3.bf16.msra.mxu1 %v4177_v20  ;;  %v2221_v30 = vsel %vm2125_vm2, %v7383_v40, %v6097_v14  ;;  %v7388_v14 = vld [vmem:[#allocation17_spill] sm:$0xff] }
 0x1c1   : > { %4296 = vrot.lane.b32.xlu1 %v4295_v5, %s4333_s6  ;;  %2610 = vmatprep.mubr.f32.mxu0 %v4026_v2  ;;  %v4262_v28 = vpop.permute.xlu0 %4261  ;;  %v7384_v5 = vld [vmem:[#allocation40_spill] sm:$0xff] }
 0x1c2   : > { %v2220_v21 = vsel %vm2125_vm2, %v7381_v51, %v4248_v32  ;;  %v2146_v49 = vsel %vm2125_vm2, %v7382_v52, %v4249_v3  ;;  %v2222_v2 = vsel %vm2125_vm2, %v7384_v5, %v1946_v34  ;;  %v2245_v3 = vsel %vm2150_vm3, %v2221_v30, %v7386_v24  ;;  %v7387_v32 = vld [vmem:[#allocation52_spill] sm:$0xff] }
 0x1c3   : > { %v4257_v58 = vpop.permute.xlu1 %4256  ;;  %v2244_v13 = vsel %vm2150_vm3, %v2220_v21, %v4253_v57  ;;  %v2171_v22 = vsel %vm2150_vm3, %v2146_v49, %v4254_v39  ;;  %2003 = vrot.lane.b32.xlu0 %v7368_v43, %s4333_s6  ;;  %v7385_v39 = vld [vmem:[#allocation35_spill] sm:$0xff]  ;;  %v4263_v57 = vunpack.i.l.bf16 %v4262_v28  ;;  %v2246_v46 = vsel %vm2150_vm3, %v2222_v2, %v7387_v32 }
 0x1c4   : > { %v4259_v60 = vunpack.i.h.bf16 %v4257_v58  ;;  %v4258_v35 = vunpack.i.l.bf16 %v4257_v58  ;;  %2611 = vmatmul.mubr.f32.gmra.mrb[4].mxu0 %v4025_v11  ;;  %v4264_v34 = vunpack.i.h.bf16 %v4262_v28 }
 0x1c5   : > { %1929 = vrot.lane.b32.xlu1 %v6274_v63, %s4334_s7  ;;  %v2093_v20 = vpop.permute.xlu0 %2092 }
 0x1c6   : > { %v2268_v25 = vsel %vm2175_vm4, %v2244_v13, %v4258_v35  ;;  %v2196_v53 = vsel %vm2175_vm4, %v2171_v22, %v4259_v60  ;;  %v2269_v49 = vsel %vm2175_vm4, %v2245_v3, %v2093_v20  ;;  %v7392_v3 = vld [vmem:[#allocation23_spill] sm:$0xff] }
 0x1c7   : > { %v1662_v48 = vpop.permute.xlu1 %1661  ;;  %2675 = vmatprep.mubr.f32.mxu1 %v2268_v25  ;;  %1751 = vrot.lane.b32.xlu0 %v5987_v33, %s4333_s6  ;;  %v7389_v25 = vld [vmem:[#allocation7_spill] sm:$0xff]  ;;  %v2130_v32 = vsel %vm2125_vm2, %v7392_v3, %v4264_v34  ;;  %v7393_v34 = vld [vmem:[#allocation26_spill] sm:$0xff] }
 0x1c8   : > { %2676 = vmatmul.mubr.f32.gmra.mrb[2].mxu1 %v2196_v53  ;;  %v2148_v21 = vsel %vm2125_vm2, %v7388_v14, %v1662_v48  ;;  %v7390_v53 = vld [vmem:[#allocation15_spill] sm:$0xff] }
 0x1c9   : > { %1643 = vrot.lane.b32.xlu1 %v6033_v16, %s4334_s7  ;;  %v6286_v12 = vpop.permute.xlu0 %1771  ;;  %v2147_v40 = vsel %vm2125_vm2, %v7390_v53, %v7389_v25  ;;  %v7394_v25 = vld [vmem:[#allocation6_spill] sm:$0xff] }
 0x1ca   : > { %v2172_v28 = vsel %vm2150_vm3, %v2147_v40, %v6074_v38  ;;  %v2223_v40 = vsel %vm2125_vm2, %v7394_v25, %v6085_v4  ;;  %v7401_v25 = vld [vmem:[#allocation47_spill] sm:$0xff] }
 0x1cb   : > { %v1770_v15 = vpop.permute.xlu1 %1769  ;;  %1931 = vrot.lane.b32.xlu0 %v6261_v55, %s4334_s7 }
 0x1cc   : > { %v2173_v13 = vsel %vm2150_vm3, %v2148_v21, %v1770_v15  ;;  %v7391_v15 = vld [vmem:[#allocation37_spill] sm:$0xff] }
 0x1cd   : > { %2001 = vrot.lane.b32.xlu1 %v6141_v1, %s4333_s6  ;;  %v1844_v47 = vpop.permute.xlu0 %1843 }
 0x1ce   : > { %v2198_v30 = vsel %vm2175_vm4, %v2173_v13, %v1844_v47 }
 0x1cf   : > { %v4267_v6 = vpop.permute.xlu1 %4266  ;;  %2078 = vrot.lane.b32.xlu0 %v7385_v39, %s4332_s30 }
 0x1d0   : > { %v4269_v22 = vunpack.i.h.bf16 %v4267_v6  ;;  %v4268_v60 = vunpack.i.l.bf16 %v4267_v6  ;;  %v2204_v6 = vsel %vm2125_vm2, %v7391_v15, %v4263_v57 }
 0x1d1   : > { %1647 = vrot.lane.b32.xlu1 %v6124_v45, %s4334_s7  ;;  %v6305_v51 = vpop.permute.xlu0 %1913 }
 0x1d2   : > { %v2155_v38 = vsel %vm2150_vm3, %v2130_v32, %v4269_v22  ;;  %v4310_v22 = vpack.i.bf16 %v6274_v63, %v7382_v52  ;;  %v7395_v52 = vld [vmem:[#allocation34_spill] sm:$0xff] }
 0x1d3   : > { %v2095_v11 = vpop.permute.xlu1 %2094  ;;  %1825 = vrot.lane.b32.xlu0 %v6113_v26, %s4332_s30 }
 0x1d4   : > { %v2270_v58 = vsel %vm2175_vm4, %v2246_v46, %v2095_v11  ;;  %v2228_v46 = vsel %vm2150_vm3, %v2204_v6, %v4268_v60 }
 0x1d5   : > { %1753 = vrot.lane.b32.xlu1 %v6152_v59, %s4333_s6  ;;  %v4044_v35 = vcombine.low %v2269_v49, %v2270_v58  ;;  %v4272_v20 = vpop.permute.xlu0 %4271  ;;  %v2365_v32 = vcombine.high %v2198_v30, %v2270_v58 }
 0x1d6   : > { %v4274_v2 = vunpack.i.h.bf16 %v4272_v20  ;;  %v4273_v24 = vunpack.i.l.bf16 %v4272_v20  ;;  %v2149_v20 = vsel %vm2125_vm2, %v7395_v52, %v6115_v42 }
 0x1d7   : > { %v1842_v48 = vpop.permute.xlu1 %1841  ;;  %2680 = vmatprep.mubr.f32.mxu1 %v4044_v35  ;;  %2005 = vrot.lane.b32.xlu0 %v5239_v9, %s4333_s6  ;;  %v2174_v6 = vsel %vm2150_vm3, %v2149_v20, %v6286_v12  ;;  %v7403_v20 = vld [vmem:[#allocation48_spill] sm:$0xff] }
 0x1d8   : > { %v2197_v5 = vsel %vm2175_vm4, %v2172_v28, %v1842_v48  ;;  %v2252_v57 = vsel %vm2175_vm4, %v2228_v46, %v4273_v24  ;;  %v2180_v11 = vsel %vm2175_vm4, %v2155_v38, %v4274_v2  ;;  %v4315_v28 = vpack.i.bf16 %v7368_v43, %v7369_v8  ;;  %v7397_v24 = vld [vmem:[#allocation13_spill] sm:$0xff] }
 0x1d9   : > { %v4043_v47 = vcombine.low %v2197_v5, %v2198_v30  ;;  %2076 = vrot.lane.b32.xlu1 %v6169_v61, %s4332_s30  ;;  %v6335_v21 = vpop.permute.xlu0 %1629  ;;  %2615 = vmatprep.mubr.f32.mxu0 %v2252_v57  ;;  %v7396_v5 = vld [vmem:[#allocation32_spill] sm:$0xff]  ;;  %v2322_v3 = vcombine.high %v7397_v24, %v7397_v24  ;;  %v7398_v57 = vld [vmem:[#allocation27_spill] sm:$0xff] }
 0x1da   : > { %2616 = vmatmul.mubr.f32.gmra.mrb[6].mxu0 %v2180_v11  ;;  %v4305_v43 = vpack.i.bf16 %v6203_v19, %v7396_v5 }
 0x1db   : > { %v1912_v14 = vpop.permute.xlu1 %1911  ;;  %2681 = vmatmul.mubr.f32.gmra.mrb[4].mxu1 %v4043_v47  ;;  %2080 = vrot.lane.b32.xlu0 %v7393_v34, %s4332_s30  ;;  %v2412_v11 = vcombine.low %v7397_v24, %v2322_v3  ;;  %v2424_v24 = vcombine.low %v5683_v54, %v6008_v44  ;;  %v7404_v3 = vld [vmem:[#allocation10_spill] sm:$0xff] }
 0x1dd   : > { %1755 = vrot.lane.b32.xlu1 %v6128_v0, %s4333_s6  ;;  %v1986_v13 = vpop.permute.xlu0 %1985 }
 0x1df   : > { %v2022_v49 = vpop.permute.xlu1 %2021  ;;  %4311 = vrot.lane.b32.xlu0 %v4310_v22, %s4333_s6 }
 0x1e0   : > { %v2247_v48 = vsel %vm2150_vm3, %v2223_v40, %v2022_v49  ;;  %v7399_v49 = vld [vmem:[#allocation28_spill] sm:$0xff]  ;;  %v2330_v40 = vcombine.high %v7401_v25, %v7401_v25 }
 0x1e1   : > { %1827 = vrot.lane.b32.xlu1 %v6139_v29, %s4332_s30  ;;  %v2097_v35 = vpop.permute.xlu0 %2096  ;;  %v2326_v22 = vcombine.high %v7399_v49, %v7399_v49 }
 0x1e2   : > { %v2271_v15 = vsel %vm2175_vm4, %v2247_v48, %v2097_v35 }
 0x1e3   : > { %v6346_v60 = vpop.permute.xlu1 %1627  ;;  %4316 = vrot.lane.b32.xlu0 %v4315_v28, %s4332_s30  ;;  %v7402_v28 = vld [vmem:[#allocation9_spill] sm:$0xff] }
 0x1e4   : > { %v2418_v48 = vcombine.low %v2326_v22, %v7402_v28  ;;  %v2346_v22 = vcombine.high %v6274_v63, %v6274_v63 }
 0x1e5   : > { %1829 = vrot.lane.b32.xlu1 %v6141_v1, %s4332_s30  ;;  %v1736_v8 = vpop.permute.xlu0 %1735 }
 0x1e7   : > { %v1846_v4 = vpop.permute.xlu1 %1845  ;;  %2009 = vrot.lane.b32.xlu0 %v7390_v53, %s4333_s6 }
 0x1e8   : > { %v2199_v2 = vsel %vm2175_vm4, %v2174_v6, %v1846_v4  ;;  %v2421_v6 = vcombine.low %v7401_v25, %v2330_v40  ;;  %v2334_v4 = vcombine.high %v6008_v44, %v6008_v44  ;;  %v2342_v44 = vcombine.high %v6152_v59, %v6152_v59 }
 0x1e9   : > { %4306 = vrot.lane.b32.xlu1 %v4305_v43, %s4334_s7  ;;  %v2367_v42 = vcombine.low %v2199_v2, %v2271_v15  ;;  %v1916_v12 = vpop.permute.xlu0 %1915  ;;  %v4045_v38 = vcombine.low %v2365_v32, %v2199_v2  ;;  %v2206_v15 = vsel %vm2125_vm2, %v7403_v20, %v6305_v51  ;;  %v2338_v43 = vcombine.high %v7379_v18, %v7379_v18 }
 0x1ea   : > { %v2350_v25 = vcombine.high %v7396_v5, %v7396_v5  ;;  %v2439_v20 = vcombine.low %v6274_v63, %v2346_v22 }
 0x1eb   : > { %v1988_v47 = vpop.permute.xlu1 %1987  ;;  %v4046_v46 = vcombine.high %v2270_v58, %v2367_v42  ;;  %2084 = vrot.lane.b32.xlu0 %v5320_v27, %s4332_s30  ;;  %v7400_v58 = vld [vmem:[#allocation24_spill] sm:$0xff]  ;;  %v2205_v42 = vsel %vm2125_vm2, %v7404_v3, %v1912_v14  ;;  %v2430_v54 = vcombine.low %v7379_v18, %v2338_v43  ;;  %v7405_v18 = vld [vmem:[#allocation42_spill] sm:$0xff]  ;;  %v7410_v3 = vld [vmem:[#allocation41_spill] sm:$0xff] }
 0x1ec   : > { %v2415_v35 = vcombine.low %v7400_v58, %v7399_v49  ;;  %v2230_v2 = vsel %vm2150_vm3, %v2206_v15, %v1988_v47  ;;  %v2229_v32 = vsel %vm2150_vm3, %v2205_v42, %v1986_v13  ;;  %v7406_v58 = vld [vmem:[#allocation39_spill] sm:$0xff]  ;;  %v7408_v15 = vld [vmem:[#allocation8_spill] sm:$0xff]  ;;  %v7409_v43 = vld [vmem:[#allocation38_spill] sm:$0xff]  ;;  %v2123_v42 = vrot.slane %v7410_v3, 2 }
 0x1ed   : > { %1935 = vrot.lane.b32.xlu1 %v7398_v57, %s4334_s7  ;;  %2685 = vmatprep.mubr.f32.mxu1 %v4046_v46  ;;  %v2063_v53 = vpop.permute.xlu0 %2062 }
 0x1ee   : > { %2686 = vmatmul.mubr.f32.gmra.mrb[6].mxu1 %v4045_v38  ;;  %v2254_v51 = vsel %vm2175_vm4, %v2230_v2, %v2063_v53  ;;  %v2132_v53 = vsel %vm2125_vm2, %v7405_v18, %v6335_v21  ;;  %v7415_v18 = vld [vmem:[#allocation33_spill] sm:$0xff] }
 0x1ef   : > { %v1632_v30 = vpop.permute.xlu1 %1631  ;;  %4098 = vmatprep.mubr.msk.f32.mxu1 %vm2125_vm2, %v2412_v11  ;;  %v2427_v11 = vcombine.low %v2334_v4, %v5983_v31  ;;  %v2433_v31 = vcombine.low %v5987_v33, %v6152_v59  ;;  %v7407_v59 = vld [vmem:[#allocation45_spill] sm:$0xff] }
 0x1f0   : > { %v2207_v21 = vsel %vm2125_vm2, %v7407_v59, %v1916_v12  ;;  %v2133_v2 = vsel %vm2125_vm2, %v7409_v43, %v1632_v30  ;;  %v7416_v59 = vld [vmem:[#allocation31_spill] sm:$0xff] }
 0x1f1   : > { %1651 = vrot.lane.b32.xlu1 %v6169_v61, %s4334_s7  ;;  %v1810_v27 = vpop.permute.xlu0 %1809  ;;  %s4213_s7 = smul.u32 48, %s7422_s19 }
 0x1f2   : > { %4099 = vmatmul.mubr.msk.f32.vlgmr.msra.gmra.mrb[8].mxu1 %vm2125_vm2, %v2415_v35  ;;  %v2131_v35 = vsel %vm2125_vm2, %v7406_v58, %v6346_v60 }
 0x1f3   : > { %v1738_v52 = vpop.permute.xlu1 %1737  ;;  %4101 = vmatprep.mubr.msk.f32.mxu1 %vm2125_vm2, %v2418_v48  ;;  %v2156_v40 = vsel %vm2150_vm3, %v2131_v35, %v1736_v8  ;;  %s6704_s27 = scalar_lea.vmem %s7036_s5, %s4213_s7 }
 0x1f4   : > { %v2157_v28 = vsel %vm2150_vm3, %v2132_v53, %v1738_v52  ;;  %v2181_v48 = vsel %vm2175_vm4, %v2156_v40, %v1810_v27  ;;  %v2442_v52 = vcombine.low %v6261_v55, %v7396_v5  ;;  %v7411_v5 = vld [vmem:[#allocation11_spill] sm:$0xff] }
 0x1f5   : > { %1759 = vrot.lane.b32.xlu1 %v6261_v55, %s4333_s6  ;;  %v1990_v38 = vpop.permute.xlu0 %1989  ;;  %v2445_v55 = vcombine.low %v2350_v25, %v7398_v57 }
 0x1f6   : > { %4102 = vmatmul.mubr.msk.f32.gmra.mrb[10].mxu1 %vm2125_vm2, %v2421_v6  ;;  %v2354_v6 = vcombine.high %v7408_v15, %v7408_v15  ;;  %v2231_v8 = vsel %vm2150_vm3, %v2207_v21, %v1990_v38 }
 0x1f7   : > { %v2061_v46 = vpop.permute.xlu1 %2060  ;;  %4104 = vmatprep.mubr.msk.f32.mxu1 %vm2125_vm2, %v2424_v24 }
 0x1f8   : > { %v2253_v47 = vsel %vm2175_vm4, %v2229_v32, %v2061_v46  ;;  %v2122_v46 = vrot.slane %v7411_v5, 2  ;;  %v2448_v38 = vcombine.low %v7408_v15, %v2354_v6 }
 0x1f9   : > { %v4028_v49 = vcombine.low %v2253_v47, %v2254_v51  ;;  %1833 = vrot.lane.b32.xlu1 %v5239_v9, %s4332_s30  ;;  %v2065_v13 = vpop.permute.xlu0 %2064  ;;  %v2436_v9 = vcombine.low %v2342_v44, %v6128_v0  ;;  %v7412_v47 = vld [vmem:[#allocation14_spill] sm:$0xff] }
 0x1fa   : > { %4105 = vmatmul.mubr.msk.f32.gmra.mrb[12].mxu1 %vm2125_vm2, %v2427_v11  ;;  %v2255_v12 = vsel %vm2175_vm4, %v2231_v8, %v2065_v13  ;;  %v2358_v11 = vcombine.high %v7412_v47, %v7412_v47  ;;  %v7413_v13 = vld [vmem:[#allocation36_spill] sm:$0xff]  ;;  %v2124_v58 = vsel %vm686_vm1, %v2122_v46, %v2123_v42 }
 0x1fb   : > { %v1740_v14 = vpop.permute.xlu1 %1739  ;;  %2620 = vmatprep.mubr.f32.mxu0 %v4028_v49  ;;  %4107 = vmatprep.mubr.msk.f32.mxu1 %vm2125_vm2, %v2430_v54  ;;  %v2362_v22 = vcombine.high %v7413_v13, %v7413_v13  ;;  %v2460_v21 = vcombine.low %v7416_v59, %v2124_v58 }
 0x1fc   : > { %v2158_v27 = vsel %vm2150_vm3, %v2133_v2, %v1740_v14  ;;  %v2454_v53 = vcombine.low %v2358_v11, %v7415_v18 }
 0x1fd   : > { %v4282_v0 = vpop.permute.xlu0 %4281 }
 0x1fe   : > { %4108 = vmatmul.mubr.msk.f32.gmra.mrb[14].mxu1 %vm2125_vm2, %v2433_v31  ;;  %v7414_v31 = vld [vmem:[#allocation16_spill] sm:$0xff]  ;;  %v4284_v15 = vunpack.i.h.bf16 %v4282_v0  ;;  %v4283_v6 = vunpack.i.l.bf16 %v4282_v0 }
 0x1ff   : > { %v1812_v33 = vpop.permute.xlu1 %1811  ;;  %4110 = vmatprep.mubr.msk.f32.mxu1 %vm2125_vm2, %v2436_v9  ;;  %v2451_v9 = vcombine.low %v7414_v31, %v7412_v47 }
 0x200   : > { %v2182_v60 = vsel %vm2175_vm4, %v2157_v28, %v1812_v33  ;;  %v2457_v28 = vcombine.low %v7413_v13, %v2362_v22  ;;  %v2366_v33 = vcombine.high %v2124_v58, %v2124_v58  ;;  %v7418_v13 = vld [vmem:[#allocation51_spill] sm:$0xff] }
 0x201   : > { %v4027_v4 = vcombine.low %v2181_v48, %v2182_v60  ;;  %v1922_v63 = vpop.permute.xlu0 %1921  ;;  %v2333_v49 = vcombine.high %v2182_v60, %v2254_v51  ;;  %v7417_v60 = vld [vmem:[#allocation43_spill] sm:$0xff] }
 0x202   : > { %4111 = vmatmul.mubr.msk.f32.gmra.mrb[16].mxu1 %vm2125_vm2, %v2439_v20  ;;  %v2463_v2 = vcombine.low %v2366_v33, %v2123_v42 }
 0x203   : > { %v1814_v24 = vpop.permute.xlu1 %1813  ;;  %2621 = vmatmul.mubr.f32.gmra.mrb[8].mxu0 %v4027_v4  ;;  %4113 = vmatprep.mubr.msk.f32.mxu1 %vm2125_vm2, %v2442_v52 }
 0x204   : > { %v2183_v32 = vsel %vm2175_vm4, %v2158_v27, %v1814_v24 }
 0x205   : > { %v2335_v30 = vcombine.low %v2183_v32, %v2255_v12  ;;  %v1636_v14 = vpop.permute.xlu0 %1635  ;;  %v4029_v57 = vcombine.low %v2333_v49, %v2183_v32 }
 0x206   : > { %4114 = vmatmul.mubr.msk.f32.gmra.mrb[18].mxu1 %vm2125_vm2, %v2445_v55 }
 0x207   : > { %v4277_v54 = vpop.permute.xlu1 %4276  ;;  %v4030_v44 = vcombine.high %v2254_v51, %v2335_v30  ;;  %4116 = vmatprep.mubr.msk.f32.mxu1 %vm2125_vm2, %v2448_v38  ;;  %v2210_v38 = vsel %vm2125_vm2, %v6058_v10, %v1922_v63  ;;  %v7419_v10 = vld [vmem:[#allocation44_spill] sm:$0xff] }
 0x208   : > { %v4279_v35 = vunpack.i.h.bf16 %v4277_v54  ;;  %v4278_v25 = vunpack.i.l.bf16 %v4277_v54  ;;  %v2135_v63 = vsel %vm2125_vm2, %v7419_v10, %v1636_v14 }
 0x209   : > { %2625 = vmatprep.mubr.f32.mxu0 %v4030_v44  ;;  %v1994_v40 = vpop.permute.xlu0 %1993 }
 0x20a   : > { %2626 = vmatmul.mubr.f32.gmra.mrb[10].mxu0 %v4029_v57  ;;  %4117 = vmatmul.mubr.msk.f32.gmra.mrb[20].mxu1 %vm2125_vm2, %v2451_v9  ;;  %v2208_v48 = vsel %vm2125_vm2, %v5903_v17, %v4278_v25  ;;  %v2134_v20 = vsel %vm2125_vm2, %v7417_v60, %v4279_v35 }
 0x20b   : > { %v1920_v51 = vpop.permute.xlu1 %1919  ;;  %4119 = vmatprep.mubr.msk.f32.mxu1 %vm2125_vm2, %v2454_v53  ;;  %v2232_v12 = vsel %vm2150_vm3, %v2208_v48, %v4283_v6  ;;  %v2159_v27 = vsel %vm2150_vm3, %v2134_v20, %v4284_v15 }
 0x20c   : > { %v2209_v47 = vsel %vm2125_vm2, %v5868_v36, %v1920_v51 }
 0x20d   : > { %v1640_v4 = vpop.permute.xlu0 %1639  ;;  %v2233_v11 = vsel %vm2150_vm3, %v2209_v47, %v1994_v40 }
 0x20e   : > { %4120 = vmatmul.mubr.msk.f32.gmra.mrb[22].mxu1 %vm2125_vm2, %v2457_v28  ;;  %v2137_v33 = vsel %vm2125_vm2, %v5848_v41, %v1640_v4 }
 0x20f   : > { %v4287_v8 = vpop.permute.xlu1 %4286  ;;  %4122 = vmatprep.mubr.msk.f32.mxu1 %vm2125_vm2, %v2460_v21 }
 0x210   : > { %v4289_v52 = vunpack.i.h.bf16 %v4287_v8  ;;  %v4288_v43 = vunpack.i.l.bf16 %v4287_v8 }
 0x211   : > { %v1746_v0 = vpop.permute.xlu0 %1745 }
 0x212   : > { %v2256_v24 = vsel %vm2175_vm4, %v2232_v12, %v4288_v43  ;;  %v2184_v17 = vsel %vm2175_vm4, %v2159_v27, %v4289_v52  ;;  %4123 = vmatmul.mubr.msk.f32.gmra.mrb[24].mxu1 %vm2125_vm2, %v2463_v2 }
 0x213   : > { %v1638_v3 = vpop.permute.xlu1 %1637  ;;  %2630 = vmatprep.mubr.f32.mxu0 %v2256_v24 }
 0x214   : > { %2631 = vmatmul.mubr.f32.gmra.mrb[12].mxu0 %v2184_v17  ;;  %v2136_v22 = vsel %vm2125_vm2, %v7418_v13, %v1638_v3 }
 0x215   : > { %v2069_v55 = vpop.permute.xlu0 %2068  ;;  %v2161_v9 = vsel %vm2150_vm3, %v2136_v22, %v1746_v0 }
 0x216   : > { %v2257_v57 = vsel %vm2175_vm4, %v2233_v11, %v2069_v55 }
 0x217   : > { %v1996_v32 = vpop.permute.xlu1 %1995 }
 0x218   : > { %v2234_v49 = vsel %vm2150_vm3, %v2210_v38, %v1996_v32 }
 0x219   : > { %v1748_v46 = vpop.permute.xlu0 %1747 }
 0x21a   : > { %v2162_v14 = vsel %vm2150_vm3, %v2137_v33, %v1748_v46 }
 0x21b   : > { %v1744_v5 = vpop.permute.xlu1 %1743 }
 0x21c   : > { %v2160_v53 = vsel %vm2150_vm3, %v2135_v63, %v1744_v5 }
 0x21d   : > { %v1820_v42 = vpop.permute.xlu0 %1819 }
 0x21e   : > { %v2186_v36 = vsel %vm2175_vm4, %v2161_v9, %v1820_v42 }
 0x21f   : > { %v1924_v30 = vpop.permute.xlu1 %1923 }
 0x220   : > { %v2211_v59 = vsel %vm2125_vm2, %v6033_v16, %v1924_v30 }
 0x221   : > { %v1822_v44 = vpop.permute.xlu0 %1821 }
 0x222   : > { %v2187_v20 = vsel %vm2175_vm4, %v2162_v14, %v1822_v44 }
 0x223   : > { %v2071_v54 = vpop.permute.xlu1 %2070 }
 0x224   : > { %v2258_v31 = vsel %vm2175_vm4, %v2234_v49, %v2071_v54 }
 0x225   : > { %v4032_v18 = vcombine.low %v2257_v57, %v2258_v31  ;;  %v4292_v35 = vpop.permute.xlu0 %4291  ;;  %v2341_v43 = vcombine.high %v2186_v36, %v2258_v31 }
 0x226   : > { %v4294_v6 = vunpack.i.h.bf16 %v4292_v35  ;;  %v4293_v8 = vunpack.i.l.bf16 %v4292_v35 }
 0x227   : > { %v1818_v58 = vpop.permute.xlu1 %1817  ;;  %2635 = vmatprep.mubr.f32.mxu0 %v4032_v18  ;;  %v4033_v27 = vcombine.low %v2341_v43, %v2187_v20 }
 0x228   : > { %v2185_v25 = vsel %vm2175_vm4, %v2160_v53, %v1818_v58  ;;  %v2212_v3 = vsel %vm2125_vm2, %v6148_v50, %v4293_v8  ;;  %v2138_v0 = vsel %vm2125_vm2, %v5957_v56, %v4294_v6 }
 0x229   : > { %v4031_v51 = vcombine.low %v2185_v25, %v2186_v36  ;;  %v1928_v28 = vpop.permute.xlu0 %1927 }
 0x22a   : > { %v2213_v57 = vsel %vm2125_vm2, %v6124_v45, %v1928_v28 }
 0x22b   : > { %v1998_v40 = vpop.permute.xlu1 %1997  ;;  %2636 = vmatmul.mubr.f32.gmra.mrb[14].mxu0 %v4031_v51 }
 0x22c   : > { %v2235_v21 = vsel %vm2150_vm3, %v2211_v59, %v1998_v40 }
 0x22d   : > { %v4302_v60 = vpop.permute.xlu0 %4301 }
 0x22e   : > { %v4304_v41 = vunpack.i.h.bf16 %v4302_v60  ;;  %v4303_v4 = vunpack.i.l.bf16 %v4302_v60 }
 0x22f   : > { %v2073_v48 = vpop.permute.xlu1 %2072 }
 0x230   : > { %v2259_v15 = vsel %vm2175_vm4, %v2235_v21, %v2073_v48 }
 0x231   : > { %v2343_v52 = vcombine.low %v2187_v20, %v2259_v15  ;;  %v1646_v17 = vpop.permute.xlu0 %1645 }
 0x233   : > { %v4297_v2 = vpop.permute.xlu1 %4296  ;;  %v4034_v12 = vcombine.high %v2258_v31, %v2343_v52 }
 0x234   : > { %v4299_v16 = vunpack.i.h.bf16 %v4297_v2  ;;  %v4298_v24 = vunpack.i.l.bf16 %v4297_v2 }
 0x235   : > { %2640 = vmatprep.mubr.f32.mxu0 %v4034_v12  ;;  %v2004_v42 = vpop.permute.xlu0 %2003 }
 0x236   : > { %2641 = vmatmul.mubr.f32.gmra.mrb[16].mxu0 %v4033_v27  ;;  %v2236_v32 = vsel %vm2150_vm3, %v2212_v3, %v4298_v24  ;;  %v2163_v55 = vsel %vm2150_vm3, %v2138_v0, %v4299_v16 }
 0x237   : > { %v1930_v5 = vpop.permute.xlu1 %1929  ;;  %v2260_v46 = vsel %vm2175_vm4, %v2236_v32, %v4303_v4  ;;  %v2188_v30 = vsel %vm2175_vm4, %v2163_v55, %v4304_v41 }
 0x238   : > { %2645 = vmatprep.mubr.f32.mxu0 %v2260_v46  ;;  %v2214_v44 = vsel %vm2125_vm2, %v6203_v19, %v1930_v5  ;;  %v2140_v19 = vsel %vm2125_vm2, %v6099_v23, %v1646_v17 }
 0x239   : > { %v1752_v47 = vpop.permute.xlu0 %1751  ;;  %v2238_v22 = vsel %vm2150_vm3, %v2214_v44, %v2004_v42 }
 0x23a   : > { %2646 = vmatmul.mubr.f32.gmra.mrb[18].mxu0 %v2188_v30 }
 0x23b   : > { %v1644_v38 = vpop.permute.xlu1 %1643 }
 0x23c   : > { %v2139_v35 = vsel %vm2125_vm2, %v5959_v7, %v1644_v38 }
 0x23d   : > { %v1932_v50 = vpop.permute.xlu0 %1931  ;;  %v2164_v45 = vsel %vm2150_vm3, %v2139_v35, %v1752_v47 }
 0x23e   : > { %v2215_v40 = vsel %vm2125_vm2, %v6169_v61, %v1932_v50 }
 0x23f   : > { %v2002_v11 = vpop.permute.xlu1 %2001 }
 0x240   : > { %v2237_v9 = vsel %vm2150_vm3, %v2213_v57, %v2002_v11 }
 0x241   : > { %v2079_v54 = vpop.permute.xlu0 %2078 }
 0x242   : > { %v2262_v31 = vsel %vm2175_vm4, %v2238_v22, %v2079_v54 }
 0x243   : > { %v1648_v49 = vpop.permute.xlu1 %1647 }
 0x244   : > { %v2141_v23 = vsel %vm2125_vm2, %v6113_v26, %v1648_v49 }
 0x245   : > { %v1826_v13 = vpop.permute.xlu0 %1825 }
 0x246   : > { %v2189_v28 = vsel %vm2175_vm4, %v2164_v45, %v1826_v13  ;;  %v6558_v45 = vld [vmem:[%s7035_s4] ss:$0 sm:$0xff] }
 0x247   : > { %v1754_v56 = vpop.permute.xlu1 %1753 }
 0x248   : > { %v2165_v25 = vsel %vm2150_vm3, %v2140_v19, %v1754_v56 }
 0x249   : > { %v2006_v63 = vpop.permute.xlu0 %2005 }
 0x24a   : > { %v2239_v14 = vsel %vm2150_vm3, %v2215_v40, %v2006_v63 }
 0x24b   : > { %v2077_v18 = vpop.permute.xlu1 %2076 }
 0x24c   : > { %v2261_v10 = vsel %vm2175_vm4, %v2237_v9, %v2077_v18 }
 0x24d   : > { %v4036_v36 = vcombine.low %v2261_v10, %v2262_v31  ;;  %v2081_v58 = vpop.permute.xlu0 %2080 }
 0x24e   : > { %v2263_v7 = vsel %vm2175_vm4, %v2239_v14, %v2081_v58  ;;  %v4336_v58 = vmov 1983009808  }
 0x24f   : > { %v1756_v53 = vpop.permute.xlu1 %1755  ;;  %2650 = vmatprep.mubr.f32.mxu0 %v4036_v36  ;;  %v2884_v19 = vunpack.c.l.s4 %v4336_v58 }
 0x250   : > { %v2166_v48 = vsel %vm2150_vm3, %v2141_v23, %v1756_v53 }
 0x251   : > { %v4312_v59 = vpop.permute.xlu0 %4311 }
 0x252   : > { %v4314_v26 = vunpack.i.h.bf16 %v4312_v59  ;;  %v4313_v16 = vunpack.i.l.bf16 %v4312_v59 }
 0x253   : > { %v1828_v51 = vpop.permute.xlu1 %1827 }
 0x254   : > { %v2190_v33 = vsel %vm2175_vm4, %v2165_v25, %v1828_v51 }
 0x255   : > { %v4035_v21 = vcombine.low %v2189_v28, %v2190_v33  ;;  %v4317_v61 = vpop.permute.xlu0 %4316  ;;  %v2349_v15 = vcombine.high %v2190_v33, %v2262_v31  ;;  %v7420_v33 = vld [vmem:[#allocation2_spill] sm:$0xff] }
 0x256   : > { %v4319_v41 = vunpack.i.h.bf16 %v4317_v61  ;;  %v4318_v4 = vunpack.i.l.bf16 %v4317_v61 }
 0x257   : > { %v1830_v60 = vpop.permute.xlu1 %1829  ;;  %2651 = vmatmul.mubr.f32.gmra.mrb[20].mxu0 %v4035_v21 }
 0x258   : > { %v2191_v20 = vsel %vm2175_vm4, %v2166_v48, %v1830_v60 }
 0x259   : > { %v2351_v6 = vcombine.low %v2191_v20, %v2263_v7  ;;  %v4037_v8 = vcombine.low %v2349_v15, %v2191_v20  ;;  %v2010_v27 = vpop.permute.xlu0 %2009 }
 0x25b   : > { %v4307_v52 = vpop.permute.xlu1 %4306  ;;  %v4038_v43 = vcombine.high %v2262_v31, %v2351_v6 }
 0x25c   : > { %v4309_v2 = vunpack.i.h.bf16 %v4307_v52  ;;  %v4308_v12 = vunpack.i.l.bf16 %v4307_v52 }
 0x25d   : > { %2655 = vmatprep.mubr.f32.mxu0 %v4038_v43  ;;  %v2085_v30 = vpop.permute.xlu0 %2084 }
 0x25e   : > { %2656 = vmatmul.mubr.f32.gmra.mrb[22].mxu0 %v4037_v8  ;;  %v2216_v24 = vsel %vm2125_vm2, %v7385_v39, %v4308_v12  ;;  %v2142_v17 = vsel %vm2125_vm2, %v6139_v29, %v4309_v2 }
 0x25f   : > { %v1936_v3 = vpop.permute.xlu1 %1935  ;;  %v2240_v0 = vsel %vm2150_vm3, %v2216_v24, %v4313_v16  ;;  %v2167_v32 = vsel %vm2150_vm3, %v2142_v17, %v4314_v26 }
 0x260   : > { %v2217_v55 = vsel %vm2125_vm2, %v7393_v34, %v1936_v3  ;;  %v2264_v5 = vsel %vm2175_vm4, %v2240_v0, %v4318_v4  ;;  %v2192_v46 = vsel %vm2175_vm4, %v2167_v32, %v4319_v41 }
 0x261   : > { %v2241_v42 = vsel %vm2150_vm3, %v2217_v55, %v2010_v27  ;;  %2660 = vmatprep.mubr.f32.mxu0 %v2264_v5 }
 0x262   : > { %2661 = vmatmul.mubr.f32.gmra.mrb[24].mxu0 %v2192_v46  ;;  %v2265_v39 = vsel %vm2175_vm4, %v2241_v42, %v2085_v30 }
 0x263   : > { %v1652_v29 = vpop.permute.xlu1 %1651  ;;  %v4040_v38 = vcombine.low %v2265_v39, %v6227_v37 }
 0x264   : > { %v2143_v11 = vsel %vm2125_vm2, %v6141_v1, %v1652_v29 }
 0x265   : > { %2665 = vmatprep.mubr.f32.mxu0 %v4040_v38 }
 0x267   : > { %v1760_v47 = vpop.permute.xlu1 %1759 }
 0x268   : > { %v2168_v34 = vsel %vm2150_vm3, %v2143_v11, %v1760_v47 }
 0x26b   : > { %v1834_v50 = vpop.permute.xlu1 %1833 }
 0x26c   : > { %v2193_v49 = vsel %vm2175_vm4, %v2168_v34, %v1834_v50 }
 0x26d   : > { %v4039_v54 = vcombine.low %v2193_v49, %v6223_v62  ;;  %v2885_v62 = vunpack.c.0.s8 %v2884_v19 }
 0x26f   : > { %2666 = vmatmul.mubr.f32.gmra.mrb[26].mxu0 %v4039_v54  ;;  %v6563_v59 = vsub.s32 %v2885_v62, %v7420_v33 }
 0x285   : > { %v2602_v56 = vpop.f32.mrb[0].mxu0 }
 0x286   : > { %v2604_v44 = vpop.f32.mrb[1].mxu0  ;;  %v2603_v40 = vadd.f32 %v6558_v45, %v2602_v56 }
 0x28e   : > { %v2672_v13 = vpop.f32.mrb[0].mxu1 }
 0x28f   : > { %v2674_v22 = vpop.f32.mrb[1].mxu1  ;;  %v6568_v20 = vadd.f32 %v6558_v45, %v2672_v13 }
 0x293   : > { %v2607_v57 = vpop.f32.mrb[2].mxu0 }
 0x294   : > { %v2609_v31 = vpop.f32.mrb[3].mxu0  ;;  %v2608_v51 = vadd.f32 %v6558_v45, %v2607_v57 }
 0x297   : > { %v2612_v37 = vpop.f32.mrb[4].mxu0 }
 0x298   : > { %v2614_v9 = vpop.f32.mrb[5].mxu0  ;;  %v2613_v60 = vadd.f32 %v6558_v45, %v2612_v37 }
 0x29b   : > { %v2677_v18 = vpop.f32.mrb[2].mxu1 }
 0x29c   : > { %v2679_v10 = vpop.f32.mrb[3].mxu1  ;;  %v6571_v6 = vadd.f32 %v6558_v45, %v2677_v18 }
 0x2ad   : > { %v2617_v36 = vpop.f32.mrb[6].mxu0 }
 0x2ae   : > { %v6553_v63 = vpop.f32.mrb[4].mxu1  ;;  %v2619_v53 = vpop.f32.mrb[7].mxu0  ;;  %v2618_v7 = vadd.f32 %v6558_v45, %v2617_v36 }
 0x2af   : > { %v2684_v1 = vpop.f32.mrb[5].mxu1 }
 0x2c1   : > { %v2687_v35 = vpop.f32.mrb[6].mxu1 }
 0x2c2   : > { %v2689_v25 = vpop.f32.mrb[7].mxu1  ;;  %v6575_v12 = vadd.f32 %v6558_v45, %v2687_v35 }
 0x2c5   : > { %v4100_v28 = vpop.f32.mrb[8].mxu1 }
 0x2c6   : > { %v2763_v14 = vadd.f32 %v4100_v28, %v2608_v51  ;;  %v2757_v21 = vpop.f32.mrb[9].mxu1 }
 0x2c7   : > { %v2758_v23 = vadd.f32 %v2757_v21, %v2603_v40 }
 0x2c8   : > { %v2847_v48 = vmax.f32 %v2763_v14, 0.0 }
 0x2c9   : > { %v2846_v61 = vmax.f32 %v2758_v23, 0.0  ;;  %v4103_v15 = vpop.f32.mrb[10].mxu1 }
 0x2ca   : > { %v2899_v8 = vcombine.high %v2847_v48, %v2847_v48  ;;  %v2906_v52 = vrot.slane %v2847_v48, %v6563_v59  ;;  %v2773_v43 = vadd.f32 %v4103_v15, %v2618_v7  ;;  %v2767_v2 = vpop.f32.mrb[11].mxu1 }
 0x2cb   : > { %v2882_v41 = vcombine.high %v2846_v61, %v2846_v61  ;;  %v2889_v4 = vrot.slane %v2846_v61, %v6563_v59  ;;  %v6578_v27 = vadd.f32 %v2767_v2, %v2613_v60 }
 0x2cc   : > { %v2913_v26 = vrot.slane %v2899_v8, %v6563_v59  ;;  %v2914_v16 = vcombine.high %v2906_v52, %v2906_v52  ;;  %v3289_v24 = vsel %vm3260_vm5, %v2906_v52, -inf  ;;  %v6582_v17 = vmax.f32 %v2773_v43, 0.0 }
 0x2cd   : > { %v3290_v3 = vrot.slane %v3289_v24, 4  ;;  %v2896_v0 = vrot.slane %v2882_v41, %v6563_v59  ;;  %v2897_v32 = vcombine.high %v2889_v4, %v2889_v4  ;;  %v3261_v55 = vsel %vm3260_vm5, %v2889_v4, -inf  ;;  %v6586_v5 = vpop.f32.mrb[12].mxu1 }
 0x2ce   : > { %v2915_v46 = vcombine.high %v2913_v26, %v2913_v26  ;;  %v3296_v30 = vsel %vm3260_vm5, %v2914_v16, -inf  ;;  %v3303_v42 = vsel %vm3260_vm5, %v2913_v26, -inf  ;;  %v3262_v39 = vrot.slane %v3261_v55, 4  ;;  %v6590_v29 = vpop.f32.mrb[13].mxu1 }
 0x2cf   : > { %v3291_v38 = vmax.f32 %v3289_v24, %v3290_v3  ;;  %v3297_v47 = vrot.slane %v3296_v30, 4  ;;  %v3304_v11 = vrot.slane %v3303_v42, 4  ;;  %v2898_v34 = vcombine.high %v2896_v0, %v2896_v0 }
 0x2d0   : > { %v3310_v50 = vsel %vm3260_vm5, %v2915_v46, -inf  ;;  %v3263_v49 = vmax.f32 %v3261_v55, %v3262_v39  ;;  %v3268_v54 = vsel %vm3260_vm5, %v2897_v32, -inf  ;;  %v3275_v56 = vsel %vm3260_vm5, %v2896_v0, -inf }
 0x2d1   : > { %v3292_v44 = vrot.slane %v3291_v38, 2  ;;  %v3298_v13 = vmax.f32 %v3296_v30, %v3297_v47  ;;  %v3305_v22 = vmax.f32 %v3303_v42, %v3304_v11  ;;  %v3311_v57 = vrot.slane %v3310_v50, 4  ;;  %v6595_v31 = vpop.f32.mrb[14].mxu1 }
 0x2d2   : > { %v3264_v37 = vrot.slane %v3263_v49, 2  ;;  %v3269_v9 = vrot.slane %v3268_v54, 4  ;;  %v3276_v18 = vrot.slane %v3275_v56, 4  ;;  %v3282_v10 = vsel %vm3260_vm5, %v2898_v34, -inf  ;;  %v6598_v1 = vpop.f32.mrb[15].mxu1 }
 0x2d3   : > { %v3293_v36 = vmax.f32 %v3291_v38, %v3292_v44  ;;  %v3299_v53 = vrot.slane %v3298_v13, 2  ;;  %v3306_v58 = vrot.slane %v3305_v22, 2  ;;  %v3312_v19 = vmax.f32 %v3310_v50, %v3311_v57 }
 0x2d4   : > { %v3265_v35 = vmax.f32 %v3263_v49, %v3264_v37  ;;  %v3270_v62 = vmax.f32 %v3268_v54, %v3269_v9  ;;  %v3277_v25 = vmax.f32 %v3275_v56, %v3276_v18  ;;  %v3283_v51 = vrot.slane %v3282_v10, 4 }
 0x2d5   : > { %v3294_v40 = vrot.slane %v3293_v36, 1  ;;  %v3300_v28 = vmax.f32 %v3298_v13, %v3299_v53  ;;  %v3307_v33 = vmax.f32 %v3305_v22, %v3306_v58  ;;  %v3313_v14 = vrot.slane %v3312_v19, 2  ;;  %v6600_v21 = vpop.f32.mrb[16].mxu1 }
 0x2d6   : > { %v3266_v23 = vrot.slane %v3265_v35, 1  ;;  %v3271_v7 = vrot.slane %v3270_v62, 2  ;;  %v3278_v48 = vrot.slane %v3277_v25, 2  ;;  %v3284_v60 = vmax.f32 %v3282_v10, %v3283_v51  ;;  %v2622_v61 = vpop.f32.mrb[8].mxu0  ;;  %v6602_v15 = vpop.f32.mrb[17].mxu1 }
 0x2d7   : > { %v3295_v8 = vmax.f32 %v3293_v36, %v3294_v40  ;;  %v3301_v52 = vrot.slane %v3300_v28, 1  ;;  %v3308_v43 = vrot.slane %v3307_v33, 1  ;;  %v3314_v2 = vmax.f32 %v3312_v19, %v3313_v14  ;;  %v2624_v41 = vpop.f32.mrb[9].mxu0 }
 0x2d8   : > { %v3267_v4 = vmax.f32 %v3265_v35, %v3266_v23  ;;  %v3272_v26 = vmax.f32 %v3270_v62, %v3271_v7  ;;  %v3279_v16 = vmax.f32 %v3277_v25, %v3278_v48  ;;  %v3285_v24 = vrot.slane %v3284_v60, 2 }
 0x2d9   : > { %v3302_v3 = vmax.f32 %v3300_v28, %v3301_v52  ;;  %v3309_v0 = vmax.f32 %v3307_v33, %v3308_v43  ;;  %v3315_v32 = vrot.slane %v3314_v2, 1  ;;  %v6605_v55 = vsel %vm2150_vm3, %v3295_v8, -inf  ;;  %v6607_v46 = vpop.f32.mrb[18].mxu1 }
 0x2da   : > { %v3273_v30 = vrot.slane %v3272_v26, 1  ;;  %v3280_v42 = vrot.slane %v3279_v16, 1  ;;  %v3286_v39 = vmax.f32 %v3284_v60, %v3285_v24  ;;  %v3765_v38 = vsel %vm2150_vm3, %v3267_v4, -inf  ;;  %v6610_v47 = vpop.f32.mrb[19].mxu1 }
 0x2db   : > { %v3316_v11 = vmax.f32 %v3314_v2, %v3315_v32  ;;  %v6613_v34 = vsel %vm2150_vm3, %v3302_v3, -inf  ;;  %v3766_v50 = vsel %vm2150_vm3, %v3309_v0, -inf  ;;  %v2933_v49 = vcombine.high %v6582_v17, %v6582_v17 }
 0x2dc   : > { %v3274_v54 = vmax.f32 %v3272_v26, %v3273_v30  ;;  %v3281_v56 = vmax.f32 %v3279_v16, %v3280_v42  ;;  %v3287_v44 = vrot.slane %v3286_v39, 1  ;;  %v3767_v13 = vmax.f32 %v3765_v38, %v3766_v50 }
 0x2dd   : > { %v3769_v22 = vsel %vm2150_vm3, %v3316_v11, -inf  ;;  %v2940_v57 = vrot.slane %v6582_v17, %v6563_v59  ;;  %v2947_v37 = vrot.slane %v2933_v49, %v6563_v59  ;;  %v2848_v9 = vmax.f32 %v6578_v27, 0.0  ;;  %v6623_v18 = vpop.f32.mrb[10].mxu0  ;;  %v6625_v10 = vpop.f32.mrb[20].mxu1 }
 0x2de   : > { %v3288_v36 = vmax.f32 %v3286_v39, %v3287_v44  ;;  %v3768_v53 = vsel %vm2150_vm3, %v3274_v54, -inf  ;;  %v6629_v58 = vsel %vm2150_vm3, %v3281_v56, -inf  ;;  %v6632_v19 = vadd.f32 %v6558_v45, %v2622_v61  ;;  %v2629_v35 = vpop.f32.mrb[11].mxu0  ;;  %v6634_v62 = vpop.f32.mrb[21].mxu1 }
 0x2df   : > { %v3770_v17 = vmax.f32 %v3768_v53, %v3769_v22  ;;  %v2948_v25 = vcombine.high %v2940_v57, %v2940_v57  ;;  %v2949_v51 = vcombine.high %v2947_v37, %v2947_v37  ;;  %v3345_v27 = vsel %vm3260_vm5, %v2940_v57, -inf }
 0x2e0   : > { %v3346_v40 = vrot.slane %v3345_v27, 4  ;;  %v3359_v28 = vsel %vm3260_vm5, %v2947_v37, -inf  ;;  %v2916_v33 = vcombine.high %v2848_v9, %v2848_v9  ;;  %v2923_v14 = vrot.slane %v2848_v9, %v6563_v59 }
 0x2e1   : > { %v6640_v23 = vsel %vm3909_vm6, %v3770_v17, %v3767_v13  ;;  %v3352_v7 = vsel %vm3260_vm5, %v2948_v25, -inf  ;;  %v3360_v48 = vrot.slane %v3359_v28, 4  ;;  %v3366_v60 = vsel %vm3260_vm5, %v2949_v51, -inf  ;;  %v6644_v61 = vpop.f32.mrb[22].mxu1 }
 0x2e2   : > { %v3347_v8 = vmax.f32 %v3345_v27, %v3346_v40  ;;  %v3353_v52 = vrot.slane %v3352_v7, 4  ;;  %v3367_v43 = vrot.slane %v3366_v60, 4  ;;  %v2930_v2 = vrot.slane %v2916_v33, %v6563_v59  ;;  %v6647_v41 = vpop.f32.mrb[23].mxu1 }
 0x2e3   : > { %v3361_v4 = vmax.f32 %v3359_v28, %v3360_v48  ;;  %v2931_v26 = vcombine.high %v2923_v14, %v2923_v14  ;;  %v3317_v16 = vsel %vm3260_vm5, %v2923_v14, -inf  ;;  %v6651_v24 = vsel %vm2150_vm3, %v3288_v36, -inf }
 0x2e4   : > { %v3348_v3 = vrot.slane %v3347_v8, 2  ;;  %v3354_v0 = vmax.f32 %v3352_v7, %v3353_v52  ;;  %v3368_v32 = vmax.f32 %v3366_v60, %v3367_v43  ;;  %v2932_v30 = vcombine.high %v2930_v2, %v2930_v2 }
 0x2e5   : > { %v3362_v42 = vrot.slane %v3361_v4, 2  ;;  %v3318_v39 = vrot.slane %v3317_v16, 4  ;;  %v3324_v38 = vsel %vm3260_vm5, %v2931_v26, -inf  ;;  %v3331_v11 = vsel %vm3260_vm5, %v2930_v2, -inf  ;;  %v6655_v50 = vpop.f32.mrb[24].mxu1 }
 0x2e6   : > { %v3349_v49 = vmax.f32 %v3347_v8, %v3348_v3  ;;  %v3355_v54 = vrot.slane %v3354_v0, 2  ;;  %v3369_v56 = vrot.slane %v3368_v32, 2  ;;  %v3325_v44 = vrot.slane %v3324_v38, 4  ;;  %v6657_v13 = vpop.f32.mrb[25].mxu1 }
 0x2e7   : > { %v3363_v22 = vmax.f32 %v3361_v4, %v3362_v42  ;;  %v3319_v57 = vmax.f32 %v3317_v16, %v3318_v39  ;;  %v3332_v37 = vrot.slane %v3331_v11, 4  ;;  %v3338_v9 = vsel %vm3260_vm5, %v2932_v30, -inf  ;;  %v6660_v36 = vpop.f32.mrb[12].mxu0 }
 0x2e8   : > { %v3350_v53 = vrot.slane %v3349_v49, 1  ;;  %v3356_v35 = vmax.f32 %v3354_v0, %v3355_v54  ;;  %v3370_v17 = vmax.f32 %v3368_v32, %v3369_v56  ;;  %v3326_v25 = vmax.f32 %v3324_v38, %v3325_v44  ;;  %v2634_v51 = vpop.f32.mrb[13].mxu0 }
 0x2e9   : > { %v3364_v27 = vrot.slane %v3363_v22, 1  ;;  %v3320_v40 = vrot.slane %v3319_v57, 2  ;;  %v3333_v28 = vmax.f32 %v3331_v11, %v3332_v37  ;;  %v3339_v33 = vrot.slane %v3338_v9, 4 }
 0x2ea   : > { %v3351_v14 = vmax.f32 %v3349_v49, %v3350_v53  ;;  %v3357_v7 = vrot.slane %v3356_v35, 1  ;;  %v3371_v48 = vrot.slane %v3370_v17, 1  ;;  %v3327_v60 = vrot.slane %v3326_v25, 2 }
 0x2eb   : > { %v3365_v8 = vmax.f32 %v3363_v22, %v3364_v27  ;;  %v3321_v52 = vmax.f32 %v3319_v57, %v3320_v40  ;;  %v3334_v43 = vrot.slane %v3333_v28, 2  ;;  %v3340_v2 = vmax.f32 %v3338_v9, %v3339_v33 }
 0x2ec   : > { %v3358_v4 = vmax.f32 %v3356_v35, %v3357_v7  ;;  %v3372_v26 = vmax.f32 %v3370_v17, %v3371_v48  ;;  %v6663_v16 = vsel %vm2150_vm3, %v3351_v14, -inf  ;;  %v3328_v3 = vmax.f32 %v3326_v25, %v3327_v60 }
 0x2ed   : > { %v6666_v0 = vsel %vm2150_vm3, %v3365_v8, -inf  ;;  %v3322_v32 = vrot.slane %v3321_v52, 1  ;;  %v3335_v30 = vmax.f32 %v3333_v28, %v3334_v43  ;;  %v3341_v42 = vrot.slane %v3340_v2, 2 }
 0x2ee   : > { %v6669_v39 = vsel %vm2150_vm3, %v3358_v4, -inf  ;;  %v6672_v38 = vsel %vm2150_vm3, %v3372_v26, -inf  ;;  %v3329_v11 = vrot.slane %v3328_v3, 1  ;;  %v2778_v49 = vadd.f32 %v6590_v29, %v6632_v19 }
 0x2ef   : > { %v3323_v54 = vmax.f32 %v3321_v52, %v3322_v32  ;;  %v3336_v56 = vrot.slane %v3335_v30, 1  ;;  %v3342_v44 = vmax.f32 %v3340_v2, %v3341_v42  ;;  %v2628_v22 = vadd.f32 %v6558_v45, %v6623_v18 }
 0x2f0   : > { %v3330_v57 = vmax.f32 %v3328_v3, %v3329_v11  ;;  %v2850_v37 = vmax.f32 %v2778_v49, 0.0  ;;  %v6680_v9 = vadd.f32 %v6644_v61, %v6571_v6  ;;  %v6684_v53 = vadd.f32 %v6647_v41, %v6568_v20 }
 0x2f1   : > { %v3337_v35 = vmax.f32 %v3335_v30, %v3336_v56  ;;  %v3343_v17 = vrot.slane %v3342_v44, 1  ;;  %v3772_v29 = vsel %vm2150_vm3, %v3323_v54, -inf  ;;  %v2783_v19 = vadd.f32 %v6586_v5, %v2628_v22 }
 0x2f2   : > { %v3773_v25 = vmax.f32 %v6629_v58, %v3772_v29  ;;  %v3775_v18 = vsel %vm2150_vm3, %v3330_v57, -inf  ;;  %v2950_v51 = vcombine.high %v2850_v37, %v2850_v37  ;;  %v2957_v27 = vrot.slane %v2850_v37, %v6563_v59 }
 0x2f3   : > { %v3344_v6 = vmax.f32 %v3342_v44, %v3343_v17  ;;  %v3776_v61 = vmax.f32 %v6651_v24, %v3775_v18  ;;  %v3778_v20 = vsel %vm2150_vm3, %v3337_v35, -inf  ;;  %v2851_v41 = vmax.f32 %v2783_v19, 0.0 }
 0x2f4   : > { %v3779_v40 = vmax.f32 %v6605_v55, %v3778_v20  ;;  %v3912_v28 = vsel %vm3911_vm7, %v3773_v25, %v6640_v23  ;;  %v2964_v5 = vrot.slane %v2950_v51, %v6563_v59  ;;  %v2965_v33 = vcombine.high %v2957_v27, %v2957_v27 }
 0x2f5   : > { %v3781_v58 = vsel %vm2150_vm3, %v3344_v6, -inf  ;;  %v3914_v14 = vsel %vm3913_vm8, %v3776_v61, %v3912_v28  ;;  %v3373_v7 = vsel %vm3260_vm5, %v2957_v27, -inf  ;;  %v2967_v48 = vcombine.high %v2851_v41, %v2851_v41 }
 0x2f6   : > { %v3782_v55 = vmax.f32 %v6613_v34, %v3781_v58  ;;  %v3916_v23 = vsel %vm3915_vm9, %v3779_v40, %v3914_v14  ;;  %v2966_v24 = vcombine.high %v2964_v5, %v2964_v5  ;;  %v3374_v60 = vrot.slane %v3373_v7, 4 }
 0x2f7   : > { %v3380_v8 = vsel %vm3260_vm5, %v2965_v33, -inf  ;;  %v3387_v52 = vsel %vm3260_vm5, %v2964_v5, -inf  ;;  %v2974_v43 = vrot.slane %v2851_v41, %v6563_v59  ;;  %v2981_v2 = vrot.slane %v2967_v48, %v6563_v59 }
 0x2f8   : > { %v3918_v4 = vsel %vm3917_vm10, %v3782_v55, %v3916_v23  ;;  %v3375_v26 = vmax.f32 %v3373_v7, %v3374_v60  ;;  %v3381_v3 = vrot.slane %v3380_v8, 4  ;;  %v3388_v32 = vrot.slane %v3387_v52, 4 }
 0x2f9   : > { %3951 = vst.msk [vmem:[%s6704_s27] sm:$0x3f] %vm3950_vm11, %v3918_v4  ;;  %v3394_v34 = vsel %vm3260_vm5, %v2966_v24, -inf  ;;  %v2982_v30 = vcombine.high %v2974_v43, %v2974_v43  ;;  %v2983_v42 = vcombine.high %v2981_v2, %v2981_v2  ;;  %v3401_v11 = vsel %vm3260_vm5, %v2974_v43, -inf }
 0x2fa   : > { %v3376_v49 = vrot.slane %v3375_v26, 2  ;;  %v3382_v54 = vmax.f32 %v3380_v8, %v3381_v3  ;;  %v3389_v56 = vmax.f32 %v3387_v52, %v3388_v32  ;;  %v3395_v44 = vrot.slane %v3394_v34, 4 }
 0x2fb   : > { %v3402_v22 = vrot.slane %v3401_v11, 4  ;;  %v3408_v57 = vsel %vm3260_vm5, %v2982_v30, -inf  ;;  %v3415_v37 = vsel %vm3260_vm5, %v2981_v2, -inf  ;;  %v3422_v35 = vsel %vm3260_vm5, %v2983_v42, -inf }
 0x2fc   : > { %v3377_v17 = vmax.f32 %v3375_v26, %v3376_v49  ;;  %v3383_v29 = vrot.slane %v3382_v54, 2  ;;  %v3390_v19 = vrot.slane %v3389_v56, 2  ;;  %v3396_v25 = vmax.f32 %v3394_v34, %v3395_v44 }
 0x2fd   : > { %v3403_v18 = vmax.f32 %v3401_v11, %v3402_v22  ;;  %v3409_v51 = vrot.slane %v3408_v57, 4  ;;  %v3416_v27 = vrot.slane %v3415_v37, 4  ;;  %v3423_v6 = vrot.slane %v3422_v35, 4 }
 0x2fe   : > { %v3378_v61 = vrot.slane %v3377_v17, 1  ;;  %v3384_v20 = vmax.f32 %v3382_v54, %v3383_v29  ;;  %v3391_v41 = vmax.f32 %v3389_v56, %v3390_v19  ;;  %v3397_v40 = vrot.slane %v3396_v25, 2  ;;  %v6720_v28 = vpop.f32.mrb[14].mxu0 }
 0x2ff   : > { %v3404_v5 = vrot.slane %v3403_v18, 2  ;;  %v3410_v33 = vmax.f32 %v3408_v57, %v3409_v51  ;;  %v3417_v58 = vmax.f32 %v3415_v37, %v3416_v27  ;;  %v3424_v14 = vmax.f32 %v3422_v35, %v3423_v6  ;;  %v2639_v7 = vpop.f32.mrb[15].mxu0 }
 0x300   : > { %v3379_v48 = vmax.f32 %v3377_v17, %v3378_v61  ;;  %v3385_v55 = vrot.slane %v3384_v20, 1  ;;  %v3392_v23 = vrot.slane %v3391_v41, 1  ;;  %v3398_v24 = vmax.f32 %v3396_v25, %v3397_v40 }
 0x301   : > { %v3405_v60 = vmax.f32 %v3403_v18, %v3404_v5  ;;  %v3411_v8 = vrot.slane %v3410_v33, 2  ;;  %v3418_v52 = vrot.slane %v3417_v58, 2  ;;  %v3425_v43 = vrot.slane %v3424_v14, 2 }
 0x302   : > { %v3386_v2 = vmax.f32 %v3384_v20, %v3385_v55  ;;  %v3393_v4 = vmax.f32 %v3391_v41, %v3392_v23  ;;  %v3399_v26 = vrot.slane %v3398_v24, 1  ;;  %v3795_v3 = vsel %vm2150_vm3, %v3379_v48, -inf }
 0x303   : > { %v3406_v32 = vrot.slane %v3405_v60, 1  ;;  %v3412_v34 = vmax.f32 %v3410_v33, %v3411_v8  ;;  %v3419_v30 = vmax.f32 %v3417_v58, %v3418_v52  ;;  %v3426_v42 = vmax.f32 %v3424_v14, %v3425_v43 }
 0x304   : > { %v3400_v11 = vmax.f32 %v3398_v24, %v3399_v26  ;;  %v3784_v49 = vsel %vm2150_vm3, %v3393_v4, -inf  ;;  %v3798_v54 = vsel %vm2150_vm3, %v3386_v2, -inf  ;;  %v2861_v56 = vmax.f32 %v6680_v9, 0.0 }
 0x305   : > { %v3785_v44 = vmax.f32 %v6663_v16, %v3784_v49  ;;  %v3407_v22 = vmax.f32 %v3405_v60, %v3406_v32  ;;  %v3413_v57 = vrot.slane %v3412_v34, 1  ;;  %v3420_v37 = vrot.slane %v3419_v30, 1 }
 0x306   : > { %v3787_v35 = vsel %vm2150_vm3, %v3400_v11, -inf  ;;  %v3427_v17 = vrot.slane %v3426_v42, 1  ;;  %v3137_v29 = vcombine.high %v2861_v56, %v2861_v56  ;;  %v3144_v19 = vrot.slane %v2861_v56, %v6563_v59 }
 0x307   : > { %v3788_v25 = vmax.f32 %v6669_v39, %v3787_v35  ;;  %v3414_v18 = vmax.f32 %v3412_v34, %v3413_v57  ;;  %v3421_v51 = vmax.f32 %v3419_v30, %v3420_v37  ;;  %v3790_v27 = vsel %vm2150_vm3, %v3407_v22, -inf }
 0x308   : > { %v3428_v6 = vmax.f32 %v3426_v42, %v3427_v17  ;;  %v3791_v9 = vmax.f32 %v6666_v0, %v3790_v27  ;;  %v3151_v16 = vrot.slane %v3137_v29, %v6563_v59  ;;  %v3152_v61 = vcombine.high %v3144_v19, %v3144_v19 }
 0x309   : > { %v3919_v20 = vsel %vm3909_vm6, %v3788_v25, %v3785_v44  ;;  %v3793_v41 = vsel %vm2150_vm3, %v3414_v18, -inf  ;;  %v3796_v40 = vsel %vm2150_vm3, %v3421_v51, -inf  ;;  %v3681_v5 = vsel %vm3260_vm5, %v3144_v19, -inf  ;;  %v6737_v33 = vpop.f32.mrb[16].mxu0 }
 0x30a   : > { %v3794_v39 = vmax.f32 %v6672_v38, %v3793_v41  ;;  %v3797_v58 = vmax.f32 %v3795_v3, %v3796_v40  ;;  %v3799_v14 = vsel %vm2150_vm3, %v3428_v6, -inf  ;;  %v3920_v0 = vsel %vm3911_vm7, %v3791_v9, %v3919_v20  ;;  %v2644_v7 = vpop.f32.mrb[17].mxu0 }
 0x30b   : > { %v3800_v48 = vmax.f32 %v3798_v54, %v3799_v14  ;;  %v3153_v55 = vcombine.high %v3151_v16, %v3151_v16  ;;  %v3682_v23 = vrot.slane %v3681_v5, 4  ;;  %v3688_v24 = vsel %vm3260_vm5, %v3152_v61, -inf }
 0x30c   : > { %v3921_v60 = vsel %vm3913_vm8, %v3794_v39, %v3920_v0  ;;  %v3689_v8 = vrot.slane %v3688_v24, 4  ;;  %v3695_v52 = vsel %vm3260_vm5, %v3151_v16, -inf  ;;  %v2860_v43 = vmax.f32 %v6684_v53, 0.0 }
 0x30d   : > { %v3922_v38 = vsel %vm3915_vm9, %v3797_v58, %v3921_v60  ;;  %v3683_v2 = vmax.f32 %v3681_v5, %v3682_v23  ;;  %v3696_v4 = vrot.slane %v3695_v52, 4  ;;  %v3702_v26 = vsel %vm3260_vm5, %v3153_v55, -inf  ;;  %v6748_v3 = vpop.f32.mrb[18].mxu0 }
 0x30e   : > { %v3923_v32 = vsel %vm3917_vm10, %v3800_v48, %v3922_v38  ;;  %v3690_v34 = vmax.f32 %v3688_v24, %v3689_v8  ;;  %v3703_v30 = vrot.slane %v3702_v26, 4  ;;  %v3120_v42 = vcombine.high %v2860_v43, %v2860_v43  ;;  %v2649_v11 = vpop.f32.mrb[19].mxu0 }
 0x30f   : > { %3952 = vst.msk [vmem:[%s6704_s27 + $0x8] sm:$0x3f] %vm3950_vm11, %v3923_v32  ;;  %v3684_v49 = vrot.slane %v3683_v2, 2  ;;  %v3697_v54 = vmax.f32 %v3695_v52, %v3696_v4  ;;  %v3127_v53 = vrot.slane %v2860_v43, %v6563_v59  ;;  %v2843_v57 = vadd.f32 %v6655_v50, %v6575_v12 }
 0x310   : > { %v3691_v56 = vrot.slane %v3690_v34, 2  ;;  %v3704_v44 = vmax.f32 %v3702_v26, %v3703_v30  ;;  %v3134_v22 = vrot.slane %v3120_v42, %v6563_v59  ;;  %v2633_v20 = vadd.f32 %v6558_v45, %v6660_v36 }
 0x311   : > { %v3698_v37 = vrot.slane %v3697_v54, 2  ;;  %v3135_v35 = vcombine.high %v3127_v53, %v3127_v53  ;;  %v3653_v17 = vsel %vm3260_vm5, %v3127_v53, -inf  ;;  %v3685_v29 = vmax.f32 %v3683_v2, %v3684_v49 }
 0x312   : > { %v3705_v19 = vrot.slane %v3704_v44, 2  ;;  %v3654_v25 = vrot.slane %v3653_v17, 4  ;;  %v3692_v18 = vmax.f32 %v3690_v34, %v3691_v56  ;;  %v3667_v9 = vsel %vm3260_vm5, %v3134_v22, -inf }
 0x313   : > { %v3660_v51 = vsel %vm3260_vm5, %v3135_v35, -inf  ;;  %v3699_v27 = vmax.f32 %v3697_v54, %v3698_v37  ;;  %v3136_v16 = vcombine.high %v3134_v22, %v3134_v22  ;;  %v3686_v12 = vrot.slane %v3685_v29, 1 }
 0x314   : > { %v3655_v6 = vmax.f32 %v3653_v17, %v3654_v25  ;;  %v3661_v61 = vrot.slane %v3660_v51, 4  ;;  %v3706_v50 = vmax.f32 %v3704_v44, %v3705_v19  ;;  %v3693_v41 = vrot.slane %v3692_v18, 1 }
 0x315   : > { %v3668_v40 = vrot.slane %v3667_v9, 4  ;;  %v3700_v5 = vrot.slane %v3699_v27, 1  ;;  %v3674_v14 = vsel %vm3260_vm5, %v3136_v16, -inf  ;;  %v2788_v0 = vadd.f32 %v6598_v1, %v2633_v20 }
 0x316   : > { %v3656_v39 = vrot.slane %v3655_v6, 2  ;;  %v3662_v58 = vmax.f32 %v3660_v51, %v3661_v61  ;;  %v2863_v7 = vmax.f32 %v2843_v57, 0.0  ;;  %v2683_v48 = vadd.f32 %v6558_v45, %v6553_v63 }
 0x317   : > { %v3687_v55 = vmax.f32 %v3685_v29, %v3686_v12  ;;  %v3707_v23 = vrot.slane %v3706_v50, 1  ;;  %v3694_v24 = vmax.f32 %v3692_v18, %v3693_v41  ;;  %v6766_v60 = vmax.f32 %v3667_v9, %v3668_v40 }
 0x318   : > { %v2852_v36 = vmax.f32 %v2788_v0, 0.0  ;;  %v3171_v8 = vcombine.high %v2863_v7, %v2863_v7  ;;  %v6768_v52 = vmax.f32 %v3655_v6, %v3656_v39  ;;  %v3675_v43 = vrot.slane %v3674_v14, 4 }
 0x319   : > { %v3178_v38 = vrot.slane %v2863_v7, %v6563_v59  ;;  %v6772_v2 = vadd.f32 %v6657_v13, %v2683_v48  ;;  %v3701_v1 = vmax.f32 %v3699_v27, %v3700_v5  ;;  %v3663_v4 = vrot.slane %v3662_v58, 2 }
 0x31a   : > { %v2984_v26 = vcombine.high %v2852_v36, %v2852_v36  ;;  %v2991_v63 = vrot.slane %v2852_v36, %v6563_v59  ;;  %v6775_v32 = vmax.f32 %v3706_v50, %v3707_v23  ;;  %v6778_v34 = vsel %vm2150_vm3, %v3687_v55, -inf }
 0x31b   : > { %v3185_v30 = vrot.slane %v3171_v8, %v6563_v59  ;;  %v3186_v42 = vcombine.high %v3178_v38, %v3178_v38  ;;  %v6782_v11 = vsel %vm2150_vm3, %v3694_v24, -inf  ;;  %v3670_v49 = vrot.slane %v6766_v60, 2 }
 0x31c   : > { %v2998_v13 = vrot.slane %v2984_v26, %v6563_v59  ;;  %v2999_v54 = vcombine.high %v2991_v63, %v2991_v63  ;;  %v3658_v53 = vrot.slane %v6768_v52, 1  ;;  %v6787_v56 = vmax.f32 %v3674_v14, %v3675_v43 }
 0x31d   : > { %v3429_v44 = vsel %vm3260_vm5, %v2991_v63, -inf  ;;  %v3737_v22 = vsel %vm3260_vm5, %v3178_v38, -inf  ;;  %v6791_v57 = vmax.f32 %v3662_v58, %v3663_v4  ;;  %v3187_v17 = vcombine.high %v3185_v30, %v3185_v30 }
 0x31e   : > { %v3000_v37 = vcombine.high %v2998_v13, %v2998_v13  ;;  %v3430_v35 = vrot.slane %v3429_v44, 4  ;;  %v3436_v29 = vsel %vm3260_vm5, %v2999_v54, -inf  ;;  %v3443_v19 = vsel %vm3260_vm5, %v2998_v13, -inf }
 0x31f   : > { %v3738_v25 = vrot.slane %v3737_v22, 4  ;;  %v3744_v18 = vsel %vm3260_vm5, %v3186_v42, -inf  ;;  %v3437_v27 = vrot.slane %v3436_v29, 4  ;;  %v3444_v6 = vrot.slane %v3443_v19, 4 }
 0x320   : > { %v3431_v51 = vmax.f32 %v3429_v44, %v3430_v35  ;;  %v6797_v9 = vsel %vm2150_vm3, %v3701_v1, -inf  ;;  %v3450_v16 = vsel %vm3260_vm5, %v3000_v37, -inf  ;;  %v3745_v20 = vrot.slane %v3744_v18, 4 }
 0x321   : > { %v3739_v61 = vmax.f32 %v3737_v22, %v3738_v25  ;;  %v3751_v12 = vsel %vm3260_vm5, %v3185_v30, -inf  ;;  %v3438_v41 = vmax.f32 %v3436_v29, %v3437_v27  ;;  %v3445_v40 = vmax.f32 %v3443_v19, %v3444_v6 }
 0x322   : > { %v3432_v50 = vrot.slane %v3431_v51, 2  ;;  %v3451_v5 = vrot.slane %v3450_v16, 4  ;;  %v3746_v58 = vmax.f32 %v3744_v18, %v3745_v20  ;;  %v3752_v14 = vrot.slane %v3751_v12, 4 }
 0x323   : > { %v3740_v39 = vrot.slane %v3739_v61, 2  ;;  %v3758_v0 = vsel %vm3260_vm5, %v3187_v17, -inf  ;;  %v3439_v48 = vrot.slane %v3438_v41, 2  ;;  %v3446_v55 = vrot.slane %v3445_v40, 2 }
 0x324   : > { %v3433_v7 = vmax.f32 %v3431_v51, %v3432_v50  ;;  %v3452_v23 = vmax.f32 %v3450_v16, %v3451_v5  ;;  %v3747_v36 = vrot.slane %v3746_v58, 2  ;;  %v3753_v8 = vmax.f32 %v3751_v12, %v3752_v14 }
 0x325   : > { %v3741_v24 = vmax.f32 %v3739_v61, %v3740_v39  ;;  %v3759_v43 = vrot.slane %v3758_v0, 4  ;;  %v3440_v1 = vmax.f32 %v3438_v41, %v3439_v48  ;;  %v3447_v4 = vmax.f32 %v3445_v40, %v3446_v55 }
 0x326   : > { %v3434_v38 = vrot.slane %v3433_v7, 1  ;;  %v3453_v26 = vrot.slane %v3452_v23, 2  ;;  %v3748_v30 = vmax.f32 %v3746_v58, %v3747_v36  ;;  %v3754_v42 = vrot.slane %v3753_v8, 2 }
 0x327   : > { %v3742_v63 = vrot.slane %v3741_v24, 1  ;;  %v3760_v13 = vmax.f32 %v3758_v0, %v3759_v43  ;;  %v3441_v22 = vrot.slane %v3440_v1, 1  ;;  %v3448_v37 = vrot.slane %v3447_v4, 1 }
 0x328   : > { %v3435_v44 = vmax.f32 %v3433_v7, %v3434_v38  ;;  %v3454_v35 = vmax.f32 %v3452_v23, %v3453_v26  ;;  %v3749_v19 = vrot.slane %v3748_v30, 1  ;;  %v3755_v25 = vmax.f32 %v3753_v8, %v3754_v42 }
 0x329   : > { %v3743_v29 = vmax.f32 %v3741_v24, %v3742_v63  ;;  %v3761_v18 = vrot.slane %v3760_v13, 2  ;;  %v6805_v51 = vmax.f32 %v6766_v60, %v3670_v49  ;;  %v3442_v27 = vmax.f32 %v3440_v1, %v3441_v22 }
 0x32a   : > { %v6802_v54 = vpop.f32.mrb[20].mxu0  ;;  %v3455_v6 = vrot.slane %v3454_v35, 1  ;;  %v6809_v16 = vsel %vm2150_vm3, %v6775_v32, -inf  ;;  %v3750_v61 = vmax.f32 %v3748_v30, %v3749_v19  ;;  %v3756_v20 = vrot.slane %v3755_v25, 1 }
 0x32b   : > { %v2654_v17 = vpop.f32.mrb[21].mxu0  ;;  %v3762_v12 = vmax.f32 %v3760_v13, %v3761_v18  ;;  %v6812_v50 = vsel %vm2150_vm3, %v3743_v29, -inf  ;;  %v6814_v41 = vmax.f32 %v3447_v4, %v3448_v37  ;;  %v6817_v40 = vsel %vm2150_vm3, %v3435_v44, -inf }
 0x32c   : > { %v3863_v60 = vmax.f32 %v6797_v9, %v6812_v50  ;;  %v2862_v49 = vmax.f32 %v6772_v2, 0.0  ;;  %v3757_v5 = vmax.f32 %v3755_v25, %v3756_v20  ;;  %v6823_v32 = vsel %vm2150_vm3, %v3750_v61, -inf }
 0x32d   : > { %v3763_v39 = vrot.slane %v3762_v12, 1  ;;  %v2638_v58 = vadd.f32 %v6558_v45, %v6720_v28  ;;  %v3866_v14 = vmax.f32 %v6809_v16, %v6823_v32  ;;  %v2643_v48 = vadd.f32 %v6558_v45, %v6737_v33 }
 0x32e   : > { %v3154_v0 = vcombine.high %v2862_v49, %v2862_v49  ;;  %v3161_v7 = vrot.slane %v2862_v49, %v6563_v59  ;;  %v6834_v2 = vmax.f32 %v3454_v35, %v3455_v6  ;;  %v6837_v23 = vsel %vm2150_vm3, %v3442_v27, -inf }
 0x32f   : > { %v3764_v24 = vmax.f32 %v3762_v12, %v3763_v39  ;;  %v2793_v36 = vadd.f32 %v6595_v31, %v2638_v58  ;;  %v2798_v1 = vadd.f32 %v6602_v15, %v2643_v48  ;;  %v6844_v45 = vsel %vm2150_vm3, %v3757_v5, -inf }
 0x330   : > { %v3168_v8 = vrot.slane %v3154_v0, %v6563_v59  ;;  %v3169_v43 = vcombine.high %v3161_v7, %v3161_v7  ;;  %v3709_v38 = vsel %vm3260_vm5, %v3161_v7, -inf }
 0x331   : > { %v6832_v55 = vpop.f32.mrb[22].mxu0  ;;  %v3710_v4 = vrot.slane %v3709_v38, 4  ;;  %v6847_v33 = vsel %vm2150_vm3, %v3764_v24, -inf  ;;  %v2853_v26 = vmax.f32 %v2793_v36, 0.0  ;;  %v2854_v42 = vmax.f32 %v2798_v1, 0.0 }
 0x332   : > { %v2659_v28 = vpop.f32.mrb[23].mxu0  ;;  %v3170_v63 = vcombine.high %v3168_v8, %v3168_v8  ;;  %v3716_v30 = vsel %vm3260_vm5, %v3169_v43, -inf  ;;  %v3723_v31 = vsel %vm3260_vm5, %v3168_v8, -inf }
 0x333   : > { %v3711_v44 = vmax.f32 %v3709_v38, %v3710_v4  ;;  %v3717_v22 = vrot.slane %v3716_v30, 4  ;;  %v3724_v37 = vrot.slane %v3723_v31, 4  ;;  %v3001_v15 = vcombine.high %v2853_v26, %v2853_v26 }
 0x334   : > { %v3730_v17 = vsel %vm3260_vm5, %v3170_v63, -inf  ;;  %v3008_v29 = vrot.slane %v2853_v26, %v6563_v59  ;;  %v3018_v19 = vcombine.high %v2854_v42, %v2854_v42  ;;  %v6856_v25 = vrot.slane %v2854_v42, %v6563_v59 }
 0x335   : > { %v6851_v13 = vpop.f32.mrb[24].mxu0  ;;  %v3712_v18 = vrot.slane %v3711_v44, 2  ;;  %v3718_v27 = vmax.f32 %v3716_v30, %v3717_v22  ;;  %v3725_v6 = vmax.f32 %v3723_v31, %v3724_v37  ;;  %v3731_v61 = vrot.slane %v3730_v17, 4 }
 0x336   : > { %v2664_v35 = vpop.f32.mrb[25].mxu0  ;;  %v3015_v20 = vrot.slane %v3001_v15, %v6563_v59  ;;  %v3016_v12 = vcombine.high %v3008_v29, %v3008_v29  ;;  %v3457_v49 = vsel %vm3260_vm5, %v3008_v29, -inf  ;;  %v6861_v5 = vrot.slane %v3018_v19, %v6563_v59 }
 0x337   : > { %v3713_v39 = vmax.f32 %v3711_v44, %v3712_v18  ;;  %v3719_v58 = vrot.slane %v3718_v27, 2  ;;  %v3726_v0 = vrot.slane %v3725_v6, 2  ;;  %v3732_v7 = vmax.f32 %v3730_v17, %v3731_v61 }
 0x338   : > { %v3017_v48 = vcombine.high %v3015_v20, %v3015_v20  ;;  %v3458_v24 = vrot.slane %v3457_v49, 4  ;;  %v3464_v36 = vsel %vm3260_vm5, %v3016_v12, -inf  ;;  %v3471_v28 = vsel %vm3260_vm5, %v3015_v20, -inf }
 0x339   : > { %v3714_v8 = vrot.slane %v3713_v39, 1  ;;  %v3720_v43 = vmax.f32 %v3718_v27, %v3719_v58  ;;  %v3727_v38 = vmax.f32 %v3725_v6, %v3726_v0  ;;  %v3733_v1 = vrot.slane %v3732_v7, 2 }
 0x33a   : > { %v3459_v4 = vmax.f32 %v3457_v49, %v3458_v24  ;;  %v3465_v26 = vrot.slane %v3464_v36, 4  ;;  %v3472_v63 = vrot.slane %v3471_v28, 4  ;;  %v3478_v30 = vsel %vm3260_vm5, %v3017_v48, -inf }
 0x33b   : > { %v3715_v31 = vmax.f32 %v3713_v39, %v3714_v8  ;;  %v3721_v42 = vrot.slane %v3720_v43, 1  ;;  %v3728_v44 = vrot.slane %v3727_v38, 1  ;;  %v3734_v22 = vmax.f32 %v3732_v7, %v3733_v1 }
 0x33c   : > { %v3460_v37 = vrot.slane %v3459_v4, 2  ;;  %v3466_v15 = vmax.f32 %v3464_v36, %v3465_v26  ;;  %v3473_v35 = vmax.f32 %v3471_v28, %v3472_v63  ;;  %v3479_v17 = vrot.slane %v3478_v30, 4 }
 0x33d   : > { %v3722_v29 = vmax.f32 %v3720_v43, %v3721_v42  ;;  %v3729_v19 = vmax.f32 %v3727_v38, %v3728_v44  ;;  %v3735_v18 = vrot.slane %v3734_v22, 1  ;;  %v3867_v27 = vsel %vm2150_vm3, %v3715_v31, -inf }
 0x33e   : > { %v3869_v6 = vmax.f32 %v3867_v27, %v6844_v45  ;;  %v3461_v61 = vmax.f32 %v3459_v4, %v3460_v37  ;;  %v3467_v20 = vrot.slane %v3466_v15, 2  ;;  %v3474_v12 = vrot.slane %v3473_v35, 2 }
 0x33f   : > { %v3736_v49 = vmax.f32 %v3734_v22, %v3735_v18  ;;  %v3856_v39 = vsel %vm2150_vm3, %v3729_v19, -inf  ;;  %v3870_v58 = vsel %vm2150_vm3, %v3722_v29, -inf  ;;  %v3480_v0 = vmax.f32 %v3478_v30, %v3479_v17 }
 0x340   : > { %v3857_v48 = vmax.f32 %v6778_v34, %v3856_v39  ;;  %v3872_v24 = vmax.f32 %v3870_v58, %v6847_v33  ;;  %v3462_v36 = vrot.slane %v3461_v61, 1  ;;  %v3468_v28 = vmax.f32 %v3466_v15, %v3467_v20 }
 0x341   : > { %v3859_v45 = vsel %vm2150_vm3, %v3736_v49, -inf  ;;  %v3475_v43 = vmax.f32 %v3473_v35, %v3474_v12  ;;  %v3481_v38 = vrot.slane %v3480_v0, 2  ;;  %v3033_v1 = vcombine.high %v6856_v25, %v6856_v25 }
 0x342   : > { %v6870_v7 = vpop.f32.mrb[26].mxu0  ;;  %v3860_v4 = vmax.f32 %v6782_v11, %v3859_v45  ;;  %v3469_v26 = vrot.slane %v3468_v28, 1  ;;  %v6880_v63 = vsel %vm2150_vm3, %v6814_v41, -inf  ;;  %v6884_v34 = vsel %vm2150_vm3, %v6834_v2, -inf }
 0x343   : > { %v2669_v8 = vpop.f32.mrb[27].mxu0  ;;  %v3476_v33 = vrot.slane %v3475_v43, 1  ;;  %v3482_v30 = vmax.f32 %v3480_v0, %v3481_v38  ;;  %v3485_v31 = vsel %vm3260_vm5, %v6856_v25, -inf  ;;  %v3492_v42 = vsel %vm3260_vm5, %v3033_v1, -inf }
 0x344   : > { %v3939_v44 = vsel %vm3909_vm6, %v3860_v4, %v3857_v48  ;;  %v3463_v22 = vmax.f32 %v3461_v61, %v3462_v36  ;;  %v3034_v11 = vcombine.high %v6861_v5, %v6861_v5  ;;  %v3486_v37 = vrot.slane %v3485_v31, 4 }
 0x345   : > { %v3940_v41 = vsel %vm3911_vm7, %v3863_v60, %v3939_v44  ;;  %v3477_v2 = vmax.f32 %v3475_v43, %v3476_v33  ;;  %v3483_v15 = vrot.slane %v3482_v30, 1  ;;  %v3493_v35 = vrot.slane %v3492_v42, 4 }
 0x346   : > { %v3941_v25 = vsel %vm3913_vm8, %v3866_v14, %v3940_v41  ;;  %v3470_v17 = vmax.f32 %v3468_v28, %v3469_v26  ;;  %v3487_v29 = vmax.f32 %v3485_v31, %v3486_v37  ;;  %v3499_v19 = vsel %vm3260_vm5, %v6861_v5, -inf  ;;  %v6913_v5 = vld [vmem:[%s7035_s4] ss:$0 sm:$0xff] }
 0x347   : > { %v3942_v18 = vsel %vm3915_vm9, %v3869_v6, %v3941_v25  ;;  %v3484_v27 = vmax.f32 %v3482_v30, %v3483_v15  ;;  %v3802_v9 = vsel %vm2150_vm3, %v3477_v2, -inf  ;;  %v3494_v50 = vmax.f32 %v3492_v42, %v3493_v35 }
 0x348   : > { %v3943_v60 = vsel %vm3917_vm10, %v3872_v24, %v3942_v18  ;;  %v3803_v61 = vmax.f32 %v6817_v40, %v3802_v9  ;;  %v3488_v20 = vrot.slane %v3487_v29, 2  ;;  %v3500_v12 = vrot.slane %v3499_v19, 4 }
 0x349   : > { %3956 = vst.msk [vmem:[%s6704_s27 + $0x28] sm:$0x3f] %vm3950_vm11, %v3943_v60  ;;  %v3805_v16 = vsel %vm2150_vm3, %v3484_v27, -inf  ;;  %v3495_v32 = vrot.slane %v3494_v50, 2  ;;  %v3506_v14 = vsel %vm3260_vm5, %v3034_v11, -inf  ;;  %v2648_v6 = vadd.f32 %v6913_v5, %v6748_v3 }
 0x34a   : > { %v3806_v49 = vmax.f32 %v6837_v23, %v3805_v16  ;;  %v3489_v40 = vmax.f32 %v3487_v29, %v3488_v20  ;;  %v3501_v39 = vmax.f32 %v3499_v19, %v3500_v12  ;;  %v3507_v58 = vrot.slane %v3506_v14, 4 }
 0x34b   : > { %v3496_v0 = vmax.f32 %v3494_v50, %v3495_v32  ;;  %v2803_v48 = vadd.f32 %v6600_v21, %v2648_v6  ;;  %v2653_v24 = vadd.f32 %v6913_v5, %v6802_v54  ;;  %v2658_v36 = vadd.f32 %v6913_v5, %v6832_v55 }
 0x34c   : > { %v3924_v28 = vsel %vm3909_vm6, %v3806_v49, %v3803_v61  ;;  %v3490_v8 = vrot.slane %v3489_v40, 1  ;;  %v3502_v45 = vrot.slane %v3501_v39, 2  ;;  %v3508_v43 = vmax.f32 %v3506_v14, %v3507_v58 }
 0x34d   : > { %v3497_v3 = vrot.slane %v3496_v0, 1  ;;  %v2855_v38 = vmax.f32 %v2803_v48, 0.0  ;;  %v2808_v23 = vadd.f32 %v6610_v47, %v2653_v24  ;;  %v2813_v1 = vadd.f32 %v6607_v46, %v2658_v36 }
 0x34e   : > { %v3813_v4 = vsel %vm2150_vm3, %v3463_v22, -inf  ;;  %v3491_v21 = vmax.f32 %v3489_v40, %v3490_v8  ;;  %v3503_v26 = vmax.f32 %v3501_v39, %v3502_v45  ;;  %v3509_v33 = vrot.slane %v3508_v43, 2 }
 0x34f   : > { %v3816_v54 = vsel %vm2150_vm3, %v3470_v17, -inf  ;;  %v3498_v30 = vmax.f32 %v3496_v0, %v3497_v3  ;;  %v3035_v55 = vcombine.high %v2855_v38, %v2855_v38  ;;  %v3042_v31 = vrot.slane %v2855_v38, %v6563_v59 }
 0x350   : > { %v3504_v42 = vrot.slane %v3503_v26, 1  ;;  %v3510_v44 = vmax.f32 %v3508_v43, %v3509_v33  ;;  %v3808_v11 = vsel %vm2150_vm3, %v3491_v21, -inf  ;;  %v2856_v37 = vmax.f32 %v2808_v23, 0.0 }
 0x351   : > { %v3809_v47 = vmax.f32 %v6880_v63, %v3808_v11  ;;  %v3811_v46 = vsel %vm2150_vm3, %v3498_v30, -inf  ;;  %v3049_v22 = vrot.slane %v3035_v55, %v6563_v59  ;;  %v3050_v41 = vcombine.high %v3042_v31, %v3042_v31 }
 0x352   : > { %v3505_v2 = vmax.f32 %v3503_v26, %v3504_v42  ;;  %v3511_v15 = vrot.slane %v3510_v44, 1  ;;  %v3812_v35 = vmax.f32 %v6884_v34, %v3811_v46  ;;  %v3513_v25 = vsel %vm3260_vm5, %v3042_v31, -inf }
 0x353   : > { %v3925_v17 = vsel %vm3911_vm7, %v3809_v47, %v3924_v28  ;;  %v3051_v29 = vcombine.high %v3049_v22, %v3049_v22  ;;  %v3514_v19 = vrot.slane %v3513_v25, 4  ;;  %v3520_v18 = vsel %vm3260_vm5, %v3050_v41, -inf }
 0x354   : > { %v3512_v27 = vmax.f32 %v3510_v44, %v3511_v15  ;;  %v3814_v63 = vsel %vm2150_vm3, %v3505_v2, -inf  ;;  %v3926_v9 = vsel %vm3913_vm8, %v3812_v35, %v3925_v17  ;;  %v3521_v50 = vrot.slane %v3520_v18, 4 }
 0x355   : > { %v3815_v60 = vmax.f32 %v3813_v4, %v3814_v63  ;;  %v3515_v61 = vmax.f32 %v3513_v25, %v3514_v19  ;;  %v3527_v20 = vsel %vm3260_vm5, %v3049_v22, -inf  ;;  %v3534_v34 = vsel %vm3260_vm5, %v3051_v29, -inf }
 0x356   : > { %v3817_v12 = vsel %vm2150_vm3, %v3512_v27, -inf  ;;  %v3522_v16 = vmax.f32 %v3520_v18, %v3521_v50  ;;  %v3528_v32 = vrot.slane %v3527_v20, 4  ;;  %v3535_v14 = vrot.slane %v3534_v34, 4 }
 0x357   : > { %v3818_v6 = vmax.f32 %v3816_v54, %v3817_v12  ;;  %v3927_v49 = vsel %vm3915_vm9, %v3815_v60, %v3926_v9  ;;  %v3516_v40 = vrot.slane %v3515_v61, 2  ;;  %v3052_v39 = vcombine.high %v2856_v37, %v2856_v37 }
 0x358   : > { %v3523_v58 = vrot.slane %v3522_v16, 2  ;;  %v3529_v0 = vmax.f32 %v3527_v20, %v3528_v32  ;;  %v3536_v48 = vmax.f32 %v3534_v34, %v3535_v14  ;;  %v3059_v24 = vrot.slane %v2856_v37, %v6563_v59 }
 0x359   : > { %v3928_v36 = vsel %vm3917_vm10, %v3818_v6, %v3927_v49  ;;  %v3517_v28 = vmax.f32 %v3515_v61, %v3516_v40  ;;  %v3066_v8 = vrot.slane %v3052_v39, %v6563_v59  ;;  %v2857_v45 = vmax.f32 %v2813_v1, 0.0 }
 0x35a   : > { %3953 = vst.msk [vmem:[%s6704_s27 + $0x10] sm:$0x3f] %vm3950_vm11, %v3928_v36  ;;  %v3524_v43 = vmax.f32 %v3522_v16, %v3523_v58  ;;  %v3530_v3 = vrot.slane %v3529_v0, 2  ;;  %v3537_v38 = vrot.slane %v3536_v48, 2  ;;  %v3067_v23 = vcombine.high %v3059_v24, %v3059_v24 }
 0x35b   : > { %v3518_v4 = vrot.slane %v3517_v28, 1  ;;  %v3068_v21 = vcombine.high %v3066_v8, %v3066_v8  ;;  %v3541_v26 = vsel %vm3260_vm5, %v3059_v24, -inf  ;;  %v3555_v33 = vsel %vm3260_vm5, %v3066_v8, -inf }
 0x35c   : > { %v3525_v54 = vrot.slane %v3524_v43, 1  ;;  %v3531_v30 = vmax.f32 %v3529_v0, %v3530_v3  ;;  %v3538_v55 = vmax.f32 %v3536_v48, %v3537_v38  ;;  %v3542_v31 = vrot.slane %v3541_v26, 4 }
 0x35d   : > { %v3519_v42 = vmax.f32 %v3517_v28, %v3518_v4  ;;  %v3548_v44 = vsel %vm3260_vm5, %v3067_v23, -inf  ;;  %v3556_v1 = vrot.slane %v3555_v33, 4  ;;  %v3562_v11 = vsel %vm3260_vm5, %v3068_v21, -inf }
 0x35e   : > { %v3532_v37 = vrot.slane %v3531_v30, 1  ;;  %v3539_v47 = vrot.slane %v3538_v55, 1  ;;  %v3543_v46 = vmax.f32 %v3541_v26, %v3542_v31  ;;  %v3069_v22 = vcombine.high %v2857_v45, %v2857_v45 }
 0x35f   : > { %v3677_v41 = vrot.slane %v6787_v56, 2  ;;  %v3549_v2 = vrot.slane %v3548_v44, 4  ;;  %v3557_v15 = vmax.f32 %v3555_v33, %v3556_v1  ;;  %v3563_v35 = vrot.slane %v3562_v11, 4 }
 0x360   : > { %v3526_v25 = vmax.f32 %v3524_v43, %v3525_v54  ;;  %v3819_v17 = vsel %vm2150_vm3, %v3519_v42, -inf  ;;  %v3544_v29 = vrot.slane %v3543_v46, 2  ;;  %v2663_v19 = vadd.f32 %v6913_v5, %v6851_v13 }
 0x361   : > { %v3550_v18 = vmax.f32 %v3548_v44, %v3549_v2  ;;  %v3558_v27 = vrot.slane %v3557_v15, 2  ;;  %v3564_v63 = vmax.f32 %v3562_v11, %v3563_v35  ;;  %v3076_v9 = vrot.slane %v2857_v45, %v6563_v59 }
 0x362   : > { %v3533_v50 = vmax.f32 %v3531_v30, %v3532_v37  ;;  %v3540_v60 = vmax.f32 %v3538_v55, %v3539_v47  ;;  %v3545_v61 = vmax.f32 %v3543_v46, %v3544_v29  ;;  %v3083_v20 = vrot.slane %v3069_v22, %v6563_v59 }
 0x363   : > { %v3551_v34 = vrot.slane %v3550_v18, 2  ;;  %v3559_v12 = vmax.f32 %v3557_v15, %v3558_v27  ;;  %v3565_v16 = vrot.slane %v3564_v63, 2  ;;  %v3084_v32 = vcombine.high %v3076_v9, %v3076_v9 }
 0x364   : > { %v3822_v14 = vsel %vm2150_vm3, %v3526_v25, -inf  ;;  %v3085_v6 = vcombine.high %v3083_v20, %v3083_v20  ;;  %v3569_v49 = vsel %vm3260_vm5, %v3076_v9, -inf  ;;  %v3583_v13 = vsel %vm3260_vm5, %v3083_v20, -inf }
 0x365   : > { %v3546_v40 = vrot.slane %v3545_v61, 1  ;;  %v3560_v39 = vrot.slane %v3559_v12, 1  ;;  %v3566_v58 = vmax.f32 %v3564_v63, %v3565_v16  ;;  %v3570_v0 = vrot.slane %v3569_v49, 4 }
 0x366   : > { %v3576_v48 = vsel %vm3260_vm5, %v3084_v32, -inf  ;;  %v3584_v24 = vrot.slane %v3583_v13, 4  ;;  %v3590_v36 = vsel %vm3260_vm5, %v3085_v6, -inf  ;;  %v3825_v28 = vsel %vm2150_vm3, %v3533_v50, -inf }
 0x367   : > { %v3552_v8 = vmax.f32 %v3550_v18, %v3551_v34  ;;  %v3561_v45 = vmax.f32 %v3559_v12, %v3560_v39  ;;  %v3567_v43 = vrot.slane %v3566_v58, 1  ;;  %v3571_v3 = vmax.f32 %v3569_v49, %v3570_v0 }
 0x368   : > { %v3577_v38 = vrot.slane %v3576_v48, 4  ;;  %v3585_v23 = vmax.f32 %v3583_v13, %v3584_v24  ;;  %v3591_v4 = vrot.slane %v3590_v36, 4  ;;  %v3828_v21 = vsel %vm2150_vm3, %v3540_v60, -inf }
 0x369   : > { %v3547_v26 = vmax.f32 %v3545_v61, %v3546_v40  ;;  %v3568_v33 = vmax.f32 %v3566_v58, %v3567_v43  ;;  %v3820_v54 = vsel %vm2150_vm3, %v3561_v45, -inf  ;;  %v3572_v30 = vrot.slane %v3571_v3, 2 }
 0x36a   : > { %v3821_v55 = vmax.f32 %v3819_v17, %v3820_v54  ;;  %v3578_v31 = vmax.f32 %v3576_v48, %v3577_v38  ;;  %v3586_v42 = vrot.slane %v3585_v23, 2  ;;  %v3592_v44 = vmax.f32 %v3590_v36, %v3591_v4 }
 0x36b   : > { %v3553_v1 = vrot.slane %v3552_v8, 1  ;;  %v3823_v11 = vsel %vm2150_vm3, %v3568_v33, -inf  ;;  %v3573_v37 = vmax.f32 %v3571_v3, %v3572_v30  ;;  %v2818_v47 = vadd.f32 %v6634_v62, %v2663_v19 }
 0x36c   : > { %v3824_v46 = vmax.f32 %v3822_v14, %v3823_v11  ;;  %v3579_v22 = vrot.slane %v3578_v31, 2  ;;  %v3587_v2 = vmax.f32 %v3585_v23, %v3586_v42  ;;  %v3593_v15 = vrot.slane %v3592_v44, 2 }
 0x36d   : > { %v3831_v35 = vsel %vm2150_vm3, %v3547_v26, -inf  ;;  %v3574_v25 = vrot.slane %v3573_v37, 1  ;;  %v2858_v29 = vmax.f32 %v2818_v47, 0.0  ;;  %v2668_v17 = vadd.f32 %v6913_v5, %v6870_v7 }
 0x36e   : > { %v3929_v18 = vsel %vm3909_vm6, %v3824_v46, %v3821_v55  ;;  %v3580_v27 = vmax.f32 %v3578_v31, %v3579_v22  ;;  %v3588_v63 = vrot.slane %v3587_v2, 1  ;;  %v3594_v9 = vmax.f32 %v3592_v44, %v3593_v15 }
 0x36f   : > { %v3575_v50 = vmax.f32 %v3573_v37, %v3574_v25  ;;  %v3086_v60 = vcombine.high %v2858_v29, %v2858_v29  ;;  %v3093_v62 = vrot.slane %v2858_v29, %v6563_v59  ;;  %v2823_v19 = vadd.f32 %v6625_v10, %v2668_v17 }
 0x370   : > { %v3554_v61 = vmax.f32 %v3552_v8, %v3553_v1  ;;  %v3581_v20 = vrot.slane %v3580_v27, 1  ;;  %v3589_v34 = vmax.f32 %v3587_v2, %v3588_v63  ;;  %v3595_v12 = vrot.slane %v3594_v9, 1 }
 0x371   : > { %v3826_v16 = vsel %vm2150_vm3, %v3575_v50, -inf  ;;  %v3100_v32 = vrot.slane %v3086_v60, %v6563_v59  ;;  %v3101_v7 = vcombine.high %v3093_v62, %v3093_v62  ;;  %v3597_v5 = vsel %vm3260_vm5, %v3093_v62, -inf }
 0x372   : > { %v3582_v14 = vmax.f32 %v3580_v27, %v3581_v20  ;;  %v3596_v6 = vmax.f32 %v3594_v9, %v3595_v12  ;;  %v3827_v49 = vmax.f32 %v3825_v28, %v3826_v16  ;;  %v3832_v13 = vsel %vm2150_vm3, %v3589_v34, -inf }
 0x373   : > { %v3833_v40 = vmax.f32 %v3831_v35, %v3832_v13  ;;  %v3102_v39 = vcombine.high %v3100_v32, %v3100_v32  ;;  %v3598_v58 = vrot.slane %v3597_v5, 4  ;;  %v3604_v10 = vsel %vm3260_vm5, %v3101_v7, -inf }
 0x374   : > { %v3834_v0 = vsel %vm2150_vm3, %v3554_v61, -inf  ;;  %v3829_v48 = vsel %vm2150_vm3, %v3582_v14, -inf  ;;  %v3835_v24 = vsel %vm2150_vm3, %v3596_v6, -inf  ;;  %v3930_v36 = vsel %vm3911_vm7, %v3827_v49, %v3929_v18 }
 0x375   : > { %v3830_v8 = vmax.f32 %v3828_v21, %v3829_v48  ;;  %v3836_v45 = vmax.f32 %v3834_v0, %v3835_v24  ;;  %v3605_v43 = vrot.slane %v3604_v10, 4  ;;  %v3611_v28 = vsel %vm3260_vm5, %v3100_v32, -inf }
 0x376   : > { %v3599_v3 = vmax.f32 %v3597_v5, %v3598_v58  ;;  %v3612_v38 = vrot.slane %v3611_v28, 4  ;;  %v3618_v23 = vsel %vm3260_vm5, %v3102_v39, -inf  ;;  %v2859_v4 = vmax.f32 %v2823_v19, 0.0 }
 0x377   : > { %v3659_v26 = vmax.f32 %v6768_v52, %v3658_v53  ;;  %v3665_v33 = vrot.slane %v6791_v57, 1  ;;  %v3931_v54 = vsel %vm3913_vm8, %v3830_v8, %v3930_v36  ;;  %v3619_v30 = vrot.slane %v3618_v23, 4 }
 0x378   : > { %v3672_v21 = vrot.slane %v6805_v51, 1  ;;  %v3932_v55 = vsel %vm3915_vm9, %v3833_v40, %v3931_v54  ;;  %v3613_v31 = vmax.f32 %v3611_v28, %v3612_v38  ;;  %v3103_v42 = vcombine.high %v2859_v4, %v2859_v4 }
 0x379   : > { %v3933_v44 = vsel %vm3917_vm10, %v3836_v45, %v3932_v55  ;;  %v3606_v1 = vmax.f32 %v3604_v10, %v3605_v43  ;;  %v3620_v11 = vmax.f32 %v3618_v23, %v3619_v30  ;;  %v3110_v37 = vrot.slane %v2859_v4, %v6563_v59 }
 0x37a   : > { %v3678_v52 = vmax.f32 %v6787_v56, %v3677_v41  ;;  %3954 = vst.msk [vmem:[%s6704_s27 + $0x18] sm:$0x3f] %vm3950_vm11, %v3933_v44  ;;  %v3600_v53 = vrot.slane %v3599_v3, 2  ;;  %v3614_v47 = vrot.slane %v3613_v31, 2  ;;  %v3117_v46 = vrot.slane %v3103_v42, %v6563_v59 }
 0x37b   : > { %v3666_v22 = vmax.f32 %v6791_v57, %v3665_v33  ;;  %v3621_v2 = vrot.slane %v3620_v11, 2  ;;  %v3118_v15 = vcombine.high %v3110_v37, %v3110_v37  ;;  %v3625_v35 = vsel %vm3260_vm5, %v3110_v37, -inf }
 0x37c   : > { %v7003_v25 = vsel %vm2150_vm3, %v3659_v26, -inf  ;;  %v3615_v29 = vmax.f32 %v3613_v31, %v3614_v47  ;;  %v3119_v17 = vcombine.high %v3117_v46, %v3117_v46  ;;  %v3626_v18 = vrot.slane %v3625_v35, 4 }
 0x37d   : > { %v3607_v27 = vrot.slane %v3606_v1, 2  ;;  %v3622_v56 = vmax.f32 %v3620_v11, %v3621_v2  ;;  %v3632_v41 = vsel %vm3260_vm5, %v3118_v15, -inf  ;;  %v3639_v63 = vsel %vm3260_vm5, %v3117_v46, -inf }
 0x37e   : > { %v3601_v9 = vmax.f32 %v3599_v3, %v3600_v53  ;;  %v3616_v59 = vrot.slane %v3615_v29, 1  ;;  %v3627_v50 = vmax.f32 %v3625_v35, %v3626_v18  ;;  %v3633_v57 = vrot.slane %v3632_v41, 4 }
 0x37f   : > { %v3679_v60 = vrot.slane %v3678_v52, 1  ;;  %v3623_v62 = vrot.slane %v3622_v56, 1  ;;  %v3640_v19 = vrot.slane %v3639_v63, 4  ;;  %v3646_v61 = vsel %vm3260_vm5, %v3119_v17, -inf }
 0x380   : > { %v3847_v20 = vsel %vm2150_vm3, %v3666_v22, -inf  ;;  %v3617_v34 = vmax.f32 %v3615_v29, %v3616_v59  ;;  %v3628_v12 = vrot.slane %v3627_v50, 2  ;;  %v3634_v16 = vmax.f32 %v3632_v41, %v3633_v57 }
 0x381   : > { %v3608_v32 = vmax.f32 %v3606_v1, %v3607_v27  ;;  %v3624_v7 = vmax.f32 %v3622_v56, %v3623_v62  ;;  %v3641_v5 = vmax.f32 %v3639_v63, %v3640_v19  ;;  %v3647_v14 = vrot.slane %v3646_v61, 4 }
 0x382   : > { %v3602_v6 = vrot.slane %v3601_v9, 1  ;;  %v3843_v49 = vsel %vm2150_vm3, %v3617_v34, -inf  ;;  %v3629_v13 = vmax.f32 %v3627_v50, %v3628_v12  ;;  %v3635_v40 = vrot.slane %v3634_v16, 2 }
 0x383   : > { %v3845_v39 = vmax.f32 %v3843_v49, %v7003_v25  ;;  %v3846_v58 = vsel %vm2150_vm3, %v3624_v7, -inf  ;;  %v3642_v10 = vrot.slane %v3641_v5, 2  ;;  %v3648_v0 = vmax.f32 %v3646_v61, %v3647_v14 }
 0x384   : > { %v3673_v48 = vmax.f32 %v6805_v51, %v3672_v21  ;;  %v3848_v24 = vmax.f32 %v3846_v58, %v3847_v20  ;;  %v3630_v36 = vrot.slane %v3629_v13, 1  ;;  %v3636_v8 = vmax.f32 %v3634_v16, %v3635_v40 }
 0x385   : > { %v3609_v45 = vrot.slane %v3608_v32, 1  ;;  %v3643_v43 = vmax.f32 %v3641_v5, %v3642_v10  ;;  %v3649_v28 = vrot.slane %v3648_v0, 2  ;;  %v3680_v3 = vmax.f32 %v3678_v52, %v3679_v60 }
 0x386   : > { %v3631_v38 = vmax.f32 %v3629_v13, %v3630_v36  ;;  %v3637_v23 = vrot.slane %v3636_v8, 1  ;;  %v3603_v4 = vmax.f32 %v3601_v9, %v3602_v6  ;;  %v3850_v54 = vsel %vm2150_vm3, %v3673_v48, -inf }
 0x387   : > { %v3644_v26 = vrot.slane %v3643_v43, 1  ;;  %v3650_v33 = vmax.f32 %v3648_v0, %v3649_v28  ;;  %v3610_v31 = vmax.f32 %v3608_v32, %v3609_v45  ;;  %v3853_v44 = vsel %vm2150_vm3, %v3680_v3, -inf }
 0x388   : > { %v3638_v30 = vmax.f32 %v3636_v8, %v3637_v23  ;;  %v3849_v55 = vsel %vm2150_vm3, %v3631_v38, -inf  ;;  %v3837_v11 = vsel %vm2150_vm3, %v3603_v4, -inf }
 0x389   : > { %v3645_v42 = vmax.f32 %v3643_v43, %v3644_v26  ;;  %v3651_v51 = vrot.slane %v3650_v33, 1  ;;  %v3851_v21 = vmax.f32 %v3849_v55, %v3850_v54  ;;  %v3840_v46 = vsel %vm2150_vm3, %v3610_v31, -inf }
 0x38a   : > { %v3852_v1 = vsel %vm2150_vm3, %v3638_v30, -inf }
 0x38b   : > { %v3652_v37 = vmax.f32 %v3650_v33, %v3651_v51  ;;  %v3838_v52 = vsel %vm2150_vm3, %v3645_v42, -inf  ;;  %v3854_v53 = vmax.f32 %v3852_v1, %v3853_v44 }
 0x38c   : > { %v3839_v47 = vmax.f32 %v3837_v11, %v3838_v52 }
 0x38d   : > { %v3841_v22 = vsel %vm2150_vm3, %v3652_v37, -inf }
 0x38e   : > { %v3842_v2 = vmax.f32 %v3840_v46, %v3841_v22 }
 0x390   : > { %v3934_v15 = vsel %vm3909_vm6, %v3842_v2, %v3839_v47 }
 0x391   : > { %v3935_v35 = vsel %vm3911_vm7, %v3845_v39, %v3934_v15 }
 0x392   : > { %v3936_v25 = vsel %vm3913_vm8, %v3848_v24, %v3935_v35 }
 0x393   : > { %v3937_v29 = vsel %vm3915_vm9, %v3851_v21, %v3936_v25 }
 0x394   : > { %v3938_v17 = vsel %vm3917_vm10, %v3854_v53, %v3937_v29 }
 0x395   : > { %3955 = vst.msk [vmem:[%s6704_s27 + $0x20] sm:$0x3f] %vm3950_vm11, %v3938_v17 }
 0x396 PF: > { %s15_s18 = sadd.s32 1, %s4329_s18  }
 0x397   : > { %p12_p4 = scmp.ge.s32.totalorder %s15_s18, 4  }
 0x399   :  { %14 = sbr.rel (!%p12_p4) target bundleno = 1 (0x1), region = 70 }

</bundles_post_ra>
